<compile_context>
chip_gen: v5e
topology: v5e:2x2
jax: 0.10.0
libtpu: 0.0.40
codegen_flags: <defaults>
</compile_context>

<pallas_src>
import numpy as np

import jax
import jax.numpy as jnp
from jax.experimental import pallas as pl
from jax.experimental.pallas import tpu as pltpu

CPAD = 128   # lane-padded channel width for every layer (lane-dense stores / MXU N-dim)
KPAD = 8     # sublane-padded reduction dim for the 1x1 layer-1 GEMM
BN_EPS = 1e-5


# --------------------------------------------------------------------------
# Fused kernel: conv1(1x1) -> BN -> ReLU -> conv2(3x3) -> BN -> ReLU
#               -> conv3(3x3) -> BN -> ReLU, all in VMEM.
# --------------------------------------------------------------------------
def encoder_kernel(p1_ref, w1_ref, g1_ref, beta1_ref,
                   sel2_ref, w2_ref, g2_ref, beta2_ref,
                   sel3_ref, w3_ref, g3_ref, beta3_ref,
                   o_ref):
    def bn_relu(y, gamma, beta):
        # Training-mode BatchNorm (batch mean / biased variance) folded to an
        # FMA.  Centered form (not E[x^2]-E[x]^2) for numerical robustness;
        # the centering is needed for the variance anyway.
        m_rows = y.shape[0]
        inv_m = 1.0 / m_rows
        mean = jnp.sum(y, axis=0, keepdims=True) * inv_m          # (1, CPAD)
        c = y - mean
        var = jnp.sum(c * c, axis=0, keepdims=True) * inv_m       # (1, CPAD)
        scale = gamma * jax.lax.rsqrt(var + BN_EPS)                # EUP rsqrt
        return jnp.maximum(c * scale + beta, 0.0)

    def conv3x3(a_prev, sel_ref, w_ref):
        # y[m, co] = sum_tap sum_ci a_prev[src(m, tap), ci] * w[tap, ci, co]
        # The row gather "a_prev[src(m, tap)]" is a one-hot matmul (MXU).
        acc = jnp.dot(jnp.dot(sel_ref[0], a_prev,
                              preferred_element_type=jnp.float32),
                      w_ref[0], preferred_element_type=jnp.float32)
        for t in range(1, 9):   # static, unrolled
            gathered = jnp.dot(sel_ref[t], a_prev,
                               preferred_element_type=jnp.float32)
            acc = acc + jnp.dot(gathered, w_ref[t],
                                preferred_element_type=jnp.float32)
        return acc

    # ---- layer 1: 1x1 conv == single GEMM (conv bias omitted: cancels in BN)
    y1 = jnp.dot(p1_ref[...], w1_ref[...], preferred_element_type=jnp.float32)
    a1 = bn_relu(y1, g1_ref[...], beta1_ref[...])                  # (M1, CPAD)

    # ---- layer 2: 3x3 conv via in-VMEM one-hot gather + GEMM
    y2 = conv3x3(a1, sel2_ref, w2_ref)                             # (M2, CPAD)
    a2 = bn_relu(y2, g2_ref[...], beta2_ref[...])

    # ---- layer 3
    y3 = conv3x3(a2, sel3_ref, w3_ref)                             # (M3, CPAD)
    o_ref[...] = bn_relu(y3, g3_ref[...], beta3_ref[...])


# --------------------------------------------------------------------------
# Host-side (static) helpers
# --------------------------------------------------------------------------
def _out_size(size, k, stride, pad):
    return (size + 2 * pad - k) // stride + 1


def _build_selection(batch, ih, iw, oh, ow, k, stride, pad):
    """One-hot gather matrices: sel[tap, out_row, in_row] = 1 selects the input
    row feeding conv tap (kh, kw); all-zero rows encode the zero padding."""
    sel = np.zeros((k * k, batch * oh * ow, batch * ih * iw), np.float32)
    for n in range(batch):
        for y in range(oh):
            for x in range(ow):
                m = (n * oh + y) * ow + x
                for kh in range(k):
                    for kw in range(k):
                        ih_ = y * stride - pad + kh
                        iw_ = x * stride - pad + kw
                        if 0 <= ih_ < ih and 0 <= iw_ < iw:
                            sel[kh * k + kw, m, (n * ih + ih_) * iw + iw_] = 1.0
    return jnp.asarray(sel)


def init_params(key, image_channel_size, conv_channel_size):
    """Synthetic parameters matching Encoder.__init__ shapes.

    Returns (kernel_params, raw_layers).  Conv biases are created (to mirror
    the PyTorch module) but NOT passed to the kernel: a per-channel constant
    is removed exactly by training-mode BatchNorm's mean subtraction.
    """
    c1 = conv_channel_size
    c2 = conv_channel_size * 2
    c3 = conv_channel_size * 4
    cfgs = [(image_channel_size, c1, 1), (c1, c2, 3), (c2, c3, 3)]

    raw = []
    for cin, cout, k in cfgs:
        key, kw, kb, kg, kbt = jax.random.split(key, 5)
        w = jax.random.normal(kw, (cout, cin, k, k), jnp.float32) * 0.1  # OIHW
        b = jax.random.normal(kb, (cout,), jnp.float32) * 0.05
        g = 1.0 + jax.random.normal(kg, (cout,), jnp.float32) * 0.05
        bt = jax.random.normal(kbt, (cout,), jnp.float32) * 0.05
        raw.append((w, b, g, bt))

    def pad_vec(v):
        return jnp.zeros((1, CPAD), jnp.float32).at[0, :v.shape[0]].set(v)

    def pad_w3x3(w, cin, cout):
        # (cout, cin, 3, 3) -> (tap, cin, cout), zero-padded to (9, CPAD, CPAD)
        wt = jnp.transpose(w.reshape(cout, cin, 9), (2, 1, 0))
        return jnp.zeros((9, CPAD, CPAD), jnp.float32).at[:, :cin, :cout].set(wt)

    (w1, _, g1, bt1), (w2, _, g2, bt2), (w3, _, g3, bt3) = raw
    w1p = jnp.zeros((KPAD, CPAD), jnp.float32).at[
        :image_channel_size, :c1].set(jnp.transpose(w1[:, :, 0, 0], (1, 0)))

    kparams = dict(
        w1=w1p, g1=pad_vec(g1), b1=pad_vec(bt1),
        w2=pad_w3x3(w2, c1, c2), g2=pad_vec(g2), b2=pad_vec(bt2),
        w3=pad_w3x3(w3, c2, c3), g3=pad_vec(g3), b3=pad_vec(bt3),
    )
    return kparams, raw


def build_encoder_forward(image_channel_size, conv_channel_size, batch, height, width):
    """Returns a jitted forward(x_nchw, kernel_params) -> (batch, C3*OH3*OW3)."""
    c3 = conv_channel_size * 4
    stride, pad = 2, 1
    oh1, ow1 = _out_size(height, 1, stride, pad), _out_size(width, 1, stride, pad)
    oh2, ow2 = _out_size(oh1, 3, stride, pad), _out_size(ow1, 3, stride, pad)
    oh3, ow3 = _out_size(oh2, 3, stride, pad), _out_size(ow2, 3, stride, pad)
    m1 = batch * oh1 * ow1
    m3 = batch * oh3 * ow3

    # Compile-time constant gather matrices for the in-kernel 3x3 im2col.
    sel2 = _build_selection(batch, oh1, ow1, oh2, ow2, 3, stride, pad)
    sel3 = _build_selection(batch, oh2, ow2, oh3, ow3, 3, stride, pad)

    vmem = pl.BlockSpec(memory_space=pltpu.MemorySpace.VMEM)
    fused = pl.pallas_call(
        encoder_kernel,
        out_shape=jax.ShapeDtypeStruct((m3, CPAD), jnp.float32),
        in_specs=[vmem] * 12,
        out_specs=vmem,
    )

    def forward(x_nchw, kp):
        x = jnp.transpose(x_nchw, (0, 2, 3, 1)).astype(jnp.float32)     # NHWC
        xp = jnp.pad(x, ((0, 0), (pad, pad), (pad, pad), (0, 0)))
        # Layer-1 patches: 1x1 kernel -> pure strided subsample (no im2col blowup)
        p1 = xp[:, 0:(oh1 - 1) * stride + 1:stride,
                0:(ow1 - 1) * stride + 1:stride, :]
        p1 = p1.reshape(m1, image_channel_size)
        p1 = jnp.pad(p1, ((0, 0), (0, KPAD - image_channel_size)))

        a3 = fused(p1, kp["w1"], kp["g1"], kp["b1"],
                   sel2, kp["w2"], kp["g2"], kp["b2"],
                   sel3, kp["w3"], kp["g3"], kp["b3"])                   # (M3, CPAD)

        # Flatten in NCHW order to match torch `x.view(batch, -1)`.
        y = a3[:, :c3].reshape(batch, oh3, ow3, c3)
        return jnp.transpose(y, (0, 3, 1, 2)).reshape(batch, -1)

    return jax.jit(forward)


# --------------------------------------------------------------------------
# Pure-JAX reference (faithful to the PyTorch module, bias included)
# --------------------------------------------------------------------------
def reference_forward(x_nchw, raw):
    x = x_nchw.astype(jnp.float32)
    for (w, b, g, bt) in raw:
        y = jax.lax.conv_general_dilated(
            x, w, window_strides=(2, 2), padding=[(1, 1), (1, 1)],
            dimension_numbers=("NCHW", "OIHW", "NCHW"),
            precision=jax.lax.Precision.HIGHEST)
        y = y + b[None, :, None, None]
        mean = jnp.mean(y, axis=(0, 2, 3), keepdims=True)
        var = jnp.var(y, axis=(0, 2, 3), keepdims=True)        # biased, train-mode BN
        y = (y - mean) * jax.lax.rsqrt(var + BN_EPS)
        y = y * g[None, :, None, None] + bt[None, :, None, None]
        x = jnp.maximum(y, 0.0)
    return x.reshape(x.shape[0], -1)


if __name__ == "__main__":
    image_channel_size = 4
    conv_channel_size = 8
    batch, spatial = 2, 16

    key = jax.random.PRNGKey(0)
    pkey, xkey = jax.random.split(key)
    kparams, raw = init_params(pkey, image_channel_size, conv_channel_size)
    x = jax.random.normal(
        xkey, (batch, image_channel_size, spatial, spatial), jnp.float32)

    forward = build_encoder_forward(
        image_channel_size, conv_channel_size, batch, spatial, spatial)
    out = jax.block_until_ready(forward(x, kparams))

    # Shape check: 16 -(k1,s2,p1)-> 9 -(k3,s2,p1)-> 5 -(k3,s2,p1)-> 3
    expected = (batch, conv_channel_size * 4 * 3 * 3)
    assert out.shape == expected, (out.shape, expected)
    assert bool(jnp.all(jnp.isfinite(out)))

    ref = reference_forward(x, raw)
    max_err = float(jnp.max(jnp.abs(out - ref)))
    assert max_err < 2e-2, f"max abs error vs reference: {max_err}"

    print("KERNEL_OK")
</pallas_src>

<mosaic_0001>
module attributes {stable_mosaic.version = 11 : i64} {
  func.func @encoder_kernel(%arg0: memref<162x8xf32, #tpu.memory_space<vmem>>, %arg1: memref<8x128xf32, #tpu.memory_space<vmem>>, %arg2: memref<1x128xf32, #tpu.memory_space<vmem>>, %arg3: memref<1x128xf32, #tpu.memory_space<vmem>>, %arg4: memref<9x50x162xf32, #tpu.memory_space<vmem>>, %arg5: memref<9x128x128xf32, #tpu.memory_space<vmem>>, %arg6: memref<1x128xf32, #tpu.memory_space<vmem>>, %arg7: memref<1x128xf32, #tpu.memory_space<vmem>>, %arg8: memref<9x18x50xf32, #tpu.memory_space<vmem>>, %arg9: memref<9x128x128xf32, #tpu.memory_space<vmem>>, %arg10: memref<1x128xf32, #tpu.memory_space<vmem>>, %arg11: memref<1x128xf32, #tpu.memory_space<vmem>>, %arg12: memref<18x128xf32, #tpu.memory_space<vmem>>) attributes {dimension_semantics = [], scalar_prefetch = 0 : i64, scratch_operands = 0 : i64, tpu.core_type = #tpu.core_type<tc>} {
    %c0 = arith.constant 0 : index
    %c0_0 = arith.constant 0 : index
    %0 = vector.load %arg0[%c0, %c0_0] : memref<162x8xf32, #tpu.memory_space<vmem>>, vector<162x8xf32>
    %c0_1 = arith.constant 0 : index
    %c0_2 = arith.constant 0 : index
    %1 = vector.load %arg1[%c0_1, %c0_2] : memref<8x128xf32, #tpu.memory_space<vmem>>, vector<8x128xf32>
    %cst = arith.constant dense<0.000000e+00> : vector<162x128xf32>
    %2 = tpu.matmul %0, %1, %cst {dimension_numbers = #tpu.dot_dimension_numbers<[1], [0], [0], [1], [0, 0, 1, 1], [], []>} : vector<162x8xf32>, vector<8x128xf32>, vector<162x128xf32> -> vector<162x128xf32>
    %c0_3 = arith.constant 0 : index
    %c0_4 = arith.constant 0 : index
    %3 = vector.load %arg2[%c0_3, %c0_4] : memref<1x128xf32, #tpu.memory_space<vmem>>, vector<1x128xf32>
    %c0_5 = arith.constant 0 : index
    %c0_6 = arith.constant 0 : index
    %4 = vector.load %arg3[%c0_5, %c0_6] : memref<1x128xf32, #tpu.memory_space<vmem>>, vector<1x128xf32>
    %cst_7 = arith.constant dense<0.000000e+00> : vector<128xf32>
    %5 = vector.multi_reduction <add>, %2, %cst_7 [0] : vector<162x128xf32> to vector<128xf32>
    %6 = vector.shape_cast %5 : vector<128xf32> to vector<1x128xf32>
    %cst_8 = arith.constant 0.00617283955 : f32
    %7 = vector.broadcast %cst_8 : f32 to vector<1x128xf32>
    %8 = arith.mulf %6, %7 : vector<1x128xf32>
    %9 = vector.broadcast %8 : vector<1x128xf32> to vector<162x128xf32>
    %10 = arith.subf %2, %9 : vector<162x128xf32>
    %11 = arith.mulf %10, %10 : vector<162x128xf32>
    %cst_9 = arith.constant dense<0.000000e+00> : vector<128xf32>
    %12 = vector.multi_reduction <add>, %11, %cst_9 [0] : vector<162x128xf32> to vector<128xf32>
    %13 = vector.shape_cast %12 : vector<128xf32> to vector<1x128xf32>
    %cst_10 = arith.constant 0.00617283955 : f32
    %14 = vector.broadcast %cst_10 : f32 to vector<1x128xf32>
    %15 = arith.mulf %13, %14 : vector<1x128xf32>
    %cst_11 = arith.constant 9.99999974E-6 : f32
    %16 = vector.broadcast %cst_11 : f32 to vector<1x128xf32>
    %17 = arith.addf %15, %16 : vector<1x128xf32>
    %18 = math.rsqrt %17 : vector<1x128xf32>
    %19 = arith.mulf %3, %18 : vector<1x128xf32>
    %20 = vector.broadcast %19 : vector<1x128xf32> to vector<162x128xf32>
    %21 = arith.mulf %10, %20 : vector<162x128xf32>
    %22 = vector.broadcast %4 : vector<1x128xf32> to vector<162x128xf32>
    %23 = arith.addf %21, %22 : vector<162x128xf32>
    %cst_12 = arith.constant 0.000000e+00 : f32
    %24 = vector.broadcast %cst_12 : f32 to vector<162x128xf32>
    %25 = arith.maximumf %23, %24 : vector<162x128xf32>
    %c0_13 = arith.constant 0 : index
    %c0_14 = arith.constant 0 : index
    %c0_15 = arith.constant 0 : index
    %26 = vector.load %arg4[%c0_13, %c0_14, %c0_15] : memref<9x50x162xf32, #tpu.memory_space<vmem>>, vector<1x50x162xf32>
    %27 = vector.shape_cast %26 : vector<1x50x162xf32> to vector<50x162xf32>
    %cst_16 = arith.constant dense<0.000000e+00> : vector<50x128xf32>
    %28 = tpu.matmul %27, %25, %cst_16 {dimension_numbers = #tpu.dot_dimension_numbers<[1], [0], [0], [1], [0, 0, 1, 1], [], []>} : vector<50x162xf32>, vector<162x128xf32>, vector<50x128xf32> -> vector<50x128xf32>
    %c0_17 = arith.constant 0 : index
    %c0_18 = arith.constant 0 : index
    %c0_19 = arith.constant 0 : index
    %29 = vector.load %arg5[%c0_17, %c0_18, %c0_19] : memref<9x128x128xf32, #tpu.memory_space<vmem>>, vector<1x128x128xf32>
    %30 = vector.shape_cast %29 : vector<1x128x128xf32> to vector<128x128xf32>
    %cst_20 = arith.constant dense<0.000000e+00> : vector<50x128xf32>
    %31 = tpu.matmul %28, %30, %cst_20 {dimension_numbers = #tpu.dot_dimension_numbers<[1], [0], [0], [1], [0, 0, 1, 1], [], []>} : vector<50x128xf32>, vector<128x128xf32>, vector<50x128xf32> -> vector<50x128xf32>
    %c1 = arith.constant 1 : index
    %c0_21 = arith.constant 0 : index
    %c0_22 = arith.constant 0 : index
    %32 = vector.load %arg4[%c1, %c0_21, %c0_22] : memref<9x50x162xf32, #tpu.memory_space<vmem>>, vector<1x50x162xf32>
    %33 = vector.shape_cast %32 : vector<1x50x162xf32> to vector<50x162xf32>
    %cst_23 = arith.constant dense<0.000000e+00> : vector<50x128xf32>
    %34 = tpu.matmul %33, %25, %cst_23 {dimension_numbers = #tpu.dot_dimension_numbers<[1], [0], [0], [1], [0, 0, 1, 1], [], []>} : vector<50x162xf32>, vector<162x128xf32>, vector<50x128xf32> -> vector<50x128xf32>
    %c1_24 = arith.constant 1 : index
    %c0_25 = arith.constant 0 : index
    %c0_26 = arith.constant 0 : index
    %35 = vector.load %arg5[%c1_24, %c0_25, %c0_26] : memref<9x128x128xf32, #tpu.memory_space<vmem>>, vector<1x128x128xf32>
    %36 = vector.shape_cast %35 : vector<1x128x128xf32> to vector<128x128xf32>
    %cst_27 = arith.constant dense<0.000000e+00> : vector<50x128xf32>
    %37 = tpu.matmul %34, %36, %cst_27 {dimension_numbers = #tpu.dot_dimension_numbers<[1], [0], [0], [1], [0, 0, 1, 1], [], []>} : vector<50x128xf32>, vector<128x128xf32>, vector<50x128xf32> -> vector<50x128xf32>
    %38 = arith.addf %31, %37 : vector<50x128xf32>
    %c2 = arith.constant 2 : index
    %c0_28 = arith.constant 0 : index
    %c0_29 = arith.constant 0 : index
    %39 = vector.load %arg4[%c2, %c0_28, %c0_29] : memref<9x50x162xf32, #tpu.memory_space<vmem>>, vector<1x50x162xf32>
    %40 = vector.shape_cast %39 : vector<1x50x162xf32> to vector<50x162xf32>
    %cst_30 = arith.constant dense<0.000000e+00> : vector<50x128xf32>
    %41 = tpu.matmul %40, %25, %cst_30 {dimension_numbers = #tpu.dot_dimension_numbers<[1], [0], [0], [1], [0, 0, 1, 1], [], []>} : vector<50x162xf32>, vector<162x128xf32>, vector<50x128xf32> -> vector<50x128xf32>
    %c2_31 = arith.constant 2 : index
    %c0_32 = arith.constant 0 : index
    %c0_33 = arith.constant 0 : index
    %42 = vector.load %arg5[%c2_31, %c0_32, %c0_33] : memref<9x128x128xf32, #tpu.memory_space<vmem>>, vector<1x128x128xf32>
    %43 = vector.shape_cast %42 : vector<1x128x128xf32> to vector<128x128xf32>
    %cst_34 = arith.constant dense<0.000000e+00> : vector<50x128xf32>
    %44 = tpu.matmul %41, %43, %cst_34 {dimension_numbers = #tpu.dot_dimension_numbers<[1], [0], [0], [1], [0, 0, 1, 1], [], []>} : vector<50x128xf32>, vector<128x128xf32>, vector<50x128xf32> -> vector<50x128xf32>
    %45 = arith.addf %38, %44 : vector<50x128xf32>
    %c3 = arith.constant 3 : index
    %c0_35 = arith.constant 0 : index
    %c0_36 = arith.constant 0 : index
    %46 = vector.load %arg4[%c3, %c0_35, %c0_36] : memref<9x50x162xf32, #tpu.memory_space<vmem>>, vector<1x50x162xf32>
    %47 = vector.shape_cast %46 : vector<1x50x162xf32> to vector<50x162xf32>
    %cst_37 = arith.constant dense<0.000000e+00> : vector<50x128xf32>
    %48 = tpu.matmul %47, %25, %cst_37 {dimension_numbers = #tpu.dot_dimension_numbers<[1], [0], [0], [1], [0, 0, 1, 1], [], []>} : vector<50x162xf32>, vector<162x128xf32>, vector<50x128xf32> -> vector<50x128xf32>
    %c3_38 = arith.constant 3 : index
    %c0_39 = arith.constant 0 : index
    %c0_40 = arith.constant 0 : index
    %49 = vector.load %arg5[%c3_38, %c0_39, %c0_40] : memref<9x128x128xf32, #tpu.memory_space<vmem>>, vector<1x128x128xf32>
    %50 = vector.shape_cast %49 : vector<1x128x128xf32> to vector<128x128xf32>
    %cst_41 = arith.constant dense<0.000000e+00> : vector<50x128xf32>
    %51 = tpu.matmul %48, %50, %cst_41 {dimension_numbers = #tpu.dot_dimension_numbers<[1], [0], [0], [1], [0, 0, 1, 1], [], []>} : vector<50x128xf32>, vector<128x128xf32>, vector<50x128xf32> -> vector<50x128xf32>
    %52 = arith.addf %45, %51 : vector<50x128xf32>
    %c4 = arith.constant 4 : index
    %c0_42 = arith.constant 0 : index
    %c0_43 = arith.constant 0 : index
    %53 = vector.load %arg4[%c4, %c0_42, %c0_43] : memref<9x50x162xf32, #tpu.memory_space<vmem>>, vector<1x50x162xf32>
    %54 = vector.shape_cast %53 : vector<1x50x162xf32> to vector<50x162xf32>
    %cst_44 = arith.constant dense<0.000000e+00> : vector<50x128xf32>
    %55 = tpu.matmul %54, %25, %cst_44 {dimension_numbers = #tpu.dot_dimension_numbers<[1], [0], [0], [1], [0, 0, 1, 1], [], []>} : vector<50x162xf32>, vector<162x128xf32>, vector<50x128xf32> -> vector<50x128xf32>
    %c4_45 = arith.constant 4 : index
    %c0_46 = arith.constant 0 : index
    %c0_47 = arith.constant 0 : index
    %56 = vector.load %arg5[%c4_45, %c0_46, %c0_47] : memref<9x128x128xf32, #tpu.memory_space<vmem>>, vector<1x128x128xf32>
    %57 = vector.shape_cast %56 : vector<1x128x128xf32> to vector<128x128xf32>
    %cst_48 = arith.constant dense<0.000000e+00> : vector<50x128xf32>
    %58 = tpu.matmul %55, %57, %cst_48 {dimension_numbers = #tpu.dot_dimension_numbers<[1], [0], [0], [1], [0, 0, 1, 1], [], []>} : vector<50x128xf32>, vector<128x128xf32>, vector<50x128xf32> -> vector<50x128xf32>
    %59 = arith.addf %52, %58 : vector<50x128xf32>
    %c5 = arith.constant 5 : index
    %c0_49 = arith.constant 0 : index
    %c0_50 = arith.constant 0 : index
    %60 = vector.load %arg4[%c5, %c0_49, %c0_50] : memref<9x50x162xf32, #tpu.memory_space<vmem>>, vector<1x50x162xf32>
    %61 = vector.shape_cast %60 : vector<1x50x162xf32> to vector<50x162xf32>
    %cst_51 = arith.constant dense<0.000000e+00> : vector<50x128xf32>
    %62 = tpu.matmul %61, %25, %cst_51 {dimension_numbers = #tpu.dot_dimension_numbers<[1], [0], [0], [1], [0, 0, 1, 1], [], []>} : vector<50x162xf32>, vector<162x128xf32>, vector<50x128xf32> -> vector<50x128xf32>
    %c5_52 = arith.constant 5 : index
    %c0_53 = arith.constant 0 : index
    %c0_54 = arith.constant 0 : index
    %63 = vector.load %arg5[%c5_52, %c0_53, %c0_54] : memref<9x128x128xf32, #tpu.memory_space<vmem>>, vector<1x128x128xf32>
    %64 = vector.shape_cast %63 : vector<1x128x128xf32> to vector<128x128xf32>
    %cst_55 = arith.constant dense<0.000000e+00> : vector<50x128xf32>
    %65 = tpu.matmul %62, %64, %cst_55 {dimension_numbers = #tpu.dot_dimension_numbers<[1], [0], [0], [1], [0, 0, 1, 1], [], []>} : vector<50x128xf32>, vector<128x128xf32>, vector<50x128xf32> -> vector<50x128xf32>
    %66 = arith.addf %59, %65 : vector<50x128xf32>
    %c6 = arith.constant 6 : index
    %c0_56 = arith.constant 0 : index
    %c0_57 = arith.constant 0 : index
    %67 = vector.load %arg4[%c6, %c0_56, %c0_57] : memref<9x50x162xf32, #tpu.memory_space<vmem>>, vector<1x50x162xf32>
    %68 = vector.shape_cast %67 : vector<1x50x162xf32> to vector<50x162xf32>
    %cst_58 = arith.constant dense<0.000000e+00> : vector<50x128xf32>
    %69 = tpu.matmul %68, %25, %cst_58 {dimension_numbers = #tpu.dot_dimension_numbers<[1], [0], [0], [1], [0, 0, 1, 1], [], []>} : vector<50x162xf32>, vector<162x128xf32>, vector<50x128xf32> -> vector<50x128xf32>
    %c6_59 = arith.constant 6 : index
    %c0_60 = arith.constant 0 : index
    %c0_61 = arith.constant 0 : index
    %70 = vector.load %arg5[%c6_59, %c0_60, %c0_61] : memref<9x128x128xf32, #tpu.memory_space<vmem>>, vector<1x128x128xf32>
    %71 = vector.shape_cast %70 : vector<1x128x128xf32> to vector<128x128xf32>
    %cst_62 = arith.constant dense<0.000000e+00> : vector<50x128xf32>
    %72 = tpu.matmul %69, %71, %cst_62 {dimension_numbers = #tpu.dot_dimension_numbers<[1], [0], [0], [1], [0, 0, 1, 1], [], []>} : vector<50x128xf32>, vector<128x128xf32>, vector<50x128xf32> -> vector<50x128xf32>
    %73 = arith.addf %66, %72 : vector<50x128xf32>
    %c7 = arith.constant 7 : index
    %c0_63 = arith.constant 0 : index
    %c0_64 = arith.constant 0 : index
    %74 = vector.load %arg4[%c7, %c0_63, %c0_64] : memref<9x50x162xf32, #tpu.memory_space<vmem>>, vector<1x50x162xf32>
    %75 = vector.shape_cast %74 : vector<1x50x162xf32> to vector<50x162xf32>
    %cst_65 = arith.constant dense<0.000000e+00> : vector<50x128xf32>
    %76 = tpu.matmul %75, %25, %cst_65 {dimension_numbers = #tpu.dot_dimension_numbers<[1], [0], [0], [1], [0, 0, 1, 1], [], []>} : vector<50x162xf32>, vector<162x128xf32>, vector<50x128xf32> -> vector<50x128xf32>
    %c7_66 = arith.constant 7 : index
    %c0_67 = arith.constant 0 : index
    %c0_68 = arith.constant 0 : index
    %77 = vector.load %arg5[%c7_66, %c0_67, %c0_68] : memref<9x128x128xf32, #tpu.memory_space<vmem>>, vector<1x128x128xf32>
    %78 = vector.shape_cast %77 : vector<1x128x128xf32> to vector<128x128xf32>
    %cst_69 = arith.constant dense<0.000000e+00> : vector<50x128xf32>
    %79 = tpu.matmul %76, %78, %cst_69 {dimension_numbers = #tpu.dot_dimension_numbers<[1], [0], [0], [1], [0, 0, 1, 1], [], []>} : vector<50x128xf32>, vector<128x128xf32>, vector<50x128xf32> -> vector<50x128xf32>
    %80 = arith.addf %73, %79 : vector<50x128xf32>
    %c8 = arith.constant 8 : index
    %c0_70 = arith.constant 0 : index
    %c0_71 = arith.constant 0 : index
    %81 = vector.load %arg4[%c8, %c0_70, %c0_71] : memref<9x50x162xf32, #tpu.memory_space<vmem>>, vector<1x50x162xf32>
    %82 = vector.shape_cast %81 : vector<1x50x162xf32> to vector<50x162xf32>
    %cst_72 = arith.constant dense<0.000000e+00> : vector<50x128xf32>
    %83 = tpu.matmul %82, %25, %cst_72 {dimension_numbers = #tpu.dot_dimension_numbers<[1], [0], [0], [1], [0, 0, 1, 1], [], []>} : vector<50x162xf32>, vector<162x128xf32>, vector<50x128xf32> -> vector<50x128xf32>
    %c8_73 = arith.constant 8 : index
    %c0_74 = arith.constant 0 : index
    %c0_75 = arith.constant 0 : index
    %84 = vector.load %arg5[%c8_73, %c0_74, %c0_75] : memref<9x128x128xf32, #tpu.memory_space<vmem>>, vector<1x128x128xf32>
    %85 = vector.shape_cast %84 : vector<1x128x128xf32> to vector<128x128xf32>
    %cst_76 = arith.constant dense<0.000000e+00> : vector<50x128xf32>
    %86 = tpu.matmul %83, %85, %cst_76 {dimension_numbers = #tpu.dot_dimension_numbers<[1], [0], [0], [1], [0, 0, 1, 1], [], []>} : vector<50x128xf32>, vector<128x128xf32>, vector<50x128xf32> -> vector<50x128xf32>
    %87 = arith.addf %80, %86 : vector<50x128xf32>
    %c0_77 = arith.constant 0 : index
    %c0_78 = arith.constant 0 : index
    %88 = vector.load %arg6[%c0_77, %c0_78] : memref<1x128xf32, #tpu.memory_space<vmem>>, vector<1x128xf32>
    %c0_79 = arith.constant 0 : index
    %c0_80 = arith.constant 0 : index
    %89 = vector.load %arg7[%c0_79, %c0_80] : memref<1x128xf32, #tpu.memory_space<vmem>>, vector<1x128xf32>
    %cst_81 = arith.constant dense<0.000000e+00> : vector<128xf32>
    %90 = vector.multi_reduction <add>, %87, %cst_81 [0] : vector<50x128xf32> to vector<128xf32>
    %91 = vector.shape_cast %90 : vector<128xf32> to vector<1x128xf32>
    %cst_82 = arith.constant 2.000000e-02 : f32
    %92 = vector.broadcast %cst_82 : f32 to vector<1x128xf32>
    %93 = arith.mulf %91, %92 : vector<1x128xf32>
    %94 = vector.broadcast %93 : vector<1x128xf32> to vector<50x128xf32>
    %95 = arith.subf %87, %94 : vector<50x128xf32>
    %96 = arith.mulf %95, %95 : vector<50x128xf32>
    %cst_83 = arith.constant dense<0.000000e+00> : vector<128xf32>
    %97 = vector.multi_reduction <add>, %96, %cst_83 [0] : vector<50x128xf32> to vector<128xf32>
    %98 = vector.shape_cast %97 : vector<128xf32> to vector<1x128xf32>
    %cst_84 = arith.constant 2.000000e-02 : f32
    %99 = vector.broadcast %cst_84 : f32 to vector<1x128xf32>
    %100 = arith.mulf %98, %99 : vector<1x128xf32>
    %cst_85 = arith.constant 9.99999974E-6 : f32
    %101 = vector.broadcast %cst_85 : f32 to vector<1x128xf32>
    %102 = arith.addf %100, %101 : vector<1x128xf32>
    %103 = math.rsqrt %102 : vector<1x128xf32>
    %104 = arith.mulf %88, %103 : vector<1x128xf32>
    %105 = vector.broadcast %104 : vector<1x128xf32> to vector<50x128xf32>
    %106 = arith.mulf %95, %105 : vector<50x128xf32>
    %107 = vector.broadcast %89 : vector<1x128xf32> to vector<50x128xf32>
    %108 = arith.addf %106, %107 : vector<50x128xf32>
    %cst_86 = arith.constant 0.000000e+00 : f32
    %109 = vector.broadcast %cst_86 : f32 to vector<50x128xf32>
    %110 = arith.maximumf %108, %109 : vector<50x128xf32>
    %c0_87 = arith.constant 0 : index
    %c0_88 = arith.constant 0 : index
    %c0_89 = arith.constant 0 : index
    %111 = vector.load %arg8[%c0_87, %c0_88, %c0_89] : memref<9x18x50xf32, #tpu.memory_space<vmem>>, vector<1x18x50xf32>
    %112 = vector.shape_cast %111 : vector<1x18x50xf32> to vector<18x50xf32>
    %cst_90 = arith.constant dense<0.000000e+00> : vector<18x128xf32>
    %113 = tpu.matmul %112, %110, %cst_90 {dimension_numbers = #tpu.dot_dimension_numbers<[1], [0], [0], [1], [0, 0, 1, 1], [], []>} : vector<18x50xf32>, vector<50x128xf32>, vector<18x128xf32> -> vector<18x128xf32>
    %c0_91 = arith.constant 0 : index
    %c0_92 = arith.constant 0 : index
    %c0_93 = arith.constant 0 : index
    %114 = vector.load %arg9[%c0_91, %c0_92, %c0_93] : memref<9x128x128xf32, #tpu.memory_space<vmem>>, vector<1x128x128xf32>
    %115 = vector.shape_cast %114 : vector<1x128x128xf32> to vector<128x128xf32>
    %cst_94 = arith.constant dense<0.000000e+00> : vector<18x128xf32>
    %116 = tpu.matmul %113, %115, %cst_94 {dimension_numbers = #tpu.dot_dimension_numbers<[1], [0], [0], [1], [0, 0, 1, 1], [], []>} : vector<18x128xf32>, vector<128x128xf32>, vector<18x128xf32> -> vector<18x128xf32>
    %c1_95 = arith.constant 1 : index
    %c0_96 = arith.constant 0 : index
    %c0_97 = arith.constant 0 : index
    %117 = vector.load %arg8[%c1_95, %c0_96, %c0_97] : memref<9x18x50xf32, #tpu.memory_space<vmem>>, vector<1x18x50xf32>
    %118 = vector.shape_cast %117 : vector<1x18x50xf32> to vector<18x50xf32>
    %cst_98 = arith.constant dense<0.000000e+00> : vector<18x128xf32>
    %119 = tpu.matmul %118, %110, %cst_98 {dimension_numbers = #tpu.dot_dimension_numbers<[1], [0], [0], [1], [0, 0, 1, 1], [], []>} : vector<18x50xf32>, vector<50x128xf32>, vector<18x128xf32> -> vector<18x128xf32>
    %c1_99 = arith.constant 1 : index
    %c0_100 = arith.constant 0 : index
    %c0_101 = arith.constant 0 : index
    %120 = vector.load %arg9[%c1_99, %c0_100, %c0_101] : memref<9x128x128xf32, #tpu.memory_space<vmem>>, vector<1x128x128xf32>
    %121 = vector.shape_cast %120 : vector<1x128x128xf32> to vector<128x128xf32>
    %cst_102 = arith.constant dense<0.000000e+00> : vector<18x128xf32>
    %122 = tpu.matmul %119, %121, %cst_102 {dimension_numbers = #tpu.dot_dimension_numbers<[1], [0], [0], [1], [0, 0, 1, 1], [], []>} : vector<18x128xf32>, vector<128x128xf32>, vector<18x128xf32> -> vector<18x128xf32>
    %123 = arith.addf %116, %122 : vector<18x128xf32>
    %c2_103 = arith.constant 2 : index
    %c0_104 = arith.constant 0 : index
    %c0_105 = arith.constant 0 : index
    %124 = vector.load %arg8[%c2_103, %c0_104, %c0_105] : memref<9x18x50xf32, #tpu.memory_space<vmem>>, vector<1x18x50xf32>
    %125 = vector.shape_cast %124 : vector<1x18x50xf32> to vector<18x50xf32>
    %cst_106 = arith.constant dense<0.000000e+00> : vector<18x128xf32>
    %126 = tpu.matmul %125, %110, %cst_106 {dimension_numbers = #tpu.dot_dimension_numbers<[1], [0], [0], [1], [0, 0, 1, 1], [], []>} : vector<18x50xf32>, vector<50x128xf32>, vector<18x128xf32> -> vector<18x128xf32>
    %c2_107 = arith.constant 2 : index
    %c0_108 = arith.constant 0 : index
    %c0_109 = arith.constant 0 : index
    %127 = vector.load %arg9[%c2_107, %c0_108, %c0_109] : memref<9x128x128xf32, #tpu.memory_space<vmem>>, vector<1x128x128xf32>
    %128 = vector.shape_cast %127 : vector<1x128x128xf32> to vector<128x128xf32>
    %cst_110 = arith.constant dense<0.000000e+00> : vector<18x128xf32>
    %129 = tpu.matmul %126, %128, %cst_110 {dimension_numbers = #tpu.dot_dimension_numbers<[1], [0], [0], [1], [0, 0, 1, 1], [], []>} : vector<18x128xf32>, vector<128x128xf32>, vector<18x128xf32> -> vector<18x128xf32>
    %130 = arith.addf %123, %129 : vector<18x128xf32>
    %c3_111 = arith.constant 3 : index
    %c0_112 = arith.constant 0 : index
    %c0_113 = arith.constant 0 : index
    %131 = vector.load %arg8[%c3_111, %c0_112, %c0_113] : memref<9x18x50xf32, #tpu.memory_space<vmem>>, vector<1x18x50xf32>
    %132 = vector.shape_cast %131 : vector<1x18x50xf32> to vector<18x50xf32>
    %cst_114 = arith.constant dense<0.000000e+00> : vector<18x128xf32>
    %133 = tpu.matmul %132, %110, %cst_114 {dimension_numbers = #tpu.dot_dimension_numbers<[1], [0], [0], [1], [0, 0, 1, 1], [], []>} : vector<18x50xf32>, vector<50x128xf32>, vector<18x128xf32> -> vector<18x128xf32>
    %c3_115 = arith.constant 3 : index
    %c0_116 = arith.constant 0 : index
    %c0_117 = arith.constant 0 : index
    %134 = vector.load %arg9[%c3_115, %c0_116, %c0_117] : memref<9x128x128xf32, #tpu.memory_space<vmem>>, vector<1x128x128xf32>
    %135 = vector.shape_cast %134 : vector<1x128x128xf32> to vector<128x128xf32>
    %cst_118 = arith.constant dense<0.000000e+00> : vector<18x128xf32>
    %136 = tpu.matmul %133, %135, %cst_118 {dimension_numbers = #tpu.dot_dimension_numbers<[1], [0], [0], [1], [0, 0, 1, 1], [], []>} : vector<18x128xf32>, vector<128x128xf32>, vector<18x128xf32> -> vector<18x128xf32>
    %137 = arith.addf %130, %136 : vector<18x128xf32>
    %c4_119 = arith.constant 4 : index
    %c0_120 = arith.constant 0 : index
    %c0_121 = arith.constant 0 : index
    %138 = vector.load %arg8[%c4_119, %c0_120, %c0_121] : memref<9x18x50xf32, #tpu.memory_space<vmem>>, vector<1x18x50xf32>
    %139 = vector.shape_cast %138 : vector<1x18x50xf32> to vector<18x50xf32>
    %cst_122 = arith.constant dense<0.000000e+00> : vector<18x128xf32>
    %140 = tpu.matmul %139, %110, %cst_122 {dimension_numbers = #tpu.dot_dimension_numbers<[1], [0], [0], [1], [0, 0, 1, 1], [], []>} : vector<18x50xf32>, vector<50x128xf32>, vector<18x128xf32> -> vector<18x128xf32>
    %c4_123 = arith.constant 4 : index
    %c0_124 = arith.constant 0 : index
    %c0_125 = arith.constant 0 : index
    %141 = vector.load %arg9[%c4_123, %c0_124, %c0_125] : memref<9x128x128xf32, #tpu.memory_space<vmem>>, vector<1x128x128xf32>
    %142 = vector.shape_cast %141 : vector<1x128x128xf32> to vector<128x128xf32>
    %cst_126 = arith.constant dense<0.000000e+00> : vector<18x128xf32>
    %143 = tpu.matmul %140, %142, %cst_126 {dimension_numbers = #tpu.dot_dimension_numbers<[1], [0], [0], [1], [0, 0, 1, 1], [], []>} : vector<18x128xf32>, vector<128x128xf32>, vector<18x128xf32> -> vector<18x128xf32>
    %144 = arith.addf %137, %143 : vector<18x128xf32>
    %c5_127 = arith.constant 5 : index
    %c0_128 = arith.constant 0 : index
    %c0_129 = arith.constant 0 : index
    %145 = vector.load %arg8[%c5_127, %c0_128, %c0_129] : memref<9x18x50xf32, #tpu.memory_space<vmem>>, vector<1x18x50xf32>
    %146 = vector.shape_cast %145 : vector<1x18x50xf32> to vector<18x50xf32>
    %cst_130 = arith.constant dense<0.000000e+00> : vector<18x128xf32>
    %147 = tpu.matmul %146, %110, %cst_130 {dimension_numbers = #tpu.dot_dimension_numbers<[1], [0], [0], [1], [0, 0, 1, 1], [], []>} : vector<18x50xf32>, vector<50x128xf32>, vector<18x128xf32> -> vector<18x128xf32>
    %c5_131 = arith.constant 5 : index
    %c0_132 = arith.constant 0 : index
    %c0_133 = arith.constant 0 : index
    %148 = vector.load %arg9[%c5_131, %c0_132, %c0_133] : memref<9x128x128xf32, #tpu.memory_space<vmem>>, vector<1x128x128xf32>
    %149 = vector.shape_cast %148 : vector<1x128x128xf32> to vector<128x128xf32>
    %cst_134 = arith.constant dense<0.000000e+00> : vector<18x128xf32>
    %150 = tpu.matmul %147, %149, %cst_134 {dimension_numbers = #tpu.dot_dimension_numbers<[1], [0], [0], [1], [0, 0, 1, 1], [], []>} : vector<18x128xf32>, vector<128x128xf32>, vector<18x128xf32> -> vector<18x128xf32>
    %151 = arith.addf %144, %150 : vector<18x128xf32>
    %c6_135 = arith.constant 6 : index
    %c0_136 = arith.constant 0 : index
    %c0_137 = arith.constant 0 : index
    %152 = vector.load %arg8[%c6_135, %c0_136, %c0_137] : memref<9x18x50xf32, #tpu.memory_space<vmem>>, vector<1x18x50xf32>
    %153 = vector.shape_cast %152 : vector<1x18x50xf32> to vector<18x50xf32>
    %cst_138 = arith.constant dense<0.000000e+00> : vector<18x128xf32>
    %154 = tpu.matmul %153, %110, %cst_138 {dimension_numbers = #tpu.dot_dimension_numbers<[1], [0], [0], [1], [0, 0, 1, 1], [], []>} : vector<18x50xf32>, vector<50x128xf32>, vector<18x128xf32> -> vector<18x128xf32>
    %c6_139 = arith.constant 6 : index
    %c0_140 = arith.constant 0 : index
    %c0_141 = arith.constant 0 : index
    %155 = vector.load %arg9[%c6_139, %c0_140, %c0_141] : memref<9x128x128xf32, #tpu.memory_space<vmem>>, vector<1x128x128xf32>
    %156 = vector.shape_cast %155 : vector<1x128x128xf32> to vector<128x128xf32>
    %cst_142 = arith.constant dense<0.000000e+00> : vector<18x128xf32>
    %157 = tpu.matmul %154, %156, %cst_142 {dimension_numbers = #tpu.dot_dimension_numbers<[1], [0], [0], [1], [0, 0, 1, 1], [], []>} : vector<18x128xf32>, vector<128x128xf32>, vector<18x128xf32> -> vector<18x128xf32>
    %158 = arith.addf %151, %157 : vector<18x128xf32>
    %c7_143 = arith.constant 7 : index
    %c0_144 = arith.constant 0 : index
    %c0_145 = arith.constant 0 : index
    %159 = vector.load %arg8[%c7_143, %c0_144, %c0_145] : memref<9x18x50xf32, #tpu.memory_space<vmem>>, vector<1x18x50xf32>
    %160 = vector.shape_cast %159 : vector<1x18x50xf32> to vector<18x50xf32>
    %cst_146 = arith.constant dense<0.000000e+00> : vector<18x128xf32>
    %161 = tpu.matmul %160, %110, %cst_146 {dimension_numbers = #tpu.dot_dimension_numbers<[1], [0], [0], [1], [0, 0, 1, 1], [], []>} : vector<18x50xf32>, vector<50x128xf32>, vector<18x128xf32> -> vector<18x128xf32>
    %c7_147 = arith.constant 7 : index
    %c0_148 = arith.constant 0 : index
    %c0_149 = arith.constant 0 : index
    %162 = vector.load %arg9[%c7_147, %c0_148, %c0_149] : memref<9x128x128xf32, #tpu.memory_space<vmem>>, vector<1x128x128xf32>
    %163 = vector.shape_cast %162 : vector<1x128x128xf32> to vector<128x128xf32>
    %cst_150 = arith.constant dense<0.000000e+00> : vector<18x128xf32>
    %164 = tpu.matmul %161, %163, %cst_150 {dimension_numbers = #tpu.dot_dimension_numbers<[1], [0], [0], [1], [0, 0, 1, 1], [], []>} : vector<18x128xf32>, vector<128x128xf32>, vector<18x128xf32> -> vector<18x128xf32>
    %165 = arith.addf %158, %164 : vector<18x128xf32>
    %c8_151 = arith.constant 8 : index
    %c0_152 = arith.constant 0 : index
    %c0_153 = arith.constant 0 : index
    %166 = vector.load %arg8[%c8_151, %c0_152, %c0_153] : memref<9x18x50xf32, #tpu.memory_space<vmem>>, vector<1x18x50xf32>
    %167 = vector.shape_cast %166 : vector<1x18x50xf32> to vector<18x50xf32>
    %cst_154 = arith.constant dense<0.000000e+00> : vector<18x128xf32>
    %168 = tpu.matmul %167, %110, %cst_154 {dimension_numbers = #tpu.dot_dimension_numbers<[1], [0], [0], [1], [0, 0, 1, 1], [], []>} : vector<18x50xf32>, vector<50x128xf32>, vector<18x128xf32> -> vector<18x128xf32>
    %c8_155 = arith.constant 8 : index
    %c0_156 = arith.constant 0 : index
    %c0_157 = arith.constant 0 : index
    %169 = vector.load %arg9[%c8_155, %c0_156, %c0_157] : memref<9x128x128xf32, #tpu.memory_space<vmem>>, vector<1x128x128xf32>
    %170 = vector.shape_cast %169 : vector<1x128x128xf32> to vector<128x128xf32>
    %cst_158 = arith.constant dense<0.000000e+00> : vector<18x128xf32>
    %171 = tpu.matmul %168, %170, %cst_158 {dimension_numbers = #tpu.dot_dimension_numbers<[1], [0], [0], [1], [0, 0, 1, 1], [], []>} : vector<18x128xf32>, vector<128x128xf32>, vector<18x128xf32> -> vector<18x128xf32>
    %172 = arith.addf %165, %171 : vector<18x128xf32>
    %c0_159 = arith.constant 0 : index
    %c0_160 = arith.constant 0 : index
    %173 = vector.load %arg10[%c0_159, %c0_160] : memref<1x128xf32, #tpu.memory_space<vmem>>, vector<1x128xf32>
    %c0_161 = arith.constant 0 : index
    %c0_162 = arith.constant 0 : index
    %174 = vector.load %arg11[%c0_161, %c0_162] : memref<1x128xf32, #tpu.memory_space<vmem>>, vector<1x128xf32>
    %cst_163 = arith.constant dense<0.000000e+00> : vector<128xf32>
    %175 = vector.multi_reduction <add>, %172, %cst_163 [0] : vector<18x128xf32> to vector<128xf32>
    %176 = vector.shape_cast %175 : vector<128xf32> to vector<1x128xf32>
    %cst_164 = arith.constant 0.055555556 : f32
    %177 = vector.broadcast %cst_164 : f32 to vector<1x128xf32>
    %178 = arith.mulf %176, %177 : vector<1x128xf32>
    %179 = vector.broadcast %178 : vector<1x128xf32> to vector<18x128xf32>
    %180 = arith.subf %172, %179 : vector<18x128xf32>
    %181 = arith.mulf %180, %180 : vector<18x128xf32>
    %cst_165 = arith.constant dense<0.000000e+00> : vector<128xf32>
    %182 = vector.multi_reduction <add>, %181, %cst_165 [0] : vector<18x128xf32> to vector<128xf32>
    %183 = vector.shape_cast %182 : vector<128xf32> to vector<1x128xf32>
    %cst_166 = arith.constant 0.055555556 : f32
    %184 = vector.broadcast %cst_166 : f32 to vector<1x128xf32>
    %185 = arith.mulf %183, %184 : vector<1x128xf32>
    %cst_167 = arith.constant 9.99999974E-6 : f32
    %186 = vector.broadcast %cst_167 : f32 to vector<1x128xf32>
    %187 = arith.addf %185, %186 : vector<1x128xf32>
    %188 = math.rsqrt %187 : vector<1x128xf32>
    %189 = arith.mulf %173, %188 : vector<1x128xf32>
    %190 = vector.broadcast %189 : vector<1x128xf32> to vector<18x128xf32>
    %191 = arith.mulf %180, %190 : vector<18x128xf32>
    %192 = vector.broadcast %174 : vector<1x128xf32> to vector<18x128xf32>
    %193 = arith.addf %191, %192 : vector<18x128xf32>
    %cst_168 = arith.constant 0.000000e+00 : f32
    %194 = vector.broadcast %cst_168 : f32 to vector<18x128xf32>
    %195 = arith.maximumf %193, %194 : vector<18x128xf32>
    %c0_169 = arith.constant 0 : index
    %c0_170 = arith.constant 0 : index
    %196 = vector.load %arg12[%c0_169, %c0_170] : memref<18x128xf32, #tpu.memory_space<vmem>>, vector<18x128xf32>
    tpu.vector_store %arg12[%c0_169, %c0_170], %195 {strides = array<i32>} : memref<18x128xf32, #tpu.memory_space<vmem>>, vector<18x128xf32>,
    return
  }
}

</mosaic_0001>

<bundles_post_ra>
// kernel: forward.1
= control target key start
LH: loop header
LB: loop body
LE: loop exit
PB: predicated region body
PF: predicated region fallthrough
CT: control target
= control target key end

     0   :  { %17 = vsyncpa [#allocation3], 0  ;;  %s4712_s0 = inlined_call_operand.vmem [shape: f32[162,8], index: 0, kind: input, shape index: {}]   ;;  %s4713_s1 = inlined_call_operand.vmem [shape: f32[8,128], index: 1, kind: input, shape index: {}]   ;;  %s4714_s2 = inlined_call_operand.vmem [shape: f32[1,128], index: 2, kind: input, shape index: {}]   ;;  %s4715_s3 = inlined_call_operand.vmem [shape: f32[1,128], index: 3, kind: input, shape index: {}]   ;;  %s4716_s4 = inlined_call_operand.hbm [shape: f32[9,50,162], index: 4, kind: input, shape index: {}]   ;;  %s4717_s5 = inlined_call_operand.vmem [shape: f32[9,128,128], index: 5, kind: input, shape index: {}]   ;;  %s4718_s6 = inlined_call_operand.vmem [shape: f32[1,128], index: 6, kind: input, shape index: {}]   ;;  %s4719_s7 = inlined_call_operand.vmem [shape: f32[1,128], index: 7, kind: input, shape index: {}]   ;;  %s4720_s8 = inlined_call_operand.vmem [shape: f32[9,18,50], index: 8, kind: input, shape index: {}]   ;;  %s4721_s9 = inlined_call_operand.hbm [shape: f32[9,128,128], index: 9, kind: input, shape index: {}]   ;;  %s4722_s10 = inlined_call_operand.vmem [shape: f32[1,128], index: 10, kind: input, shape index: {}]   ;;  %s4723_s11 = inlined_call_operand.vmem [shape: f32[1,128], index: 11, kind: input, shape index: {}]   ;;  %s4724_s12 = inlined_call_operand.vmem [shape: f32[18,128], index: 12, kind: output, shape index: {}]  }
   0x1   :  { %s31_s23 = sshll.u32 %s4716_s4, 4  ;;  %s32_s23 = int_to_ptr.hbm [resolvable:$true] %s31_s23 }
   0x2   :  { %18 = vsyncpa [#allocation5], 0  ;;  %s3247_s24 = smov [#allocation2]   ;;  %s52_s28 = sshll.u32 %s4721_s9, 4  ;;  %s53_s28 = int_to_ptr.hbm [resolvable:$true] %s52_s28 }
   0x3   :  { %s33_s25 = sshll.u32 %s3247_s24, 4  ;;  %s3248_s29 = smov 256   ;;  %s34_s25 = int_to_ptr.vmem [resolvable:$true] %s33_s25 }
   0x4   :  { %s3249_s30 = smov 16   ;;  %s3250_s13 = smov [#allocation4]  }
   0x5   :  { %39 = dma.hbm_to_vmem [thread:$0]  %s32_s23, 16128, %s34_s25, [#allocation3], %s3248_s29, %s3248_s29, %s3249_s30  }
   0x6   :  { %s54_s14 = sshll.u32 %s3250_s13, 4  ;;  %s3251_s15 = smov 128   ;;  %s55_s14 = int_to_ptr.vmem [resolvable:$true] %s54_s14 }
   0x7   :  { %s3252_s16 = smov 8  }
   0x8   :  { %60 = dma.hbm_to_vmem [thread:$0]  %s53_s28, 18432, %s55_s14, [#allocation5], %s3251_s15, %s3251_s15, %s3252_s16  }
   0x9   :  { %3243 = dma.done.wait [#allocation3], 16128  }
   0xa   :  { %3244 = vsyncadd [#allocation3], 4294951168 }
   0xb   :  { %3245 = dma.done.wait [#allocation5], 18432  }
   0xc   :  { %3246 = vsyncadd [#allocation5], 4294948864  ;;  %vm95_vm0 = vcmask 64512   ;;  %v94_v0 = vld [vmem:[%s4713_s1] sm:$0xff]  ;;  %v74_v2 = vld [vmem:[%s4712_s0 + $0x8] sm:$0xff]  ;;  %vm260_vm1 = vcmask 1041408  }
   0xd   :  { %v73_v1 = vld [vmem:[%s4712_s0] sm:$0xff]  ;;  %174 = vmatpush.msra.mxu0 %v94_v0  ;;  %v75_v3 = vld [vmem:[%s4712_s0 + $0x10] sm:$0xff]  ;;  %v76_v4 = vld [vmem:[%s4712_s0 + $0x18] sm:$0xff]  ;;  %vm435_vm5 = vcmask 277504   ;;  %vm2061_vm9 = vcmask 408576  }
   0xe   :  { %2883 = vmatmul.msk.f32.vlgmr.msra.gmra.mxu0 %vm95_vm0, %v73_v1  ;;  %v77_v5 = vld [vmem:[%s4712_s0 + $0x20] sm:$0xff]  ;;  %v78_v6 = vld [vmem:[%s4712_s0 + $0x28] sm:$0xff]  ;;  %v79_v7 = vld [vmem:[%s4712_s0 + $0x30] sm:$0xff] }
   0xf   :  { %v80_v8 = vld [vmem:[%s4712_s0 + $0x38] sm:$0xff]  ;;  %v81_v9 = vld [vmem:[%s4712_s0 + $0x40] sm:$0xff]  ;;  %v82_v10 = vld [vmem:[%s4712_s0 + $0x48] sm:$0xff] }
  0x10   :  { %v83_v11 = vld [vmem:[%s4712_s0 + $0x50] sm:$0xff]  ;;  %v84_v12 = vld [vmem:[%s4712_s0 + $0x58] sm:$0xff]  ;;  %v85_v13 = vld [vmem:[%s4712_s0 + $0x60] sm:$0xff] }
  0x11   :  { %v86_v14 = vld [vmem:[%s4712_s0 + $0x68] sm:$0xff]  ;;  %v87_v15 = vld [vmem:[%s4712_s0 + $0x70] sm:$0xff]  ;;  %v88_v16 = vld [vmem:[%s4712_s0 + $0x78] sm:$0xff] }
  0x12   :  { %v89_v18 = vld [vmem:[%s4712_s0 + $0x80] sm:$0xff]  ;;  %v90_v20 = vld [vmem:[%s4712_s0 + $0x88] sm:$0xff]  ;;  %v91_v22 = vld [vmem:[%s4712_s0 + $0x90] sm:$0xff] }
  0x13   :  { %v92_v24 = vld [vmem:[%s4712_s0 + $0x98] sm:$0xff]  ;;  %v93_v26 = vld [vmem:[%s4712_s0 + $0xa0] sm:$0x3] }
  0x16   :  { %2884 = vmatmul.msk.f32.gmra.mxu0 %vm95_vm0, %v74_v2 }
  0x1e   :  { %2885 = vmatmul.msk.f32.gmra.mxu0 %vm95_vm0, %v75_v3 }
  0x26   :  { %2886 = vmatmul.msk.f32.gmra.mxu0 %vm95_vm0, %v76_v4 }
  0x2e   :  { %2887 = vmatmul.msk.f32.gmra.mxu0 %vm95_vm0, %v77_v5 }
  0x36   :  { %2888 = vmatmul.msk.f32.gmra.mxu0 %vm95_vm0, %v78_v6 }
  0x3e   :  { %2889 = vmatmul.msk.f32.gmra.mxu0 %vm95_vm0, %v79_v7 }
  0x46   :  { %2890 = vmatmul.msk.f32.gmra.mxu0 %vm95_vm0, %v80_v8 }
  0x4e   :  { %2891 = vmatmul.msk.f32.gmra.mxu0 %vm95_vm0, %v81_v9 }
  0x56   :  { %2892 = vmatmul.msk.f32.gmra.mxu0 %vm95_vm0, %v82_v10 }
  0x5e   :  { %2893 = vmatmul.msk.f32.gmra.mxu0 %vm95_vm0, %v83_v11 }
  0x66   :  { %2894 = vmatmul.msk.f32.gmra.mxu0 %vm95_vm0, %v84_v12 }
  0x6e   :  { %2895 = vmatmul.msk.f32.gmra.mxu0 %vm95_vm0, %v85_v13 }
  0x76   :  { %2896 = vmatmul.msk.f32.gmra.mxu0 %vm95_vm0, %v86_v14 }
  0x7e   :  { %2897 = vmatmul.msk.f32.gmra.mxu0 %vm95_vm0, %v87_v15 }
  0x86   :  { %2898 = vmatmul.msk.f32.gmra.mxu0 %vm95_vm0, %v88_v16 }
  0x8b   :  { %v176_v17 = vpop.f32.mrf.mxu0 }
  0x8e   :  { %2899 = vmatmul.msk.f32.gmra.mxu0 %vm95_vm0, %v89_v18 }
  0x93   :  { %v179_v19 = vpop.f32.mrf.mxu0 }
  0x94   :  { %v241_v38 = vadd.f32 %v179_v19, %v176_v17 }
  0x96   :  { %2900 = vmatmul.msk.f32.gmra.mxu0 %vm95_vm0, %v90_v20 }
  0x9b   :  { %v182_v21 = vpop.f32.mrf.mxu0 }
  0x9c   :  { %v242_v39 = vadd.f32 %v241_v38, %v182_v21 }
  0x9e   :  { %2901 = vmatmul.msk.f32.gmra.mxu0 %vm95_vm0, %v91_v22 }
  0xa3   :  { %v185_v23 = vpop.f32.mrf.mxu0 }
  0xa4   :  { %v243_v40 = vadd.f32 %v242_v39, %v185_v23 }
  0xa6   :  { %2902 = vmatmul.msk.f32.gmra.mxu0 %vm95_vm0, %v92_v24 }
  0xab   :  { %v188_v25 = vpop.f32.mrf.mxu0 }
  0xac   :  { %v244_v42 = vadd.f32 %v243_v40, %v188_v25 }
  0xae   :  { %2903 = vmatmul.msk.f32.gmra.mxu0 %vm95_vm0, %v93_v26 }
  0xb3   :  { %v191_v27 = vpop.f32.mrf.mxu0 }
  0xb4   :  { %v245_v43 = vadd.f32 %v244_v42, %v191_v27 }
  0xbb   :  { %v194_v28 = vpop.f32.mrf.mxu0 }
  0xbc   :  { %v246_v44 = vadd.f32 %v245_v43, %v194_v28 }
  0xc3   :  { %v197_v29 = vpop.f32.mrf.mxu0 }
  0xc4   :  { %v247_v45 = vadd.f32 %v246_v44, %v197_v29 }
  0xcb   :  { %v200_v30 = vpop.f32.mrf.mxu0 }
  0xcc   :  { %v248_v47 = vadd.f32 %v247_v45, %v200_v30 }
  0xd3   :  { %v203_v31 = vpop.f32.mrf.mxu0 }
  0xd4   :  { %v249_v48 = vadd.f32 %v248_v47, %v203_v31 }
  0xdb   :  { %v3411_v32 = vpop.f32.mrf.mxu0 }
  0xdc   :  { %v250_v49 = vadd.f32 %v249_v48, %v3411_v32 }
  0xe3   :  { %v3413_v33 = vpop.f32.mrf.mxu0 }
  0xe4   :  { %v251_v50 = vadd.f32 %v250_v49, %v3413_v33 }
  0xeb   :  { %v3415_v34 = vpop.f32.mrf.mxu0 }
  0xec   :  { %v252_v52 = vadd.f32 %v251_v50, %v3415_v34 }
  0xf3   :  { %v3417_v35 = vpop.f32.mrf.mxu0 }
  0xf4   :  { %v253_v53 = vadd.f32 %v252_v52, %v3417_v35 }
  0xfb   :  { %v3419_v36 = vpop.f32.mrf.mxu0 }
  0xfc   :  { %v254_v54 = vadd.f32 %v253_v53, %v3419_v36 }
 0x103   :  { %v3421_v37 = vpop.f32.mrf.mxu0 }
 0x104   :  { %v255_v55 = vadd.f32 %v254_v54, %v3421_v37 }
 0x10b   :  { %v3423_v41 = vpop.f32.mrf.mxu0 }
 0x10c   :  { %v256_v57 = vadd.f32 %v255_v55, %v3423_v41 }
 0x113   :  { %v3425_v46 = vpop.f32.mrf.mxu0 }
 0x114   :  { %v257_v58 = vadd.f32 %v256_v57, %v3425_v46 }
 0x11b   :  { %v3429_v51 = vpop.f32.mrf.mxu0 }
 0x11c   :  { %v258_v59 = vadd.f32 %v257_v58, %v3429_v51 }
 0x123   :  { %v3435_v56 = vpop.f32.mrf.mxu0 }
 0x124   :  { %v259_v60 = vadd.f32 %v258_v59, %v3435_v56 }
 0x12b   :  { %v236_v61 = vpop.f32.mrf.mxu0 }
 0x12c   :  { %v261_v62 = vsel %vm260_vm1, %v236_v61, 0.0 }
 0x12d   :  { %v262_v63 = vadd.f32 %v261_v62, %v259_v60 }
 0x12f   :  { %v263_v0 = vrot.slane %v262_v63, 4 }
 0x131   :  { %v264_v1 = vadd.f32 %v263_v0, %v262_v63 }
 0x133   :  { %v265_v2 = vrot.slane %v264_v1, 2 }
 0x135   :  { %v266_v3 = vadd.f32 %v265_v2, %v264_v1 }
 0x137   :  { %v267_v4 = vrot.slane %v266_v3, 1 }
 0x139   :  { %v268_v5 = vadd.f32 %v267_v4, %v266_v3 }
 0x13b   :  { %v269_v6 = vmul.f32 0.0061728396, %v268_v5 }
 0x13d   :  { %v3442_v7 = vsub.f32 %v176_v17, %v269_v6  ;;  %v3444_v8 = vsub.f32 %v179_v19, %v269_v6  ;;  %v3446_v9 = vsub.f32 %v182_v21, %v269_v6  ;;  %v3452_v12 = vsub.f32 %v185_v23, %v269_v6 }
 0x13e   :  { %v3454_v13 = vsub.f32 %v188_v25, %v269_v6  ;;  %v3458_v16 = vsub.f32 %v191_v27, %v269_v6  ;;  %v3462_v19 = vsub.f32 %v194_v28, %v269_v6  ;;  %v3466_v22 = vsub.f32 %v197_v29, %v269_v6 }
 0x13f   :  { %v291_v10 = vmul.f32 %v3442_v7, %v3442_v7  ;;  %v292_v11 = vmul.f32 %v3444_v8, %v3444_v8  ;;  %v293_v14 = vmul.f32 %v3446_v9, %v3446_v9  ;;  %v294_v17 = vmul.f32 %v3452_v12, %v3452_v12 }
 0x140   :  { %v295_v20 = vmul.f32 %v3454_v13, %v3454_v13  ;;  %v296_v23 = vmul.f32 %v3458_v16, %v3458_v16  ;;  %v3470_v25 = vsub.f32 %v200_v30, %v269_v6  ;;  %v297_v26 = vmul.f32 %v3462_v19, %v3462_v19 }
 0x141   :  { %v312_v15 = vadd.f32 %v292_v11, %v291_v10  ;;  %v3474_v38 = vsub.f32 %v203_v31, %v269_v6  ;;  %v298_v28 = vmul.f32 %v3466_v22, %v3466_v22  ;;  %v3479_v40 = vsub.f32 %v3411_v32, %v269_v6 }
 0x142   :  { %v299_v29 = vmul.f32 %v3470_v25, %v3470_v25  ;;  %v3484_v30 = vsub.f32 %v3413_v33, %v269_v6  ;;  %v282_v31 = vsub.f32 %v3415_v34, %v269_v6  ;;  %v283_v32 = vsub.f32 %v3417_v35, %v269_v6 }
 0x143   :  { %v313_v18 = vadd.f32 %v312_v15, %v293_v14  ;;  %v300_v43 = vmul.f32 %v3474_v38, %v3474_v38  ;;  %v301_v45 = vmul.f32 %v3479_v40, %v3479_v40  ;;  %v284_v50 = vsub.f32 %v3419_v36, %v269_v6 }
 0x144   :  { %v302_v48 = vmul.f32 %v3484_v30, %v3484_v30  ;;  %v303_v33 = vmul.f32 %v282_v31, %v282_v31  ;;  %v285_v53 = vsub.f32 %v3421_v37, %v269_v6  ;;  %v304_v54 = vmul.f32 %v283_v32, %v283_v32 }
 0x145   :  { %v314_v21 = vadd.f32 %v313_v18, %v294_v17  ;;  %v286_v34 = vsub.f32 %v3423_v41, %v269_v6  ;;  %v305_v57 = vmul.f32 %v284_v50, %v284_v50  ;;  %v287_v59 = vsub.f32 %v3425_v46, %v269_v6 }
 0x146   :  { %v306_v60 = vmul.f32 %v285_v53, %v285_v53  ;;  %v288_v62 = vsub.f32 %v3429_v51, %v269_v6  ;;  %v290_v1 = vsub.f32 %v236_v61, %v269_v6  ;;  %v289_v36 = vsub.f32 %v3435_v56, %v269_v6 }
 0x147   :  { %v315_v24 = vadd.f32 %v314_v21, %v295_v20  ;;  %v307_v63 = vmul.f32 %v286_v34, %v286_v34  ;;  %v308_v2 = vmul.f32 %v287_v59, %v287_v59 }
 0x148   :  { %v309_v37 = vmul.f32 %v288_v62, %v288_v62  ;;  %v311_v5 = vmul.f32 %v290_v1, %v290_v1  ;;  %v310_v10 = vmul.f32 %v289_v36, %v289_v36 }
 0x149   :  { %v316_v27 = vadd.f32 %v315_v24, %v296_v23 }
 0x14a   :  { %v331_v14 = vsel %vm260_vm1, %v311_v5, 0.0 }
 0x14b   :  { %v317_v39 = vadd.f32 %v316_v27, %v297_v26 }
 0x14d   :  { %v318_v42 = vadd.f32 %v317_v39, %v298_v28  ;;  %v239_v28 = vld [vmem:[%s4714_s2] sm:$0x1] }
 0x14f   :  { %v319_v44 = vadd.f32 %v318_v42, %v299_v29 }
 0x151   :  { %v320_v47 = vadd.f32 %v319_v44, %v300_v43 }
 0x153   :  { %v321_v49 = vadd.f32 %v320_v47, %v301_v45  ;;  %v3510_v45 = vld [vmem:[%s4715_s3] ss:$0 sm:$0xff] }
 0x155   :  { %v322_v52 = vadd.f32 %v321_v49, %v302_v48 }
 0x157   :  { %v323_v55 = vadd.f32 %v322_v52, %v303_v33 }
 0x159   :  { %v324_v58 = vadd.f32 %v323_v55, %v304_v54 }
 0x15b   :  { %v325_v35 = vadd.f32 %v324_v58, %v305_v57 }
 0x15d   :  { %v326_v0 = vadd.f32 %v325_v35, %v306_v60 }
 0x15f   :  { %v327_v3 = vadd.f32 %v326_v0, %v307_v63 }
 0x161   :  { %v328_v4 = vadd.f32 %v327_v3, %v308_v2 }
 0x163   :  { %v329_v41 = vadd.f32 %v328_v4, %v309_v37 }
 0x165   :  { %v330_v11 = vadd.f32 %v329_v41, %v310_v10 }
 0x167   :  { %v332_v46 = vadd.f32 %v331_v14, %v330_v11 }
 0x169   :  { %v333_v15 = vrot.slane %v332_v46, 4 }
 0x16b   :  { %v334_v17 = vadd.f32 %v333_v15, %v332_v46  ;;  %v422_v15 = vld [vmem:[#allocation2 + $0x8] sm:$0xff] }
 0x16d   :  { %v335_v18 = vrot.slane %v334_v17, 2 }
 0x16f   :  { %v336_v51 = vadd.f32 %v335_v18, %v334_v17 }
 0x171   :  { %v337_v20 = vrot.slane %v336_v51, 1 }
 0x173   :  { %v338_v21 = vadd.f32 %v337_v20, %v336_v51 }
 0x175   :  { %v339_v61 = vmul.f32 0.0061728396, %v338_v21 }
 0x177   :  { %v340_v23 = vadd.f32 1e-05, %v339_v61 }
 0x179   :  { %3189 = vrsqrt.f32 %v340_v23  ;;  %vm347_vm3 = vweird.f32 %v340_v23 }
 0x17f   :  { %v3190_v56 = vpop.eup %3189 }
 0x180   :  { %v342_v6 = vmul.f32 %v3190_v56, %v340_v23  ;;  %vm348_vm2 = vweird.f32 %v3190_v56 }
 0x181   :  { %vm349_vm4 = vmor %vm347_vm3, %vm348_vm2 }
 0x182   :  { %v343_v24 = vmul.f32 %v3190_v56, %v342_v6 }
 0x184   :  { %v344_v26 = vmul.f32 0.5, %v343_v24 }
 0x186   :  { %v345_v27 = vsub.f32 1.5, %v344_v26 }
 0x188   :  { %v346_v39 = vmul.f32 %v3190_v56, %v345_v27 }
 0x18a   :  { %v350_v29 = vsel %vm349_vm4, %v3190_v56, %v346_v39 }
 0x18b   :  { %v351_v42 = vmul.f32 %v350_v29, %v239_v28 }
 0x18d   :  { %v3504_v43 = vperm.slane %v351_v42, 0  ;;  %v426_v42 = vld [vmem:[#allocation2 + $0x28] sm:$0xff] }
 0x18f   :  { %v370_v44 = vmul.f32 %v3504_v43, %v285_v53  ;;  %v369_v47 = vmul.f32 %v3504_v43, %v284_v50  ;;  %v375_v48 = vmul.f32 %v3504_v43, %v290_v1  ;;  %v368_v49 = vmul.f32 %v3504_v43, %v283_v32 }
 0x190   :  { %v374_v33 = vmul.f32 %v3504_v43, %v289_v36  ;;  %v367_v54 = vmul.f32 %v3504_v43, %v282_v31  ;;  %v373_v55 = vmul.f32 %v3504_v43, %v288_v62  ;;  %v366_v58 = vmul.f32 %v3504_v43, %v3484_v30 }
 0x191   :  { %v394_v52 = vadd.f32 %v3510_v45, %v370_v44  ;;  %v393_v53 = vadd.f32 %v3510_v45, %v369_v47  ;;  %v399_v57 = vadd.f32 %v3510_v45, %v375_v48  ;;  %v372_v50 = vmul.f32 %v3504_v43, %v287_v59 }
 0x192   :  { %v392_v60 = vadd.f32 %v3510_v45, %v368_v49  ;;  %v398_v32 = vadd.f32 %v3510_v45, %v374_v33  ;;  %v365_v31 = vmul.f32 %v3504_v43, %v3479_v40  ;;  %v371_v62 = vmul.f32 %v3504_v43, %v286_v34  ;;  %v2935_v49 = vld [vmem:[%s4717_s5 + $0xf8] sm:$0xff]  ;;  %v932_v33 = vld [vmem:[#allocation2 + $0x150] sm:$0xff] }
 0x193   :  { %v3526_v35 = vmax.f32 %v394_v52, 0.0  ;;  %v391_v63 = vadd.f32 %v3510_v45, %v367_v54  ;;  %v397_v0 = vadd.f32 %v3510_v45, %v373_v55  ;;  %v3533_v1 = vmax.f32 %v393_v53, 0.0  ;;  %v428_v52 = vld [vmem:[#allocation2 + $0x38] sm:$0xff]  ;;  %v2934_v54 = vld [vmem:[%s4717_s5 + $0xf0] sm:$0xff]  ;;  %v2933_v55 = vld [vmem:[%s4717_s5 + $0xe8] sm:$0xff] }
 0x194   :  { %v3535_v30 = vmax.f32 %v399_v57, 0.0  ;;  %v390_v59 = vadd.f32 %v3510_v45, %v366_v58  ;;  %v396_v40 = vadd.f32 %v3510_v45, %v372_v50  ;;  %v3542_v36 = vmax.f32 %v392_v60, 0.0  ;;  %v2932_v53 = vld [vmem:[%s4717_s5 + $0xe0] sm:$0xff]  ;;  %v423_v57 = vld [vmem:[#allocation2 + $0x10] sm:$0xff]  ;;  %v2931_v58 = vld [vmem:[%s4717_s5 + $0xd8] sm:$0xff] }
 0x195   :  { %460 = vmatpush.msra.mxu1 %v3526_v35  ;;  %3164 = vmatpush.msra.mxu3 %v3526_v35  ;;  %v3544_v34 = vmax.f32 %v398_v32, 0.0  ;;  %v364_v2 = vmul.f32 %v3504_v43, %v3474_v38  ;;  %v389_v3 = vadd.f32 %v3510_v45, %v365_v31  ;;  %v395_v37 = vadd.f32 %v3510_v45, %v371_v62  ;;  %v934_v50 = vld [vmem:[#allocation2 + $0x160] sm:$0xff]  ;;  %v430_v60 = vld [vmem:[#allocation2 + $0x48] sm:$0xff]  ;;  %v2930_v32 = vld [vmem:[%s4717_s5 + $0xd0] sm:$0xff] }
 0x196   :  { %967 = vmatpush.msrb.mxu0 %v3526_v35  ;;  %2904 = vmatpush.msk.msra.mxu2 %vm260_vm1, %v3535_v30  ;;  %v3555_v4 = vmax.f32 %v391_v63, 0.0  ;;  %v3557_v5 = vmax.f32 %v397_v0, 0.0  ;;  %v363_v10 = vmul.f32 %v3504_v43, %v3470_v25  ;;  %v3565_v38 = vmax.f32 %v390_v59, 0.0  ;;  %v3031_v31 = vld [vmem:[%s4717_s5 + $0x2f8] sm:$0xff]  ;;  %v2929_v62 = vld [vmem:[%s4717_s5 + $0xc8] sm:$0xff]  ;;  %v3030_v63 = vld [vmem:[%s4717_s5 + $0x2f0] sm:$0xff] }
 0x197   :  { %461 = vmatpush.msra.mxu1 %v3533_v1  ;;  %3165 = vmatpush.msra.mxu3 %v3533_v1  ;;  %v3567_v41 = vmax.f32 %v396_v40, 0.0  ;;  %v362_v11 = vmul.f32 %v3504_v43, %v3466_v22  ;;  %v388_v14 = vadd.f32 %v3510_v45, %v364_v2  ;;  %v3576_v25 = vmax.f32 %v389_v3, 0.0  ;;  %v2928_v0 = vld [vmem:[%s4717_s5 + $0xc0] sm:$0xff]  ;;  %v3029_v40 = vld [vmem:[%s4717_s5 + $0x2e8] sm:$0xff]  ;;  %v2927_v2 = vld [vmem:[%s4717_s5 + $0xb8] sm:$0xff] }
 0x198   :  { %968 = vmatpush.msrb.mxu0 %v3533_v1  ;;  %510 = vmatpush.msra.mxu2 %v3544_v34  ;;  %v3578_v46 = vmax.f32 %v395_v37, 0.0  ;;  %v361_v17 = vmul.f32 %v3504_v43, %v3462_v19  ;;  %v387_v22 = vadd.f32 %v3510_v45, %v363_v10  ;;  %v360_v18 = vmul.f32 %v3504_v43, %v3458_v16  ;;  %v425_v59 = vld [vmem:[#allocation2 + $0x20] sm:$0xff]  ;;  %v936_v3 = vld [vmem:[#allocation2 + $0x170] sm:$0xff]  ;;  %v432_v10 = vld [vmem:[#allocation2 + $0x58] sm:$0xff] }
 0x199   :  { %462 = vmatpush.msra.mxu1 %v3542_v36  ;;  %3166 = vmatpush.msra.mxu3 %v3542_v36  ;;  %v386_v51 = vadd.f32 %v3510_v45, %v362_v11  ;;  %v3592_v20 = vmax.f32 %v388_v14, 0.0  ;;  %v359_v19 = vmul.f32 %v3504_v43, %v3454_v13  ;;  %v358_v16 = vmul.f32 %v3504_v43, %v3452_v12  ;;  %v424_v13 = vld [vmem:[#allocation2 + $0x18] sm:$0xff]  ;;  %v3028_v37 = vld [vmem:[%s4717_s5 + $0x2e0] sm:$0xff]  ;;  %v2926_v11 = vld [vmem:[%s4717_s5 + $0xb0] sm:$0xff] }
 0x19a   :  { %969 = vmatpush.msrb.mxu0 %v3542_v36  ;;  %511 = vmatpush.msra.mxu2 %v3557_v5  ;;  %v385_v21 = vadd.f32 %v3510_v45, %v361_v17  ;;  %v3601_v61 = vmax.f32 %v387_v22, 0.0  ;;  %v384_v23 = vadd.f32 %v3510_v45, %v360_v18  ;;  %v357_v12 = vmul.f32 %v3504_v43, %v3446_v9  ;;  %v3027_v14 = vld [vmem:[%s4717_s5 + $0x2d8] sm:$0xff]  ;;  %v555_v17 = vld [vmem:[#allocation2 + $0x80] sm:$0xff]  ;;  %v3026_v22 = vld [vmem:[%s4717_s5 + $0x2d0] sm:$0xff] }
 0x19b   :  { %463 = vmatpush.msra.mxu1 %v3555_v4  ;;  %3167 = vmatpush.msra.mxu3 %v3555_v4  ;;  %v3610_v56 = vmax.f32 %v386_v51, 0.0  ;;  %v383_v6 = vadd.f32 %v3510_v45, %v359_v19  ;;  %v382_v27 = vadd.f32 %v3510_v45, %v358_v16  ;;  %v356_v28 = vmul.f32 %v3504_v43, %v3444_v8  ;;  %v2924_v18 = vld [vmem:[%s4717_s5 + $0xa0] sm:$0xff]  ;;  %v427_v51 = vld [vmem:[#allocation2 + $0x30] sm:$0xff]  ;;  %v3025_v19 = vld [vmem:[%s4717_s5 + $0x2c8] sm:$0xff] }
 0x19c   :  { %970 = vmatpush.msrb.mxu0 %v3555_v4  ;;  %512 = vmatpush.msra.mxu2 %v3567_v41  ;;  %v3617_v24 = vmax.f32 %v385_v21, 0.0  ;;  %v3625_v26 = vmax.f32 %v384_v23, 0.0  ;;  %v381_v39 = vadd.f32 %v3510_v45, %v357_v12  ;;  %v355_v29 = vmul.f32 %v3504_v43, %v3442_v7  ;;  %v2923_v21 = vld [vmem:[%s4717_s5 + $0x98] sm:$0xff]  ;;  %v938_v16 = vld [vmem:[#allocation2 + $0x180] sm:$0xff] }
 0x19d   :  { %464 = vmatpush.msra.mxu1 %v3565_v38  ;;  %3168 = vmatpush.msra.mxu3 %v3565_v38  ;;  %v3634_v9 = vmax.f32 %v383_v6, 0.0  ;;  %v3645_v8 = vmax.f32 %v382_v27, 0.0  ;;  %v380_v44 = vadd.f32 %v3510_v45, %v356_v28  ;;  %v3024_v23 = vld [vmem:[%s4717_s5 + $0x2c0] sm:$0xff]  ;;  %v2922_v6 = vld [vmem:[%s4717_s5 + $0x90] sm:$0xff]  ;;  %v3023_v12 = vld [vmem:[%s4717_s5 + $0x2b8] sm:$0xff] }
 0x19e   :  { %971 = vmatpush.msrb.mxu0 %v3565_v38  ;;  %513 = vmatpush.msra.mxu2 %v3578_v46  ;;  %v3654_v7 = vmax.f32 %v381_v39, 0.0  ;;  %v379_v43 = vadd.f32 %v3510_v45, %v355_v29  ;;  %v421_v45 = vld [vmem:[#allocation2] sm:$0xff]  ;;  %v2921_v27 = vld [vmem:[%s4717_s5 + $0x88] sm:$0xff]  ;;  %v557_v28 = vld [vmem:[#allocation2 + $0x90] sm:$0xff] }
 0x19f   :  { %465 = vmatpush.msra.mxu1 %v3576_v25  ;;  %2905 = vmatmul.msk.f32.vlgmr.msra.gmra.mxu2 %vm435_vm5, %v422_v15  ;;  %v3661_v47 = vmax.f32 %v380_v44, 0.0  ;;  %v2925_v15 = vld [vmem:[%s4717_s5 + $0xa8] sm:$0xff]  ;;  %v3022_v39 = vld [vmem:[%s4717_s5 + $0x2b0] sm:$0xff]  ;;  %v2920_v29 = vld [vmem:[%s4717_s5 + $0x80] sm:$0xff] }
 0x1a0   :  { %3169 = vmatpush.msra.mxu3 %v3576_v25  ;;  %588 = vmatpush.msrb.mxu2 %v3526_v35  ;;  %v3667_v48 = vmax.f32 %v379_v43, 0.0  ;;  %v429_v44 = vld [vmem:[#allocation2 + $0x40] sm:$0xff]  ;;  %v940_v43 = vld [vmem:[#allocation2 + $0x190] sm:$0xff] }
 0x1a1   :  { %972 = vmatpush.msrb.mxu0 %v3576_v25  ;;  %466 = vmatpush.msra.mxu1 %v3592_v20 }
 0x1a2   :  { %3170 = vmatpush.msra.mxu3 %v3592_v20  ;;  %589 = vmatpush.msrb.mxu2 %v3533_v1 }
 0x1a3   :  { %973 = vmatpush.msrb.mxu0 %v3592_v20  ;;  %467 = vmatpush.msra.mxu1 %v3601_v61 }
 0x1a4   :  { %3171 = vmatpush.msra.mxu3 %v3601_v61  ;;  %590 = vmatpush.msrb.mxu2 %v3542_v36 }
 0x1a5   :  { %974 = vmatpush.msrb.mxu0 %v3601_v61  ;;  %468 = vmatpush.msra.mxu1 %v3610_v56 }
 0x1a6   :  { %3172 = vmatpush.msra.mxu3 %v3610_v56  ;;  %591 = vmatpush.msrb.mxu2 %v3555_v4 }
 0x1a7   :  { %975 = vmatpush.msrb.mxu0 %v3610_v56  ;;  %2906 = vmatmul.msk.f32.gmra.mxu2 %vm435_vm5, %v424_v13  ;;  %v434_v13 = vld [vmem:[#allocation2 + $0x68] sm:$0x3] }
 0x1a8   :  { %469 = vmatpush.msra.mxu1 %v3617_v24  ;;  %592 = vmatpush.msrb.mxu2 %v3565_v38 }
 0x1a9   :  { %3173 = vmatpush.msra.mxu3 %v3617_v24  ;;  %976 = vmatpush.msrb.mxu0 %v3617_v24 }
 0x1aa   :  { %470 = vmatpush.msra.mxu1 %v3625_v26  ;;  %593 = vmatpush.msrb.mxu2 %v3576_v25 }
 0x1ab   :  { %3174 = vmatpush.msra.mxu3 %v3625_v26  ;;  %977 = vmatpush.msrb.mxu0 %v3625_v26 }
 0x1ac   :  { %471 = vmatpush.msra.mxu1 %v3634_v9  ;;  %594 = vmatpush.msrb.mxu2 %v3592_v20 }
 0x1ad   :  { %3175 = vmatpush.msra.mxu3 %v3634_v9  ;;  %978 = vmatpush.msrb.mxu0 %v3634_v9 }
 0x1ae   :  { %472 = vmatpush.msra.mxu1 %v3645_v8  ;;  %595 = vmatpush.msrb.mxu2 %v3601_v61 }
 0x1af   :  { %3176 = vmatpush.msra.mxu3 %v3645_v8  ;;  %979 = vmatpush.msrb.mxu0 %v3645_v8 }
 0x1b0   :  { %2907 = vmatmul.msk.f32.gmra.mxu2 %vm435_vm5, %v426_v42  ;;  %473 = vmatpush.msra.mxu1 %v3654_v7  ;;  %v3021_v42 = vld [vmem:[%s4717_s5 + $0x2a8] sm:$0xff] }
 0x1b1   :  { %596 = vmatpush.msrb.mxu2 %v3610_v56  ;;  %3177 = vmatpush.msra.mxu3 %v3654_v7 }
 0x1b2   :  { %980 = vmatpush.msrb.mxu0 %v3654_v7  ;;  %474 = vmatpush.msra.mxu1 %v3661_v47 }
 0x1b3   :  { %597 = vmatpush.msrb.mxu2 %v3617_v24  ;;  %3178 = vmatpush.msra.mxu3 %v3661_v47 }
 0x1b4   :  { %981 = vmatpush.msrb.mxu0 %v3661_v47  ;;  %475 = vmatpush.msra.mxu1 %v3667_v48 }
 0x1b5   :  { %598 = vmatpush.msrb.mxu2 %v3625_v26  ;;  %3179 = vmatpush.msra.mxu3 %v3667_v48 }
 0x1b6   :  { %982 = vmatpush.msrb.mxu0 %v3667_v48  ;;  %476 = vmatmul.f32.vlgmr.msra.gmra.mxu1 %v421_v45  ;;  %v3020_v45 = vld [vmem:[%s4717_s5 + $0x2a0] sm:$0xff] }
 0x1b7   :  { %599 = vmatpush.msrb.mxu2 %v3634_v9  ;;  %681 = vmatpush.msrb.mxu1 %v2935_v49  ;;  %v553_v49 = vld [vmem:[#allocation2 + $0x70] sm:$0xff] }
 0x1b8   :  { %983 = vmatmul.f32.vlgmr.msrb.gmra.mxu0 %v932_v33  ;;  %2908 = vmatmul.msk.f32.gmra.mxu2 %vm435_vm5, %v428_v52  ;;  %v3019_v33 = vld [vmem:[%s4717_s5 + $0x298] sm:$0xff]  ;;  %v559_v52 = vld [vmem:[#allocation2 + $0xa0] sm:$0xff] }
 0x1b9   :  { %2984 = vmatpush.msk.msra.mxu0 %vm260_vm1, %v3535_v30  ;;  %600 = vmatpush.msrb.mxu2 %v3645_v8 }
 0x1ba   :  { %682 = vmatpush.msrb.mxu1 %v2934_v54  ;;  %607 = vmatmul.f32.vlgmr.msra.gmra.mxu3 %v555_v17  ;;  %v3018_v54 = vld [vmem:[%s4717_s5 + $0x290] sm:$0xff]  ;;  %v543_v17 = vld [vmem:[%s4717_s5 + $0x38] sm:$0xff] }
 0x1bb   :  { %1191 = vmatpush.msra.mxu0 %v3544_v34  ;;  %601 = vmatpush.msrb.mxu2 %v3654_v7 }
 0x1bc   :  { %683 = vmatpush.msrb.mxu1 %v2933_v55  ;;  %v551_v55 = vld [vmem:[%s4717_s5 + $0x78] sm:$0xff] }
 0x1bd   :  { %1192 = vmatpush.msra.mxu0 %v3557_v5  ;;  %602 = vmatpush.msrb.mxu2 %v3661_v47 }
 0x1be   :  { %684 = vmatpush.msrb.mxu1 %v2932_v53  ;;  %v431_v53 = vld [vmem:[#allocation2 + $0x50] sm:$0xff]  ;;  %719 = vmatpush.msrb.mxu3 %v551_v55  ;;  %v2949_v55 = vld [vmem:[%s4717_s5 + $0x128] sm:$0xff] }
 0x1bf   :  { %1193 = vmatpush.msra.mxu0 %v3567_v41  ;;  %479 = vmatmul.f32.gmra.mxu1 %v423_v57  ;;  %v942_v57 = vld [vmem:[#allocation2 + $0x1a0] sm:$0xff] }
 0x1c0   :  { %603 = vmatpush.msrb.mxu2 %v3667_v48  ;;  %685 = vmatpush.msrb.mxu1 %v2931_v58  ;;  %v3017_v58 = vld [vmem:[%s4717_s5 + $0x288] sm:$0xff] }
 0x1c1   :  { %986 = vmatmul.f32.gmra.mxu0 %v934_v50  ;;  %2909 = vmatmul.msk.f32.gmra.mxu2 %vm435_vm5, %v430_v60  ;;  %v554_v50 = vld [vmem:[#allocation2 + $0x78] sm:$0xff]  ;;  %v550_v60 = vld [vmem:[%s4717_s5 + $0x70] sm:$0xff] }
 0x1c2   :  { %2912 = vmatpush.msk.msra.mxu2 %vm260_vm1, %v3535_v30  ;;  %1194 = vmatpush.msra.mxu0 %v3578_v46 }
 0x1c3   :  { %686 = vmatpush.msrb.mxu1 %v2930_v32  ;;  %610 = vmatmul.f32.gmra.mxu3 %v557_v28  ;;  %v3016_v32 = vld [vmem:[%s4717_s5 + $0x280] sm:$0xff]  ;;  %v2958_v28 = vld [vmem:[%s4717_s5 + $0x170] sm:$0xff] }
 0x1c4   :  { %638 = vmatpush.msra.mxu2 %v3544_v34  ;;  %1408 = vmatpush.msrb.mxu0 %v3031_v31  ;;  %v549_v31 = vld [vmem:[%s4717_s5 + $0x68] sm:$0xff] }
 0x1c5   :  { %687 = vmatpush.msrb.mxu1 %v2929_v62  ;;  %720 = vmatpush.msrb.mxu3 %v550_v60  ;;  %v561_v62 = vld [vmem:[#allocation2 + $0xb0] sm:$0xff] }
 0x1c6   :  { %639 = vmatpush.msra.mxu2 %v3557_v5  ;;  %1409 = vmatpush.msrb.mxu0 %v3030_v63  ;;  %v548_v63 = vld [vmem:[%s4717_s5 + $0x60] sm:$0xff]  ;;  %v2946_v60 = vld [vmem:[%s4717_s5 + $0x110] sm:$0xff] }
 0x1c7   :  { %688 = vmatpush.msrb.mxu1 %v2928_v0  ;;  %721 = vmatpush.msrb.mxu3 %v549_v31  ;;  %v433_v0 = vld [vmem:[#allocation2 + $0x60] sm:$0x3]  ;;  %v2945_v31 = vld [vmem:[%s4717_s5 + $0x108] sm:$0xff] }
 0x1c8   :  { %640 = vmatpush.msra.mxu2 %v3567_v41  ;;  %482 = vmatmul.f32.gmra.mxu1 %v425_v59  ;;  %v944_v59 = vld [vmem:[#allocation2 + $0x1b0] sm:$0x3] }
 0x1c9   :  { %1410 = vmatpush.msrb.mxu0 %v3029_v40  ;;  %689 = vmatpush.msrb.mxu1 %v2927_v2  ;;  %v547_v40 = vld [vmem:[%s4717_s5 + $0x58] sm:$0xff]  ;;  %v556_v2 = vld [vmem:[#allocation2 + $0x88] sm:$0xff] }
 0x1ca   :  { %989 = vmatmul.f32.gmra.mxu0 %v936_v3  ;;  %641 = vmatpush.msra.mxu2 %v3578_v46  ;;  %v546_v3 = vld [vmem:[%s4717_s5 + $0x50] sm:$0xff] }
 0x1cb   :  { %1411 = vmatpush.msrb.mxu0 %v3028_v37  ;;  %2910 = vmatmul.msk.f32.gmra.mxu2 %vm435_vm5, %v432_v10  ;;  %v545_v37 = vld [vmem:[%s4717_s5 + $0x48] sm:$0xff]  ;;  %v563_v10 = vld [vmem:[#allocation2 + $0xc0] sm:$0xff] }
 0x1cc   :  { %690 = vmatpush.msrb.mxu1 %v2926_v11  ;;  %613 = vmatmul.f32.gmra.mxu3 %v559_v52  ;;  %v544_v11 = vld [vmem:[%s4717_s5 + $0x40] sm:$0xff]  ;;  %v2951_v52 = vld [vmem:[%s4717_s5 + $0x138] sm:$0xff] }
 0x1cd   :  { %1412 = vmatpush.msrb.mxu0 %v3027_v14  ;;  %722 = vmatpush.msrb.mxu3 %v548_v63  ;;  %v1107_v14 = vld [vmem:[#allocation2 + $0x1c8] sm:$0xff]  ;;  %v2944_v63 = vld [vmem:[%s4717_s5 + $0x100] sm:$0xff] }
 0x1ce   :  { %691 = vmatpush.msrb.mxu1 %v2925_v15  ;;  %v558_v15 = vld [vmem:[#allocation2 + $0x98] sm:$0xff] }
 0x1cf   :  { %1413 = vmatpush.msrb.mxu0 %v3026_v22  ;;  %723 = vmatpush.msrb.mxu3 %v547_v40  ;;  %v542_v22 = vld [vmem:[%s4717_s5 + $0x30] sm:$0xff]  ;;  %v3003_v40 = vld [vmem:[%s4717_s5 + $0x258] sm:$0xff] }
 0x1d0   :  { %692 = vmatpush.msrb.mxu1 %v2924_v18  ;;  %v541_v18 = vld [vmem:[%s4717_s5 + $0x28] sm:$0xff] }
 0x1d1   :  { %485 = vmatmul.f32.gmra.mxu1 %v427_v51  ;;  %1414 = vmatpush.msrb.mxu0 %v3025_v19  ;;  %v540_v51 = vld [vmem:[%s4717_s5 + $0x20] sm:$0xff]  ;;  %v565_v19 = vld [vmem:[#allocation2 + $0xd0] sm:$0x3] }
 0x1d2   :  { %693 = vmatpush.msrb.mxu1 %v2923_v21  ;;  %992 = vmatmul.f32.gmra.mxu0 %v938_v16  ;;  %v560_v21 = vld [vmem:[#allocation2 + $0xa8] sm:$0xff]  ;;  %v539_v16 = vld [vmem:[%s4717_s5 + $0x18] sm:$0xff] }
 0x1d3   :  { %1415 = vmatpush.msrb.mxu0 %v3024_v23  ;;  %2911 = vmatmul.msk.f32.gmra.mxu2 %vm435_vm5, %v434_v13  ;;  %v538_v23 = vld [vmem:[%s4717_s5 + $0x10] sm:$0xff]  ;;  %v537_v13 = vld [vmem:[%s4717_s5 + $0x8] sm:$0xff] }
 0x1d4   :  { %694 = vmatpush.msrb.mxu1 %v2922_v6  ;;  %616 = vmatmul.f32.gmra.mxu3 %v561_v62  ;;  %v536_v6 = vld [vmem:[%s4717_s5] sm:$0xff]  ;;  %v3005_v62 = vld [vmem:[%s4717_s5 + $0x268] sm:$0xff] }
 0x1d5   :  { %1416 = vmatpush.msrb.mxu0 %v3023_v12  ;;  %724 = vmatpush.msrb.mxu3 %v546_v3  ;;  %v562_v12 = vld [vmem:[#allocation2 + $0xb8] sm:$0xff]  ;;  %v3002_v3 = vld [vmem:[%s4717_s5 + $0x250] sm:$0xff] }
 0x1d6   :  { %695 = vmatpush.msrb.mxu1 %v2921_v27  ;;  %v2959_v27 = vld [vmem:[%s4717_s5 + $0x178] sm:$0xff] }
 0x1d7   :  { %1417 = vmatpush.msrb.mxu0 %v3022_v39  ;;  %725 = vmatpush.msrb.mxu3 %v545_v37  ;;  %v2957_v39 = vld [vmem:[%s4717_s5 + $0x168] sm:$0xff] }
 0x1d8   :  { %696 = vmatpush.msrb.mxu1 %v2920_v29  ;;  %v2956_v29 = vld [vmem:[%s4717_s5 + $0x160] sm:$0xff]  ;;  %v3001_v37 = vld [vmem:[%s4717_s5 + $0x248] sm:$0xff] }
 0x1d9   :  { %1418 = vmatpush.msrb.mxu0 %v3021_v42  ;;  %488 = vmatmul.f32.gmra.mxu1 %v429_v44  ;;  %v564_v42 = vld [vmem:[#allocation2 + $0xc8] sm:$0xff]  ;;  %v2955_v44 = vld [vmem:[%s4717_s5 + $0x158] sm:$0xff] }
 0x1da   :  { %2936 = vmatpush.msk.msra.mxu1 %vm260_vm1, %v3535_v30  ;;  %995 = vmatmul.f32.gmra.mxu0 %v940_v43  ;;  %v2954_v43 = vld [vmem:[%s4717_s5 + $0x150] sm:$0xff] }
 0x1db   :  { %1419 = vmatpush.msrb.mxu0 %v3020_v45  ;;  %604 = vmatmul.f32.vlgmr.msrb.gmra.mxu2 %v553_v49  ;;  %v2953_v45 = vld [vmem:[%s4717_s5 + $0x148] sm:$0xff]  ;;  %v2952_v49 = vld [vmem:[%s4717_s5 + $0x140] sm:$0xff] }
 0x1dc   :  { %843 = vmatpush.msra.mxu1 %v3544_v34  ;;  %793 = vmatpush.msrb.mxu2 %v3526_v35 }
 0x1dd   :  { %1420 = vmatpush.msrb.mxu0 %v3019_v33  ;;  %619 = vmatmul.f32.gmra.mxu3 %v563_v10  ;;  %v566_v33 = vld [vmem:[#allocation2 + $0xd8] sm:$0x3]  ;;  %v3000_v10 = vld [vmem:[%s4717_s5 + $0x240] sm:$0xff] }
 0x1de   :  { %844 = vmatpush.msra.mxu1 %v3557_v5  ;;  %794 = vmatpush.msrb.mxu2 %v3533_v1 }
 0x1df   :  { %1421 = vmatpush.msrb.mxu0 %v3018_v54  ;;  %726 = vmatpush.msrb.mxu3 %v544_v11  ;;  %v2950_v54 = vld [vmem:[%s4717_s5 + $0x130] sm:$0xff]  ;;  %v762_v11 = vld [vmem:[#allocation2 + $0x100] sm:$0xff] }
 0x1e0   :  { %845 = vmatpush.msra.mxu1 %v3567_v41  ;;  %795 = vmatpush.msrb.mxu2 %v3542_v36 }
 0x1e1   :  { %491 = vmatmul.f32.gmra.mxu1 %v431_v53  ;;  %1422 = vmatpush.msrb.mxu0 %v3017_v58  ;;  %v2948_v53 = vld [vmem:[%s4717_s5 + $0x120] sm:$0xff]  ;;  %v2947_v58 = vld [vmem:[%s4717_s5 + $0x118] sm:$0xff] }
 0x1e2   :  { %846 = vmatpush.msra.mxu1 %v3578_v46  ;;  %998 = vmatmul.f32.gmra.mxu0 %v942_v57  ;;  %v758_v57 = vld [vmem:[#allocation2 + $0xe0] sm:$0xff] }
 0x1e3   :  { %796 = vmatpush.msrb.mxu2 %v3555_v4  ;;  %1423 = vmatpush.msrb.mxu0 %v3016_v32  ;;  %v3006_v32 = vld [vmem:[%s4717_s5 + $0x270] sm:$0xff] }
 0x1e4   :  { %2913 = vmatmul.msk.f32.vlgmr.msra.gmra.mxu2 %vm435_vm5, %v554_v50  ;;  %727 = vmatpush.msrb.mxu3 %v543_v17  ;;  %v3007_v50 = vld [vmem:[%s4717_s5 + $0x278] sm:$0xff]  ;;  %v2998_v17 = vld [vmem:[%s4717_s5 + $0x230] sm:$0xff] }
 0x1e5   :  { %797 = vmatpush.msrb.mxu2 %v3565_v38  ;;  %622 = vmatmul.f32.gmra.mxu3 %v565_v19  ;;  %v2995_v19 = vld [vmem:[%s4717_s5 + $0x218] sm:$0xff] }
 0x1e6   :  { %728 = vmatpush.msrb.mxu3 %v542_v22  ;;  %v2997_v22 = vld [vmem:[%s4717_s5 + $0x228] sm:$0xff] }
 0x1e7   :  { %798 = vmatpush.msrb.mxu2 %v3576_v25 }
 0x1e8   :  { %729 = vmatpush.msrb.mxu3 %v541_v18  ;;  %v2996_v18 = vld [vmem:[%s4717_s5 + $0x220] sm:$0xff] }
 0x1e9   :  { %799 = vmatpush.msrb.mxu2 %v3592_v20  ;;  %494 = vmatmul.f32.gmra.mxu1 %v433_v0  ;;  %v3004_v0 = vld [vmem:[%s4717_s5 + $0x260] sm:$0xff] }
 0x1ea   :  { %1001 = vmatmul.f32.gmra.mxu0 %v944_v59  ;;  %730 = vmatpush.msrb.mxu3 %v540_v51  ;;  %v760_v59 = vld [vmem:[#allocation2 + $0xf0] sm:$0xff] }
 0x1eb   :  { %800 = vmatpush.msrb.mxu2 %v3601_v61  ;;  %v764_v51 = vld [vmem:[#allocation2 + $0x110] sm:$0xff] }
 0x1ec   :  { %2914 = vmatmul.msk.f32.gmra.mxu2 %vm435_vm5, %v556_v2  ;;  %731 = vmatpush.msrb.mxu3 %v539_v16 }
 0x1ed   :  { %801 = vmatpush.msrb.mxu2 %v3610_v56 }
 0x1ee   :  { %732 = vmatpush.msrb.mxu3 %v538_v23  ;;  %v2994_v23 = vld [vmem:[%s4717_s5 + $0x210] sm:$0xff] }
 0x1ef   :  { %802 = vmatpush.msrb.mxu2 %v3617_v24 }
 0x1f0   :  { %733 = vmatpush.msrb.mxu3 %v537_v13 }
 0x1f1   :  { %803 = vmatpush.msrb.mxu2 %v3625_v26 }
 0x1f2   :  { %2985 = vmatmul.msk.f32.vlgmr.msra.gmra.mxu0 %vm435_vm5, %v1107_v14  ;;  %734 = vmatpush.msrb.mxu3 %v536_v6  ;;  %v2999_v14 = vld [vmem:[%s4717_s5 + $0x238] sm:$0xff]  ;;  %v2993_v6 = vld [vmem:[%s4717_s5 + $0x208] sm:$0xff] }
 0x1f3   :  { %804 = vmatpush.msrb.mxu2 %v3634_v9  ;;  %1663 = vmatpush.msra.mxu0 %v3526_v35 }
 0x1f4   :  { %2915 = vmatmul.msk.f32.gmra.mxu2 %vm435_vm5, %v558_v15  ;;  %886 = vmatpush.msra.mxu3 %v2959_v27  ;;  %v766_v27 = vld [vmem:[#allocation2 + $0x120] sm:$0xff] }
 0x1f5   :  { %805 = vmatpush.msrb.mxu2 %v3645_v8  ;;  %1664 = vmatpush.msra.mxu0 %v3533_v1 }
 0x1f6   :  { %887 = vmatpush.msra.mxu3 %v2958_v28 }
 0x1f7   :  { %806 = vmatpush.msrb.mxu2 %v3654_v7  ;;  %1665 = vmatpush.msra.mxu0 %v3542_v36 }
 0x1f8   :  { %888 = vmatpush.msra.mxu3 %v2957_v39 }
 0x1f9   :  { %807 = vmatpush.msrb.mxu2 %v3661_v47  ;;  %1666 = vmatpush.msra.mxu0 %v3555_v4 }
 0x1fa   :  { %889 = vmatpush.msra.mxu3 %v2956_v29 }
 0x1fb   :  { %808 = vmatpush.msrb.mxu2 %v3667_v48  ;;  %1667 = vmatpush.msra.mxu0 %v3565_v38 }
 0x1fc   :  { %2916 = vmatmul.msk.f32.gmra.mxu2 %vm435_vm5, %v560_v21  ;;  %890 = vmatpush.msra.mxu3 %v2955_v44 }
 0x1fd   :  { %2960 = vmatpush.msk.msra.mxu2 %vm260_vm1, %v3535_v30  ;;  %1668 = vmatpush.msra.mxu0 %v3576_v25 }
 0x1fe   :  { %891 = vmatpush.msra.mxu3 %v2954_v43 }
 0x1ff   :  { %1017 = vmatpush.msra.mxu2 %v3544_v34  ;;  %1669 = vmatpush.msra.mxu0 %v3592_v20 }
 0x200   :  { %892 = vmatpush.msra.mxu3 %v2953_v45 }
 0x201   :  { %1018 = vmatpush.msra.mxu2 %v3557_v5  ;;  %1670 = vmatpush.msra.mxu0 %v3601_v61 }
 0x202   :  { %893 = vmatpush.msra.mxu3 %v2952_v49  ;;  %v770_v49 = vld [vmem:[#allocation2 + $0x140] sm:$0x3] }
 0x203   :  { %1019 = vmatpush.msra.mxu2 %v3567_v41  ;;  %1671 = vmatpush.msra.mxu0 %v3610_v56 }
 0x204   :  { %2917 = vmatmul.msk.f32.gmra.mxu2 %vm435_vm5, %v562_v12  ;;  %894 = vmatpush.msra.mxu3 %v2951_v52  ;;  %v2992_v12 = vld [vmem:[%s4717_s5 + $0x200] sm:$0xff] }
 0x205   :  { %1020 = vmatpush.msra.mxu2 %v3578_v46  ;;  %1672 = vmatpush.msra.mxu0 %v3617_v24 }
 0x206   :  { %895 = vmatpush.msra.mxu3 %v2950_v54 }
 0x207   :  { %1673 = vmatpush.msra.mxu0 %v3625_v26 }
 0x208   :  { %896 = vmatpush.msra.mxu3 %v2949_v55  ;;  %v933_v55 = vld [vmem:[#allocation2 + $0x158] sm:$0xff] }
 0x209   :  { %1674 = vmatpush.msra.mxu0 %v3634_v9 }
 0x20a   :  { %897 = vmatpush.msra.mxu3 %v2948_v53 }
 0x20b   :  { %1675 = vmatpush.msra.mxu0 %v3645_v8 }
 0x20c   :  { %2918 = vmatmul.msk.f32.gmra.mxu2 %vm435_vm5, %v564_v42  ;;  %898 = vmatpush.msra.mxu3 %v2947_v58  ;;  %v768_v42 = vld [vmem:[#allocation2 + $0x130] sm:$0xff] }
 0x20d   :  { %1676 = vmatpush.msra.mxu0 %v3654_v7 }
 0x20e   :  { %899 = vmatpush.msra.mxu3 %v2946_v60 }
 0x20f   :  { %1677 = vmatpush.msra.mxu0 %v3661_v47 }
 0x210   :  { %900 = vmatpush.msra.mxu3 %v2945_v31 }
 0x211   :  { %1678 = vmatpush.msra.mxu0 %v3667_v48 }
 0x212   :  { %901 = vmatpush.msra.mxu3 %v2944_v63 }
 0x214   :  { %2919 = vmatmul.msk.f32.gmra.mxu2 %vm435_vm5, %v566_v33 }
 0x21c   :  { %809 = vmatmul.f32.vlgmr.msrb.gmra.mxu2 %v758_v57 }
 0x21d   :  { %1234 = vmatpush.msrb.mxu2 %v3007_v50 }
 0x21f   :  { %1235 = vmatpush.msrb.mxu2 %v3006_v32 }
 0x221   :  { %1236 = vmatpush.msrb.mxu2 %v3005_v62 }
 0x222   :  { %v515_v2 = vpop.f32.mrf.mxu2 }
 0x223   :  { %1237 = vmatpush.msrb.mxu2 %v3004_v0 }
 0x224   :  { %812 = vmatmul.f32.gmra.mxu2 %v760_v59 }
 0x225   :  { %1238 = vmatpush.msrb.mxu2 %v3003_v40  ;;  %v2983_v40 = vld [vmem:[%s4717_s5 + $0x1f8] sm:$0xff] }
 0x227   :  { %1239 = vmatpush.msrb.mxu2 %v3002_v3  ;;  %v2981_v3 = vld [vmem:[%s4717_s5 + $0x1e8] sm:$0xff] }
 0x229   :  { %1240 = vmatpush.msrb.mxu2 %v3001_v37 }
 0x22a   :  { %v518_v15 = vpop.f32.mrf.mxu2 }
 0x22b   :  { %1241 = vmatpush.msrb.mxu2 %v3000_v10  ;;  %v2980_v10 = vld [vmem:[%s4717_s5 + $0x1e0] sm:$0xff] }
 0x22c   :  { %815 = vmatmul.f32.gmra.mxu2 %v762_v11 }
 0x22d   :  { %1242 = vmatpush.msrb.mxu2 %v2999_v14 }
 0x22f   :  { %1243 = vmatpush.msrb.mxu2 %v2998_v17  ;;  %v2978_v17 = vld [vmem:[%s4717_s5 + $0x1d0] sm:$0xff] }
 0x231   :  { %1244 = vmatpush.msrb.mxu2 %v2997_v22  ;;  %v2977_v22 = vld [vmem:[%s4717_s5 + $0x1c8] sm:$0xff] }
 0x233   :  { %v521_v21 = vpop.f32.mrf.mxu2  ;;  %1245 = vmatpush.msrb.mxu2 %v2996_v18  ;;  %v477_v16 = vpop.f32.mrf.mxu1  ;;  %v2976_v18 = vld [vmem:[%s4717_s5 + $0x1c0] sm:$0xff] }
 0x234   :  { %818 = vmatmul.f32.gmra.mxu2 %v764_v51  ;;  %v516_v13 = vadd.f32 %v515_v2, %v477_v16  ;;  %v2982_v2 = vld [vmem:[%s4717_s5 + $0x1f0] sm:$0xff]  ;;  %v2975_v16 = vld [vmem:[%s4717_s5 + $0x1b8] sm:$0xff] }
 0x235   :  { %1246 = vmatpush.msrb.mxu2 %v2995_v19 }
 0x236   :  { %735 = vmatmul.f32.vlgmr.msrb.gmra.mxu3 %v516_v13  ;;  %v2973_v13 = vld [vmem:[%s4717_s5 + $0x1a8] sm:$0xff] }
 0x237   :  { %1247 = vmatpush.msrb.mxu2 %v2994_v23  ;;  %1141 = vmatpush.msrb.mxu3 %v3526_v35  ;;  %v2974_v23 = vld [vmem:[%s4717_s5 + $0x1b0] sm:$0xff] }
 0x239   :  { %1248 = vmatpush.msrb.mxu2 %v2993_v6  ;;  %1142 = vmatpush.msrb.mxu3 %v3533_v1  ;;  %v2972_v6 = vld [vmem:[%s4717_s5 + $0x1a0] sm:$0xff] }
 0x23b   :  { %1249 = vmatpush.msrb.mxu2 %v2992_v12  ;;  %1143 = vmatpush.msrb.mxu3 %v3542_v36  ;;  %v524_v39 = vpop.f32.mrf.mxu2 }
 0x23c   :  { %821 = vmatmul.f32.gmra.mxu2 %v766_v27  ;;  %v480_v28 = vpop.f32.mrf.mxu1 }
 0x23d   :  { %v519_v29 = vadd.f32 %v518_v15, %v480_v28  ;;  %1144 = vmatpush.msrb.mxu3 %v3555_v4  ;;  %v608_v31 = vpop.f32.mrf.mxu3  ;;  %v2979_v15 = vld [vmem:[%s4717_s5 + $0x1d8] sm:$0xff] }
 0x23e   :  { %v2971_v28 = vld [vmem:[%s4717_s5 + $0x198] sm:$0xff] }
 0x23f   :  { %738 = vmatmul.f32.gmra.mxu3 %v519_v29  ;;  %v2970_v29 = vld [vmem:[%s4717_s5 + $0x190] sm:$0xff] }
 0x240   :  { %1145 = vmatpush.msrb.mxu3 %v3565_v38 }
 0x242   :  { %1146 = vmatpush.msrb.mxu3 %v3576_v25 }
 0x244   :  { %824 = vmatmul.f32.gmra.mxu2 %v768_v42  ;;  %1147 = vmatpush.msrb.mxu3 %v3592_v20  ;;  %v527_v43 = vpop.f32.mrf.mxu2  ;;  %v2969_v42 = vld [vmem:[%s4717_s5 + $0x188] sm:$0xff] }
 0x245   :  { %v483_v44 = vpop.f32.mrf.mxu1 }
 0x246   :  { %1148 = vmatpush.msrb.mxu3 %v3601_v61  ;;  %v522_v45 = vadd.f32 %v521_v21, %v483_v44  ;;  %v611_v37 = vpop.f32.mrf.mxu3  ;;  %v2968_v44 = vld [vmem:[%s4717_s5 + $0x180] sm:$0xff] }
 0x248   :  { %741 = vmatmul.f32.gmra.mxu3 %v522_v45 }
 0x249   :  { %1149 = vmatpush.msrb.mxu3 %v3610_v56 }
 0x24b   :  { %1150 = vmatpush.msrb.mxu3 %v3617_v24 }
 0x24c   :  { %827 = vmatmul.f32.gmra.mxu2 %v770_v49 }
 0x24d   :  { %1151 = vmatpush.msrb.mxu3 %v3625_v26 }
 0x24e   :  { %v486_v33 = vpop.f32.mrf.mxu1  ;;  %v530_v52 = vpop.f32.mrf.mxu2 }
 0x24f   :  { %v525_v54 = vadd.f32 %v524_v39, %v486_v33  ;;  %1152 = vmatpush.msrb.mxu3 %v3634_v9  ;;  %v614_v21 = vpop.f32.mrf.mxu3  ;;  %v935_v33 = vld [vmem:[#allocation2 + $0x168] sm:$0xff] }
 0x251   :  { %744 = vmatmul.f32.gmra.mxu3 %v525_v54 }
 0x252   :  { %1153 = vmatpush.msrb.mxu3 %v3645_v8 }
 0x254   :  { %1154 = vmatpush.msrb.mxu3 %v3654_v7  ;;  %2961 = vmatmul.msk.f32.vlgmr.msra.gmra.mxu2 %vm435_vm5, %v933_v55  ;;  %v937_v55 = vld [vmem:[#allocation2 + $0x178] sm:$0xff] }
 0x255   :  { %1489 = vmatpush.msra.mxu2 %v3526_v35 }
 0x256   :  { %1155 = vmatpush.msrb.mxu3 %v3661_v47  ;;  %v489_v53 = vpop.f32.mrf.mxu1  ;;  %v533_v57 = vpop.f32.mrf.mxu2 }
 0x257   :  { %1490 = vmatpush.msra.mxu2 %v3533_v1  ;;  %v528_v58 = vadd.f32 %v527_v43, %v489_v53  ;;  %v617_v39 = vpop.f32.mrf.mxu3 }
 0x258   :  { %1156 = vmatpush.msrb.mxu3 %v3667_v48 }
 0x259   :  { %1491 = vmatpush.msra.mxu2 %v3542_v36  ;;  %747 = vmatmul.f32.gmra.mxu3 %v528_v58 }
 0x25b   :  { %1492 = vmatpush.msra.mxu2 %v3555_v4 }
 0x25c   :  { %2962 = vmatmul.msk.f32.gmra.mxu2 %vm435_vm5, %v935_v33 }
 0x25d   :  { %1493 = vmatpush.msra.mxu2 %v3565_v38 }
 0x25e   :  { %v492_v50 = vpop.f32.mrf.mxu1  ;;  %v605_v60 = vpop.f32.mrf.mxu2 }
 0x25f   :  { %1494 = vmatpush.msra.mxu2 %v3576_v25  ;;  %v531_v32 = vadd.f32 %v530_v52, %v492_v50  ;;  %v939_v50 = vld [vmem:[#allocation2 + $0x188] sm:$0xff] }
 0x260   :  { %v620_v49 = vpop.f32.mrf.mxu3 }
 0x261   :  { %1495 = vmatpush.msra.mxu2 %v3592_v20  ;;  %750 = vmatmul.f32.gmra.mxu3 %v531_v32  ;;  %v759_v32 = vld [vmem:[#allocation2 + $0xe8] sm:$0xff] }
 0x263   :  { %1496 = vmatpush.msra.mxu2 %v3601_v61 }
 0x264   :  { %2963 = vmatmul.msk.f32.gmra.mxu2 %vm435_vm5, %v937_v55 }
 0x265   :  { %1497 = vmatpush.msra.mxu2 %v3610_v56 }
 0x266   :  { %v495_v62 = vpop.f32.mrf.mxu1 }
 0x267   :  { %v643_v63 = vpop.f32.mrf.mxu2  ;;  %1498 = vmatpush.msra.mxu2 %v3617_v24  ;;  %v534_v59 = vadd.f32 %v533_v57, %v495_v62 }
 0x268   :  { %v644_v0 = vadd.f32 %v643_v63, %v605_v60  ;;  %v623_v53 = vpop.f32.mrf.mxu3  ;;  %v761_v63 = vld [vmem:[#allocation2 + $0xf8] sm:$0xff] }
 0x269   :  { %1499 = vmatpush.msra.mxu2 %v3625_v26  ;;  %753 = vmatmul.f32.gmra.mxu3 %v534_v59 }
 0x26a   :  { %697 = vmatmul.f32.vlgmr.msrb.gmra.mxu1 %v644_v0  ;;  %v943_v0 = vld [vmem:[#allocation2 + $0x1a8] sm:$0xff] }
 0x26b   :  { %1060 = vmatpush.msrb.mxu1 %v2983_v40  ;;  %1500 = vmatpush.msra.mxu2 %v3634_v9  ;;  %v763_v40 = vld [vmem:[#allocation2 + $0x108] sm:$0xff] }
 0x26c   :  { %2964 = vmatmul.msk.f32.gmra.mxu2 %vm435_vm5, %v939_v50 }
 0x26d   :  { %1061 = vmatpush.msrb.mxu1 %v2982_v2  ;;  %1501 = vmatpush.msra.mxu2 %v3645_v8  ;;  %v945_v2 = vld [vmem:[#allocation2 + $0x1b8] sm:$0x3] }
 0x26f   :  { %v646_v11 = vpop.f32.mrf.mxu2  ;;  %1062 = vmatpush.msrb.mxu1 %v2981_v3  ;;  %1502 = vmatpush.msra.mxu2 %v3654_v7 }
 0x270   :  { %v647_v14 = vadd.f32 %v646_v11, %v608_v31  ;;  %v941_v31 = vld [vmem:[#allocation2 + $0x198] sm:$0xff]  ;;  %v767_v11 = vld [vmem:[#allocation2 + $0x128] sm:$0xff] }
 0x271   :  { %1063 = vmatpush.msrb.mxu1 %v2980_v10  ;;  %1503 = vmatpush.msra.mxu2 %v3661_v47 }
 0x272   :  { %700 = vmatmul.f32.gmra.mxu1 %v647_v14 }
 0x273   :  { %1064 = vmatpush.msrb.mxu1 %v2979_v15  ;;  %1504 = vmatpush.msra.mxu2 %v3667_v48  ;;  %v769_v15 = vld [vmem:[#allocation2 + $0x138] sm:$0xff] }
 0x274   :  { %2965 = vmatmul.msk.f32.gmra.mxu2 %vm435_vm5, %v941_v31 }
 0x275   :  { %1065 = vmatpush.msrb.mxu1 %v2978_v17 }
 0x277   :  { %v649_v51 = vpop.f32.mrf.mxu2  ;;  %1066 = vmatpush.msrb.mxu1 %v2977_v22  ;;  %v771_v22 = vld [vmem:[#allocation2 + $0x148] sm:$0x3] }
 0x278   :  { %v650_v19 = vadd.f32 %v649_v51, %v611_v37  ;;  %v765_v37 = vld [vmem:[#allocation2 + $0x118] sm:$0xff] }
 0x279   :  { %1067 = vmatpush.msrb.mxu1 %v2976_v18  ;;  %v984_v18 = vpop.f32.mrf.mxu0 }
 0x27a   :  { %703 = vmatmul.f32.gmra.mxu1 %v650_v19 }
 0x27b   :  { %1068 = vmatpush.msrb.mxu1 %v2975_v16 }
 0x27c   :  { %2966 = vmatmul.msk.f32.gmra.mxu2 %vm435_vm5, %v943_v0 }
 0x27d   :  { %1069 = vmatpush.msrb.mxu1 %v2974_v23 }
 0x27f   :  { %1070 = vmatpush.msrb.mxu1 %v2973_v13  ;;  %v652_v12 = vpop.f32.mrf.mxu2 }
 0x280   :  { %v653_v27 = vadd.f32 %v652_v12, %v614_v21 }
 0x281   :  { %1071 = vmatpush.msrb.mxu1 %v2972_v6 }
 0x282   :  { %706 = vmatmul.f32.gmra.mxu1 %v653_v27  ;;  %v987_v27 = vpop.f32.mrf.mxu0 }
 0x283   :  { %1072 = vmatpush.msrb.mxu1 %v2971_v28 }
 0x284   :  { %2967 = vmatmul.msk.f32.gmra.mxu2 %vm435_vm5, %v945_v2 }
 0x285   :  { %1073 = vmatpush.msrb.mxu1 %v2970_v29 }
 0x287   :  { %v655_v43 = vpop.f32.mrf.mxu2  ;;  %1074 = vmatpush.msrb.mxu1 %v2969_v42 }
 0x288   :  { %v656_v45 = vadd.f32 %v655_v43, %v617_v39 }
 0x289   :  { %1075 = vmatpush.msrb.mxu1 %v2968_v44 }
 0x28a   :  { %709 = vmatmul.f32.gmra.mxu1 %v656_v45  ;;  %v990_v42 = vpop.f32.mrf.mxu0 }
 0x28f   :  { %v658_v52 = vpop.f32.mrf.mxu2 }
 0x290   :  { %v659_v54 = vadd.f32 %v658_v52, %v620_v49 }
 0x292   :  { %712 = vmatmul.f32.gmra.mxu1 %v659_v54  ;;  %v993_v49 = vpop.f32.mrf.mxu0 }
 0x297   :  { %v661_v57 = vpop.f32.mrf.mxu2 }
 0x298   :  { %v662_v58 = vadd.f32 %v661_v57, %v623_v53 }
 0x29a   :  { %715 = vmatmul.f32.gmra.mxu1 %v662_v58  ;;  %v996_v53 = vpop.f32.mrf.mxu0 }
 0x29f   :  { %v4072_v60 = vpop.f32.mrf.mxu2 }
 0x2a2   :  { %2937 = vmatmul.msk.f32.vlgmr.msra.gmra.mxu1 %vm435_vm5, %v759_v32  ;;  %v999_v32 = vpop.f32.mrf.mxu0 }
 0x2a3   :  { %1315 = vmatpush.msra.mxu1 %v3526_v35 }
 0x2a5   :  { %1316 = vmatpush.msra.mxu1 %v3533_v1 }
 0x2a7   :  { %1317 = vmatpush.msra.mxu1 %v3542_v36  ;;  %v4079_v62 = vpop.f32.mrf.mxu2 }
 0x2a9   :  { %1318 = vmatpush.msra.mxu1 %v3555_v4 }
 0x2aa   :  { %2938 = vmatmul.msk.f32.gmra.mxu1 %vm435_vm5, %v761_v63  ;;  %v1002_v2 = vpop.f32.mrf.mxu0 }
 0x2ab   :  { %1319 = vmatpush.msra.mxu1 %v3565_v38 }
 0x2ad   :  { %1320 = vmatpush.msra.mxu1 %v3576_v25 }
 0x2af   :  { %1321 = vmatpush.msra.mxu1 %v3592_v20  ;;  %v4087_v59 = vpop.f32.mrf.mxu2 }
 0x2b1   :  { %1322 = vmatpush.msra.mxu1 %v3601_v61 }
 0x2b2   :  { %2939 = vmatmul.msk.f32.gmra.mxu1 %vm435_vm5, %v763_v40 }
 0x2b3   :  { %1323 = vmatpush.msra.mxu1 %v3610_v56 }
 0x2b5   :  { %1324 = vmatpush.msra.mxu1 %v3617_v24 }
 0x2b7   :  { %1325 = vmatpush.msra.mxu1 %v3625_v26  ;;  %v4095_v3 = vpop.f32.mrf.mxu2 }
 0x2b9   :  { %1326 = vmatpush.msra.mxu1 %v3634_v9 }
 0x2ba   :  { %2940 = vmatmul.msk.f32.gmra.mxu1 %vm435_vm5, %v765_v37 }
 0x2bb   :  { %1327 = vmatpush.msra.mxu1 %v3645_v8 }
 0x2bd   :  { %1328 = vmatpush.msra.mxu1 %v3654_v7 }
 0x2bf   :  { %1329 = vmatpush.msra.mxu1 %v3661_v47  ;;  %v4102_v10 = vpop.f32.mrf.mxu2 }
 0x2c1   :  { %1330 = vmatpush.msra.mxu1 %v3667_v48 }
 0x2c2   :  { %2941 = vmatmul.msk.f32.gmra.mxu1 %vm435_vm5, %v767_v11 }
 0x2c7   :  { %v4106_v14 = vpop.f32.mrf.mxu2 }
 0x2ca   :  { %2942 = vmatmul.msk.f32.gmra.mxu1 %vm435_vm5, %v769_v15 }
 0x2cf   :  { %v4109_v17 = vpop.f32.mrf.mxu2 }
 0x2d2   :  { %2943 = vmatmul.msk.f32.gmra.mxu1 %vm435_vm5, %v771_v22 }
 0x2d7   :  { %v1022_v51 = vpop.f32.mrf.mxu2 }
 0x2d8   :  { %v1023_v19 = vadd.f32 %v1022_v51, %v984_v18  ;;  %v1109_v18 = vld [vmem:[#allocation2 + $0x1d8] sm:$0xff] }
 0x2d9   :  { %2986 = vmatmul.msk.f32.gmra.mxu0 %vm435_vm5, %v1109_v18  ;;  %v1116_v18 = vld [vmem:[#allocation2 + $0x210] sm:$0xff] }
 0x2da   :  { %1076 = vmatmul.f32.vlgmr.msrb.gmra.mxu1 %v1023_v19  ;;  %v1111_v19 = vld [vmem:[#allocation2 + $0x1e8] sm:$0xff] }
 0x2db   :  { %3032 = vmatpush.msk.msrb.mxu1 %vm260_vm1, %v3535_v30 }
 0x2dd   :  { %1539 = vmatpush.msrb.mxu1 %v3544_v34 }
 0x2df   :  { %1540 = vmatpush.msrb.mxu1 %v3557_v5  ;;  %v1025_v28 = vpop.f32.mrf.mxu2 }
 0x2e0   :  { %v1026_v39 = vadd.f32 %v1025_v28, %v987_v27  ;;  %v1113_v28 = vld [vmem:[#allocation2 + $0x1f8] sm:$0xff] }
 0x2e1   :  { %1541 = vmatpush.msrb.mxu1 %v3567_v41  ;;  %2987 = vmatmul.msk.f32.gmra.mxu0 %vm435_vm5, %v1111_v19  ;;  %v1284_v19 = vld [vmem:[#allocation2 + $0x250] sm:$0xff] }
 0x2e2   :  { %1079 = vmatmul.f32.gmra.mxu1 %v1026_v39  ;;  %v1106_v39 = vld [vmem:[#allocation2 + $0x1c0] sm:$0xff] }
 0x2e3   :  { %1542 = vmatpush.msrb.mxu1 %v3578_v46 }
 0x2e7   :  { %v4118_v21 = vpop.f32.mrf.mxu1  ;;  %v1028_v44 = vpop.f32.mrf.mxu2 }
 0x2e8   :  { %v1029_v43 = vadd.f32 %v1028_v44, %v990_v42  ;;  %v1115_v42 = vld [vmem:[#allocation2 + $0x208] sm:$0xff]  ;;  %v3052_v44 = vld [vmem:[%s4717_s5 + $0x360] sm:$0xff] }
 0x2e9   :  { %2988 = vmatmul.msk.f32.gmra.mxu0 %vm435_vm5, %v1113_v28  ;;  %v1286_v28 = vld [vmem:[#allocation2 + $0x260] sm:$0xff] }
 0x2ea   :  { %1082 = vmatmul.f32.gmra.mxu1 %v1029_v43  ;;  %v1108_v43 = vld [vmem:[#allocation2 + $0x1d0] sm:$0xff] }
 0x2ef   :  { %v4120_v16 = vpop.f32.mrf.mxu1  ;;  %v1031_v52 = vpop.f32.mrf.mxu2 }
 0x2f0   :  { %v1032_v54 = vadd.f32 %v1031_v52, %v993_v49  ;;  %v4164_v49 = vpop.f32.mrf.mxu3  ;;  %v1117_v52 = vld [vmem:[#allocation2 + $0x218] sm:$0xff] }
 0x2f1   :  { %2989 = vmatmul.msk.f32.gmra.mxu0 %vm435_vm5, %v1115_v42 }
 0x2f2   :  { %1085 = vmatmul.f32.gmra.mxu1 %v1032_v54  ;;  %v3049_v54 = vld [vmem:[%s4717_s5 + $0x348] sm:$0xff] }
 0x2f7   :  { %v4122_v23 = vpop.f32.mrf.mxu1  ;;  %v1034_v58 = vpop.f32.mrf.mxu2 }
 0x2f8   :  { %v1035_v50 = vadd.f32 %v1034_v58, %v996_v53  ;;  %v1110_v53 = vld [vmem:[#allocation2 + $0x1e0] sm:$0xff]  ;;  %v3046_v58 = vld [vmem:[%s4717_s5 + $0x330] sm:$0xff] }
 0x2f9   :  { %2990 = vmatmul.msk.f32.gmra.mxu0 %vm435_vm5, %v1117_v52 }
 0x2fa   :  { %1088 = vmatmul.f32.gmra.mxu1 %v1035_v50  ;;  %v4182_v50 = vpop.f32.mrf.mxu3 }
 0x2ff   :  { %v4124_v13 = vpop.f32.mrf.mxu1  ;;  %v1037_v63 = vpop.f32.mrf.mxu2 }
 0x300   :  { %v1038_v0 = vadd.f32 %v1037_v63, %v999_v32  ;;  %v3045_v32 = vld [vmem:[%s4717_s5 + $0x328] sm:$0xff]  ;;  %v1112_v63 = vld [vmem:[#allocation2 + $0x1f0] sm:$0xff] }
 0x302   :  { %1091 = vmatmul.f32.gmra.mxu1 %v1038_v0  ;;  %v3043_v0 = vld [vmem:[%s4717_s5 + $0x318] sm:$0xff] }
 0x307   :  { %v4126_v6 = vpop.f32.mrf.mxu1  ;;  %v1040_v37 = vpop.f32.mrf.mxu2 }
 0x308   :  { %v1041_v11 = vadd.f32 %v1040_v37, %v1002_v2  ;;  %v3041_v2 = vld [vmem:[%s4717_s5 + $0x308] sm:$0xff]  ;;  %v3040_v37 = vld [vmem:[%s4717_s5 + $0x300] sm:$0xff] }
 0x30a   :  { %1094 = vmatmul.f32.gmra.mxu1 %v1041_v11  ;;  %v1114_v11 = vld [vmem:[#allocation2 + $0x200] sm:$0xff] }
 0x30f   :  { %v4128_v12 = vpop.f32.mrf.mxu1 }
 0x317   :  { %v4130_v29 = vpop.f32.mrf.mxu1 }
 0x31f   :  { %v848_v45 = vpop.f32.mrf.mxu1 }
 0x320   :  { %v849_v33 = vadd.f32 %v848_v45, %v4072_v60  ;;  %v3051_v45 = vld [vmem:[%s4717_s5 + $0x358] sm:$0xff] }
 0x322   :  { %902 = vmatmul.f32.vlgmr.msra.gmra.mxu3 %v849_v33  ;;  %v3050_v33 = vld [vmem:[%s4717_s5 + $0x350] sm:$0xff] }
 0x323   :  { %3008 = vmatpush.msk.msra.mxu3 %vm260_vm1, %v3535_v30 }
 0x325   :  { %1365 = vmatpush.msra.mxu3 %v3544_v34 }
 0x327   :  { %1366 = vmatpush.msra.mxu3 %v3557_v5  ;;  %v851_v55 = vpop.f32.mrf.mxu1 }
 0x328   :  { %v852_v57 = vadd.f32 %v851_v55, %v4079_v62  ;;  %v3048_v55 = vld [vmem:[%s4717_s5 + $0x340] sm:$0xff] }
 0x329   :  { %1367 = vmatpush.msra.mxu3 %v3567_v41 }
 0x32a   :  { %905 = vmatmul.f32.gmra.mxu3 %v852_v57  ;;  %v3047_v57 = vld [vmem:[%s4717_s5 + $0x338] sm:$0xff] }
 0x32b   :  { %1368 = vmatpush.msra.mxu3 %v3578_v46 }
 0x32f   :  { %v854_v60 = vpop.f32.mrf.mxu1 }
 0x330   :  { %v855_v31 = vadd.f32 %v854_v60, %v4087_v59  ;;  %v1119_v60 = vld [vmem:[#allocation2 + $0x228] sm:$0x3] }
 0x331   :  { %2991 = vmatmul.msk.f32.gmra.mxu0 %vm435_vm5, %v1119_v60 }
 0x332   :  { %908 = vmatmul.f32.gmra.mxu3 %v855_v31  ;;  %v3044_v31 = vld [vmem:[%s4717_s5 + $0x320] sm:$0xff] }
 0x337   :  { %v857_v40 = vpop.f32.mrf.mxu1 }
 0x338   :  { %v858_v62 = vadd.f32 %v857_v40, %v4095_v3  ;;  %v3042_v40 = vld [vmem:[%s4717_s5 + $0x310] sm:$0xff] }
 0x33a   :  { %911 = vmatmul.f32.gmra.mxu3 %v858_v62  ;;  %v4200_v62 = vpop.f32.mrf.mxu3 }
 0x33f   :  { %v860_v15 = vpop.f32.mrf.mxu1 }
 0x340   :  { %v861_v22 = vadd.f32 %v860_v15, %v4102_v10  ;;  %v3055_v10 = vld [vmem:[%s4717_s5 + $0x378] sm:$0xff]  ;;  %v1280_v15 = vld [vmem:[#allocation2 + $0x230] sm:$0xff] }
 0x341   :  { %1331 = vmatmul.f32.vlgmr.msra.gmra.mxu1 %v1280_v15 }
 0x342   :  { %914 = vmatmul.f32.gmra.mxu3 %v861_v22  ;;  %v4205_v22 = vpop.f32.mrf.mxu3 }
 0x347   :  { %v863_v59 = vpop.f32.mrf.mxu1 }
 0x348   :  { %v864_v51 = vadd.f32 %v863_v59, %v4106_v14  ;;  %v3054_v14 = vld [vmem:[%s4717_s5 + $0x370] sm:$0xff]  ;;  %v1282_v59 = vld [vmem:[#allocation2 + $0x240] sm:$0xff] }
 0x349   :  { %1334 = vmatmul.f32.gmra.mxu1 %v1282_v59 }
 0x34a   :  { %917 = vmatmul.f32.gmra.mxu3 %v864_v51  ;;  %v1118_v51 = vld [vmem:[#allocation2 + $0x220] sm:$0x3] }
 0x34f   :  { %v866_v27 = vpop.f32.mrf.mxu1 }
 0x350   :  { %v867_v3 = vadd.f32 %v866_v27, %v4109_v17  ;;  %v3053_v17 = vld [vmem:[%s4717_s5 + $0x368] sm:$0xff]  ;;  %v4207_v27 = vpop.f32.mrf.mxu3 }
 0x351   :  { %1337 = vmatmul.f32.gmra.mxu1 %v1284_v19  ;;  %v1457_v19 = vld [vmem:[#allocation2 + $0x2b8] sm:$0xff] }
 0x352   :  { %920 = vmatmul.f32.gmra.mxu3 %v867_v3  ;;  %v1281_v3 = vld [vmem:[#allocation2 + $0x238] sm:$0xff] }
 0x359   :  { %1340 = vmatmul.f32.gmra.mxu1 %v1286_v28 }
 0x35a   :  { %1157 = vmatmul.f32.vlgmr.msrb.gmra.mxu3 %v1106_v39  ;;  %v4210_v39 = vpop.f32.mrf.mxu3 }
 0x35b   :  { %1582 = vmatpush.msrb.mxu3 %v3055_v10  ;;  %v1283_v10 = vld [vmem:[#allocation2 + $0x248] sm:$0xff] }
 0x35d   :  { %1583 = vmatpush.msrb.mxu3 %v3054_v14  ;;  %v1288_v14 = vld [vmem:[#allocation2 + $0x270] sm:$0xff] }
 0x35f   :  { %1584 = vmatpush.msrb.mxu3 %v3053_v17  ;;  %v1290_v17 = vld [vmem:[#allocation2 + $0x280] sm:$0xff] }
 0x361   :  { %1585 = vmatpush.msrb.mxu3 %v3052_v44  ;;  %1343 = vmatmul.f32.gmra.mxu1 %v1288_v14 }
 0x362   :  { %1160 = vmatmul.f32.gmra.mxu3 %v1108_v43  ;;  %v4218_v42 = vpop.f32.mrf.mxu3 }
 0x363   :  { %1586 = vmatpush.msrb.mxu3 %v3051_v45 }
 0x365   :  { %1587 = vmatpush.msrb.mxu3 %v3050_v33 }
 0x367   :  { %1588 = vmatpush.msrb.mxu3 %v3049_v54 }
 0x369   :  { %1589 = vmatpush.msrb.mxu3 %v3048_v55  ;;  %1346 = vmatmul.f32.gmra.mxu1 %v1290_v17 }
 0x36a   :  { %1163 = vmatmul.f32.gmra.mxu3 %v1110_v53 }
 0x36b   :  { %1590 = vmatpush.msrb.mxu3 %v3047_v57 }
 0x36d   :  { %1591 = vmatpush.msrb.mxu3 %v3046_v58 }
 0x36f   :  { %1592 = vmatpush.msrb.mxu3 %v3045_v32 }
 0x371   :  { %1593 = vmatpush.msrb.mxu3 %v3044_v31 }
 0x372   :  { %1166 = vmatmul.f32.gmra.mxu3 %v1112_v63 }
 0x373   :  { %1594 = vmatpush.msrb.mxu3 %v3043_v0 }
 0x375   :  { %1595 = vmatpush.msrb.mxu3 %v3042_v40 }
 0x377   :  { %1596 = vmatpush.msrb.mxu3 %v3041_v2 }
 0x379   :  { %1597 = vmatpush.msrb.mxu3 %v3040_v37 }
 0x37a   :  { %1169 = vmatmul.f32.gmra.mxu3 %v1114_v11  ;;  %v1455_v11 = vld [vmem:[#allocation2 + $0x2a8] sm:$0xff] }
 0x382   :  { %1172 = vmatmul.f32.gmra.mxu3 %v1116_v18 }
 0x38a   :  { %1175 = vmatmul.f32.gmra.mxu3 %v1118_v51 }
 0x392   :  { %3009 = vmatmul.msk.f32.vlgmr.msra.gmra.mxu3 %vm435_vm5, %v1281_v3 }
 0x393   :  { %1837 = vmatpush.msra.mxu3 %v3526_v35  ;;  %v1285_v35 = vld [vmem:[#allocation2 + $0x258] sm:$0xff] }
 0x395   :  { %1838 = vmatpush.msra.mxu3 %v3533_v1 }
 0x397   :  { %1839 = vmatpush.msra.mxu3 %v3542_v36  ;;  %v1287_v36 = vld [vmem:[#allocation2 + $0x268] sm:$0xff] }
 0x399   :  { %1840 = vmatpush.msra.mxu3 %v3555_v4  ;;  %v1292_v4 = vld [vmem:[#allocation2 + $0x290] sm:$0x3] }
 0x39a   :  { %3010 = vmatmul.msk.f32.gmra.mxu3 %vm435_vm5, %v1283_v10  ;;  %1349 = vmatmul.f32.gmra.mxu1 %v1292_v4  ;;  %v1454_v4 = vld [vmem:[#allocation2 + $0x2a0] sm:$0xff] }
 0x39b   :  { %1841 = vmatpush.msra.mxu3 %v3565_v38 }
 0x39d   :  { %1842 = vmatpush.msra.mxu3 %v3576_v25  ;;  %v1289_v25 = vld [vmem:[#allocation2 + $0x278] sm:$0xff] }
 0x39f   :  { %1843 = vmatpush.msra.mxu3 %v3592_v20 }
 0x3a1   :  { %1844 = vmatpush.msra.mxu3 %v3601_v61  ;;  %v1291_v61 = vld [vmem:[#allocation2 + $0x288] sm:$0xff] }
 0x3a2   :  { %3011 = vmatmul.msk.f32.gmra.mxu3 %vm435_vm5, %v1285_v35  ;;  %3033 = vmatmul.msk.f32.vlgmr.msrb.gmra.mxu1 %vm435_vm5, %v1455_v11  ;;  %v1459_v35 = vld [vmem:[#allocation2 + $0x2c8] sm:$0xff] }
 0x3a3   :  { %1845 = vmatpush.msra.mxu3 %v3610_v56 }
 0x3a5   :  { %1846 = vmatpush.msra.mxu3 %v3617_v24  ;;  %v4226_v1 = vpop.f32.mrf.mxu3  ;;  %v1293_v24 = vld [vmem:[#allocation2 + $0x298] sm:$0x3] }
 0x3a7   :  { %1847 = vmatpush.msra.mxu3 %v3625_v26  ;;  %v4244_v26 = vpop.f32.mrf.mxu1 }
 0x3a9   :  { %1848 = vmatpush.msra.mxu3 %v3634_v9 }
 0x3aa   :  { %3012 = vmatmul.msk.f32.gmra.mxu3 %vm435_vm5, %v1287_v36  ;;  %3034 = vmatmul.msk.f32.gmra.mxu1 %vm435_vm5, %v1457_v19 }
 0x3ab   :  { %1849 = vmatpush.msra.mxu3 %v3645_v8 }
 0x3ad   :  { %1850 = vmatpush.msra.mxu3 %v3654_v7  ;;  %v4233_v38 = vpop.f32.mrf.mxu3 }
 0x3af   :  { %1851 = vmatpush.msra.mxu3 %v3661_v47  ;;  %v4248_v8 = vpop.f32.mrf.mxu1  ;;  %v1196_v47 = vpop.f32.mrf.mxu0 }
 0x3b1   :  { %1852 = vmatpush.msra.mxu3 %v3667_v48 }
 0x3b2   :  { %3013 = vmatmul.msk.f32.gmra.mxu3 %vm435_vm5, %v1289_v25  ;;  %3035 = vmatmul.msk.f32.gmra.mxu1 %vm435_vm5, %v1459_v35  ;;  %v1633_v35 = vld [vmem:[#allocation2 + $0x338] sm:$0xff] }
 0x3b5   :  { %v4238_v20 = vpop.f32.mrf.mxu3 }
 0x3b7   :  { %v4254_v44 = vpop.f32.mrf.mxu1  ;;  %v1199_v43 = vpop.f32.mrf.mxu0 }
 0x3ba   :  { %3014 = vmatmul.msk.f32.gmra.mxu3 %vm435_vm5, %v1291_v61  ;;  %v1461_v61 = vld [vmem:[#allocation2 + $0x2d8] sm:$0xff] }
 0x3bb   :  { %3036 = vmatmul.msk.f32.gmra.mxu1 %vm435_vm5, %v1461_v61 }
 0x3bd   :  { %v4241_v56 = vpop.f32.mrf.mxu3 }
 0x3bf   :  { %v4256_v52 = vpop.f32.mrf.mxu1  ;;  %v1202_v54 = vpop.f32.mrf.mxu0 }
 0x3c2   :  { %3015 = vmatmul.msk.f32.gmra.mxu3 %vm435_vm5, %v1293_v24 }
 0x3c5   :  { %v4246_v9 = vpop.f32.mrf.mxu3 }
 0x3c7   :  { %v4264_v57 = vpop.f32.mrf.mxu1  ;;  %v1205_v60 = vpop.f32.mrf.mxu0 }
 0x3cd   :  { %v4250_v7 = vpop.f32.mrf.mxu3 }
 0x3cf   :  { %v4266_v31 = vpop.f32.mrf.mxu1  ;;  %v1208_v40 = vpop.f32.mrf.mxu0 }
 0x3d5   :  { %v4252_v48 = vpop.f32.mrf.mxu3 }
 0x3d7   :  { %v4268_v15 = vpop.f32.mrf.mxu1  ;;  %v1211_v18 = vpop.f32.mrf.mxu0 }
 0x3dd   :  { %v1158_v45 = vpop.f32.mrf.mxu3 }
 0x3de   :  { %v1197_v33 = vadd.f32 %v1196_v47, %v1158_v45 }
 0x3df   :  { %v1332_v3 = vpop.f32.mrf.mxu1  ;;  %v1214_v28 = vpop.f32.mrf.mxu0 }
 0x3e0   :  { %1250 = vmatmul.f32.vlgmr.msrb.gmra.mxu2 %v1197_v33  ;;  %v1463_v33 = vld [vmem:[#allocation2 + $0x2e8] sm:$0xff] }
 0x3e1   :  { %3056 = vmatpush.msk.msrb.mxu2 %vm260_vm1, %v3535_v30  ;;  %3037 = vmatmul.msk.f32.gmra.mxu1 %vm435_vm5, %v1463_v33  ;;  %v1638_v33 = vld [vmem:[#allocation2 + $0x360] sm:$0xff] }
 0x3e3   :  { %1713 = vmatpush.msrb.mxu2 %v3544_v34 }
 0x3e5   :  { %1714 = vmatpush.msrb.mxu2 %v3557_v5  ;;  %v1161_v55 = vpop.f32.mrf.mxu3 }
 0x3e6   :  { %v1200_v53 = vadd.f32 %v1199_v43, %v1161_v55  ;;  %v1456_v43 = vld [vmem:[#allocation2 + $0x2b0] sm:$0xff]  ;;  %v1458_v55 = vld [vmem:[#allocation2 + $0x2c0] sm:$0xff] }
 0x3e7   :  { %1715 = vmatpush.msrb.mxu2 %v3567_v41  ;;  %v1335_v17 = vpop.f32.mrf.mxu1 }
 0x3e8   :  { %1253 = vmatmul.f32.gmra.mxu2 %v1200_v53 }
 0x3e9   :  { %1716 = vmatpush.msrb.mxu2 %v3578_v46 }
 0x3ed   :  { %v1164_v58 = vpop.f32.mrf.mxu3 }
 0x3ee   :  { %v1203_v32 = vadd.f32 %v1202_v54, %v1164_v58 }
 0x3ef   :  { %v1338_v24 = vpop.f32.mrf.mxu1 }
 0x3f0   :  { %1256 = vmatmul.f32.gmra.mxu2 %v1203_v32 }
 0x3f5   :  { %v1167_v63 = vpop.f32.mrf.mxu3 }
 0x3f6   :  { %v1206_v0 = vadd.f32 %v1205_v60, %v1167_v63  ;;  %v1460_v60 = vld [vmem:[#allocation2 + $0x2d0] sm:$0xff] }
 0x3f8   :  { %1259 = vmatmul.f32.gmra.mxu2 %v1206_v0 }
 0x3fd   :  { %v1170_v2 = vpop.f32.mrf.mxu3 }
 0x3fe   :  { %v1209_v37 = vadd.f32 %v1208_v40, %v1170_v2 }
 0x400   :  { %1262 = vmatmul.f32.gmra.mxu2 %v1209_v37  ;;  %v1464_v37 = vld [vmem:[#allocation2 + $0x2f0] sm:$0xff] }
 0x405   :  { %v1173_v59 = vpop.f32.mrf.mxu3 }
 0x406   :  { %v1212_v51 = vadd.f32 %v1211_v18, %v1173_v59 }
 0x408   :  { %1265 = vmatmul.f32.gmra.mxu2 %v1212_v51  ;;  %v1466_v51 = vld [vmem:[#allocation2 + $0x300] sm:$0x3] }
 0x40d   :  { %v1176_v10 = vpop.f32.mrf.mxu3 }
 0x40e   :  { %v1215_v14 = vadd.f32 %v1214_v28, %v1176_v10  ;;  %v1628_v28 = vld [vmem:[#allocation2 + $0x310] sm:$0xff]  ;;  %v1631_v10 = vld [vmem:[#allocation2 + $0x328] sm:$0xff] }
 0x410   :  { %1268 = vmatmul.f32.gmra.mxu2 %v1215_v14  ;;  %v1630_v14 = vld [vmem:[#allocation2 + $0x320] sm:$0xff] }
 0x415   :  { %v1370_v36 = vpop.f32.mrf.mxu3 }
 0x416   :  { %v1371_v25 = vadd.f32 %v1370_v36, %v1332_v3  ;;  %v1629_v3 = vld [vmem:[#allocation2 + $0x318] sm:$0xff] }
 0x418   :  { %1424 = vmatmul.f32.vlgmr.msrb.gmra.mxu0 %v1371_v25  ;;  %1505 = vmatmul.f32.vlgmr.msra.gmra.mxu2 %v1454_v4  ;;  %v1635_v4 = vld [vmem:[#allocation2 + $0x348] sm:$0xff]  ;;  %v1634_v25 = vld [vmem:[#allocation2 + $0x340] sm:$0xff] }
 0x419   :  { %3080 = vmatpush.msk.msrb.mxu0 %vm260_vm1, %v3535_v30  ;;  %v1341_v30 = vpop.f32.mrf.mxu1 }
 0x41b   :  { %1887 = vmatpush.msrb.mxu0 %v3544_v34  ;;  %v1465_v34 = vld [vmem:[#allocation2 + $0x2f8] sm:$0xff] }
 0x41c   :  { %3038 = vmatmul.msk.f32.gmra.mxu1 %vm435_vm5, %v1465_v34 }
 0x41d   :  { %1888 = vmatpush.msrb.mxu0 %v3557_v5  ;;  %v1373_v47 = vpop.f32.mrf.mxu3  ;;  %v1467_v5 = vld [vmem:[#allocation2 + $0x308] sm:$0x3] }
 0x41e   :  { %v1374_v45 = vadd.f32 %v1373_v47, %v1335_v17  ;;  %v1632_v17 = vld [vmem:[#allocation2 + $0x330] sm:$0xff] }
 0x41f   :  { %1889 = vmatpush.msrb.mxu0 %v3567_v41  ;;  %v1636_v47 = vld [vmem:[#allocation2 + $0x350] sm:$0xff] }
 0x420   :  { %1427 = vmatmul.f32.gmra.mxu0 %v1374_v45  ;;  %1508 = vmatmul.f32.gmra.mxu2 %v1456_v43  ;;  %v1639_v45 = vld [vmem:[#allocation2 + $0x368] sm:$0xff] }
 0x421   :  { %1890 = vmatpush.msrb.mxu0 %v3578_v46  ;;  %v1344_v41 = vpop.f32.mrf.mxu1  ;;  %v1462_v46 = vld [vmem:[#allocation2 + $0x2e0] sm:$0xff] }
 0x424   :  { %3039 = vmatmul.msk.f32.gmra.mxu1 %vm435_vm5, %v1467_v5 }
 0x425   :  { %v1376_v54 = vpop.f32.mrf.mxu3 }
 0x426   :  { %v1377_v53 = vadd.f32 %v1376_v54, %v1338_v24  ;;  %v1637_v24 = vld [vmem:[#allocation2 + $0x358] sm:$0xff] }
 0x428   :  { %1430 = vmatmul.f32.gmra.mxu0 %v1377_v53  ;;  %1511 = vmatmul.f32.gmra.mxu2 %v1458_v55  ;;  %v1641_v55 = vld [vmem:[#allocation2 + $0x378] sm:$0x3] }
 0x429   :  { %v1347_v40 = vpop.f32.mrf.mxu1 }
 0x42d   :  { %v1379_v58 = vpop.f32.mrf.mxu3 }
 0x42e   :  { %v1380_v32 = vadd.f32 %v1379_v58, %v1341_v30  ;;  %v1640_v30 = vld [vmem:[#allocation2 + $0x370] sm:$0x3] }
 0x430   :  { %1433 = vmatmul.f32.gmra.mxu0 %v1380_v32  ;;  %1514 = vmatmul.f32.gmra.mxu2 %v1460_v60  ;;  %v3079_v32 = vld [vmem:[%s4717_s5 + $0x3f8] sm:$0xff] }
 0x431   :  { %v1350_v18 = vpop.f32.mrf.mxu1  ;;  %1756 = vmatpush.msra.mxu1 %v3079_v32 }
 0x435   :  { %v1382_v63 = vpop.f32.mrf.mxu3 }
 0x436   :  { %v1383_v0 = vadd.f32 %v1382_v63, %v1344_v41  ;;  %v3078_v41 = vld [vmem:[%s4717_s5 + $0x3f0] sm:$0xff] }
 0x437   :  { %1757 = vmatpush.msra.mxu1 %v3078_v41  ;;  %v3064_v41 = vld [vmem:[%s4717_s5 + $0x380] sm:$0xff] }
 0x438   :  { %1436 = vmatmul.f32.gmra.mxu0 %v1383_v0  ;;  %1517 = vmatmul.f32.gmra.mxu2 %v1462_v46  ;;  %v3077_v0 = vld [vmem:[%s4717_s5 + $0x3e8] sm:$0xff] }
 0x439   :  { %v1544_v5 = vpop.f32.mrf.mxu1  ;;  %1758 = vmatpush.msra.mxu1 %v3077_v0 }
 0x43d   :  { %v1385_v2 = vpop.f32.mrf.mxu3 }
 0x43e   :  { %v1386_v11 = vadd.f32 %v1385_v2, %v1347_v40 }
 0x440   :  { %1439 = vmatmul.f32.gmra.mxu0 %v1386_v11  ;;  %1520 = vmatmul.f32.gmra.mxu2 %v1464_v37  ;;  %v3076_v37 = vld [vmem:[%s4717_s5 + $0x3e0] sm:$0xff]  ;;  %v3075_v11 = vld [vmem:[%s4717_s5 + $0x3d8] sm:$0xff] }
 0x441   :  { %v1547_v63 = vpop.f32.mrf.mxu1  ;;  %1759 = vmatpush.msra.mxu1 %v3076_v37  ;;  %v1803_v37 = vld [vmem:[#allocation2 + $0x388] sm:$0xff] }
 0x443   :  { %1760 = vmatpush.msra.mxu1 %v3075_v11 }
 0x445   :  { %v1388_v59 = vpop.f32.mrf.mxu3 }
 0x446   :  { %v1389_v19 = vadd.f32 %v1388_v59, %v1350_v18  ;;  %v3074_v18 = vld [vmem:[%s4717_s5 + $0x3d0] sm:$0xff] }
 0x447   :  { %1761 = vmatpush.msra.mxu1 %v3074_v18 }
 0x448   :  { %1442 = vmatmul.f32.gmra.mxu0 %v1389_v19  ;;  %1523 = vmatmul.f32.gmra.mxu2 %v1466_v51  ;;  %v3073_v19 = vld [vmem:[%s4717_s5 + $0x3c8] sm:$0xff] }
 0x449   :  { %v1550_v59 = vpop.f32.mrf.mxu1  ;;  %1762 = vmatpush.msra.mxu1 %v3073_v19  ;;  %v1805_v19 = vld [vmem:[#allocation2 + $0x398] sm:$0xff] }
 0x450   :  { %3057 = vmatmul.msk.f32.vlgmr.msrb.gmra.mxu2 %vm435_vm5, %v1629_v3  ;;  %1679 = vmatmul.f32.vlgmr.msra.gmra.mxu0 %v1628_v28 }
 0x458   :  { %3058 = vmatmul.msk.f32.gmra.mxu2 %vm435_vm5, %v1631_v10  ;;  %1682 = vmatmul.f32.gmra.mxu0 %v1630_v14  ;;  %v3072_v10 = vld [vmem:[%s4717_s5 + $0x3c0] sm:$0xff]  ;;  %v3071_v14 = vld [vmem:[%s4717_s5 + $0x3b8] sm:$0xff] }
 0x459   :  { %1763 = vmatpush.msra.mxu1 %v3072_v10 }
 0x45b   :  { %1764 = vmatpush.msra.mxu1 %v3071_v14 }
 0x460   :  { %3059 = vmatmul.msk.f32.gmra.mxu2 %vm435_vm5, %v1633_v35  ;;  %1685 = vmatmul.f32.gmra.mxu0 %v1632_v17  ;;  %v3070_v35 = vld [vmem:[%s4717_s5 + $0x3b0] sm:$0xff] }
 0x461   :  { %1765 = vmatpush.msra.mxu1 %v3070_v35 }
 0x463   :  { %v4286_v36 = vpop.f32.mrf.mxu2 }
 0x468   :  { %3060 = vmatmul.msk.f32.gmra.mxu2 %vm435_vm5, %v1635_v4  ;;  %1688 = vmatmul.f32.gmra.mxu0 %v1634_v25  ;;  %v1553_v4 = vpop.f32.mrf.mxu1  ;;  %v3069_v25 = vld [vmem:[%s4717_s5 + $0x3a8] sm:$0xff] }
 0x469   :  { %1766 = vmatpush.msra.mxu1 %v3069_v25 }
 0x46b   :  { %v4289_v61 = vpop.f32.mrf.mxu2 }
 0x470   :  { %3061 = vmatmul.msk.f32.gmra.mxu2 %vm435_vm5, %v1637_v24  ;;  %1691 = vmatmul.f32.gmra.mxu0 %v1636_v47  ;;  %v3068_v47 = vld [vmem:[%s4717_s5 + $0x3a0] sm:$0xff] }
 0x471   :  { %1767 = vmatpush.msra.mxu1 %v3068_v47 }
 0x473   :  { %v4292_v43 = vpop.f32.mrf.mxu2 }
 0x478   :  { %3062 = vmatmul.msk.f32.gmra.mxu2 %vm435_vm5, %v1639_v45  ;;  %1694 = vmatmul.f32.gmra.mxu0 %v1638_v33  ;;  %v3067_v33 = vld [vmem:[%s4717_s5 + $0x398] sm:$0xff] }
 0x479   :  { %1768 = vmatpush.msra.mxu1 %v3067_v33  ;;  %v1809_v33 = vld [vmem:[#allocation2 + $0x3b8] sm:$0xff] }
 0x47b   :  { %v4295_v54 = vpop.f32.mrf.mxu2 }
 0x480   :  { %3063 = vmatmul.msk.f32.gmra.mxu2 %vm435_vm5, %v1641_v55  ;;  %1697 = vmatmul.f32.gmra.mxu0 %v1640_v30  ;;  %v3066_v55 = vld [vmem:[%s4717_s5 + $0x390] sm:$0xff] }
 0x481   :  { %1769 = vmatpush.msra.mxu1 %v3066_v55 }
 0x483   :  { %v4298_v53 = vpop.f32.mrf.mxu2 }
 0x488   :  { %3081 = vmatmul.msk.f32.vlgmr.msrb.gmra.mxu0 %vm435_vm5, %v1803_v37 }
 0x48b   :  { %v4300_v34 = vpop.f32.mrf.mxu2 }
 0x490   :  { %3082 = vmatmul.msk.f32.gmra.mxu0 %vm435_vm5, %v1805_v19 }
 0x493   :  { %v4302_v58 = vpop.f32.mrf.mxu2 }
 0x495   :  { %v4304_v60 = vpop.f32.mrf.mxu0 }
 0x49b   :  { %v1506_v46 = vpop.f32.mrf.mxu2 }
 0x49c   :  { %v1545_v40 = vadd.f32 %v1544_v5, %v1506_v46  ;;  %v3065_v5 = vld [vmem:[%s4717_s5 + $0x388] sm:$0xff]  ;;  %v1556_v46 = vpop.f32.mrf.mxu1 }
 0x49d   :  { %v4315_v2 = vpop.f32.mrf.mxu0  ;;  %1770 = vmatpush.msra.mxu1 %v3065_v5  ;;  %v1804_v5 = vld [vmem:[#allocation2 + $0x390] sm:$0xff] }
 0x49e   :  { %1598 = vmatmul.f32.vlgmr.msrb.gmra.mxu3 %v1545_v40 }
 0x49f   :  { %1771 = vmatpush.msra.mxu1 %v3064_v41  ;;  %v1811_v41 = vld [vmem:[#allocation2 + $0x3c8] sm:$0xff] }
 0x4a3   :  { %v1509_v51 = vpop.f32.mrf.mxu2 }
 0x4a4   :  { %v1548_v3 = vadd.f32 %v1547_v63, %v1509_v51  ;;  %v1559_v18 = vpop.f32.mrf.mxu1 }
 0x4a5   :  { %v4329_v28 = vpop.f32.mrf.mxu0 }
 0x4a6   :  { %1601 = vmatmul.f32.gmra.mxu3 %v1548_v3 }
 0x4ab   :  { %v1512_v17 = vpop.f32.mrf.mxu2 }
 0x4ac   :  { %v1551_v24 = vadd.f32 %v1550_v59, %v1512_v17  ;;  %v1562_v10 = vpop.f32.mrf.mxu1  ;;  %v1807_v17 = vld [vmem:[#allocation2 + $0x3a8] sm:$0xff] }
 0x4ad   :  { %v4346_v45 = vpop.f32.mrf.mxu0  ;;  %3083 = vmatmul.msk.f32.gmra.mxu0 %vm435_vm5, %v1807_v17 }
 0x4ae   :  { %1604 = vmatmul.f32.gmra.mxu3 %v1551_v24  ;;  %v1802_v24 = vld [vmem:[#allocation2 + $0x380] sm:$0xff] }
 0x4b3   :  { %v1515_v30 = vpop.f32.mrf.mxu2 }
 0x4b4   :  { %v1554_v32 = vadd.f32 %v1553_v4, %v1515_v30 }
 0x4b5   :  { %v4360_v63 = vpop.f32.mrf.mxu0  ;;  %3084 = vmatmul.msk.f32.gmra.mxu0 %vm435_vm5, %v1809_v33  ;;  %v1812_v33 = vld [vmem:[#allocation2 + $0x3d0] sm:$0xff] }
 0x4b6   :  { %1607 = vmatmul.f32.gmra.mxu3 %v1554_v32 }
 0x4bb   :  { %v1518_v0 = vpop.f32.mrf.mxu2 }
 0x4bc   :  { %v1557_v40 = vadd.f32 %v1556_v46, %v1518_v0 }
 0x4bd   :  { %v4362_v11 = vpop.f32.mrf.mxu0  ;;  %3085 = vmatmul.msk.f32.gmra.mxu0 %vm435_vm5, %v1811_v41 }
 0x4be   :  { %1610 = vmatmul.f32.gmra.mxu3 %v1557_v40  ;;  %v1806_v40 = vld [vmem:[#allocation2 + $0x3a0] sm:$0xff] }
 0x4c3   :  { %v1521_v59 = vpop.f32.mrf.mxu2 }
 0x4c4   :  { %v1560_v51 = vadd.f32 %v1559_v18, %v1521_v59  ;;  %v1813_v18 = vld [vmem:[#allocation2 + $0x3d8] sm:$0xff] }
 0x4c5   :  { %v4365_v3 = vpop.f32.mrf.mxu0  ;;  %3086 = vmatmul.msk.f32.gmra.mxu0 %vm435_vm5, %v1813_v18  ;;  %v3100_v18 = vld [vmem:[%s4717_s5 + $0x460] sm:$0xff] }
 0x4c6   :  { %4725 = vst [vmem:[#allocation8_spill] sm:$0xff] %v4365_v3  ;;  %1613 = vmatmul.f32.gmra.mxu3 %v1560_v51  ;;  %v1815_v51 = vld [vmem:[#allocation2 + $0x3e8] sm:$0x3] }
 0x4cb   :  { %v1524_v14 = vpop.f32.mrf.mxu2 }
 0x4cc   :  { %v1563_v35 = vadd.f32 %v1562_v10, %v1524_v14  ;;  %v1808_v10 = vld [vmem:[#allocation2 + $0x3b0] sm:$0xff] }
 0x4cd   :  { %v1680_v4 = vpop.f32.mrf.mxu0  ;;  %3087 = vmatmul.msk.f32.gmra.mxu0 %vm435_vm5, %v1815_v51  ;;  %v3098_v51 = vld [vmem:[%s4717_s5 + $0x450] sm:$0xff] }
 0x4ce   :  { %1616 = vmatmul.f32.gmra.mxu3 %v1563_v35 }
 0x4d3   :  { %v1718_v25 = vpop.f32.mrf.mxu2 }
 0x4d4   :  { %v1719_v47 = vadd.f32 %v1718_v25, %v1680_v4  ;;  %v1810_v4 = vld [vmem:[#allocation2 + $0x3c0] sm:$0xff] }
 0x4d5   :  { %v1683_v55 = vpop.f32.mrf.mxu0 }
 0x4d6   :  { %1772 = vmatmul.f32.vlgmr.msra.gmra.mxu1 %v1719_v47  ;;  %1853 = vmatmul.f32.vlgmr.msra.gmra.mxu3 %v1802_v24 }
 0x4db   :  { %v1721_v30 = vpop.f32.mrf.mxu2 }
 0x4dc   :  { %v1722_v32 = vadd.f32 %v1721_v30, %v1683_v55 }
 0x4dd   :  { %v1686_v46 = vpop.f32.mrf.mxu0 }
 0x4de   :  { %1775 = vmatmul.f32.gmra.mxu1 %v1722_v32  ;;  %1856 = vmatmul.f32.gmra.mxu3 %v1804_v5  ;;  %v1814_v32 = vld [vmem:[#allocation2 + $0x3e0] sm:$0x3] }
 0x4e3   :  { %v1724_v0 = vpop.f32.mrf.mxu2 }
 0x4e4   :  { %v1725_v37 = vadd.f32 %v1724_v0, %v1686_v46  ;;  %v3103_v46 = vld [vmem:[%s4717_s5 + $0x478] sm:$0xff]  ;;  %v3102_v0 = vld [vmem:[%s4717_s5 + $0x470] sm:$0xff] }
 0x4e5   :  { %v1689_v59 = vpop.f32.mrf.mxu0  ;;  %1930 = vmatpush.msra.mxu2 %v3103_v46 }
 0x4e6   :  { %1778 = vmatmul.f32.gmra.mxu1 %v1725_v37  ;;  %1859 = vmatmul.f32.gmra.mxu3 %v1806_v40  ;;  %v3101_v37 = vld [vmem:[%s4717_s5 + $0x468] sm:$0xff] }
 0x4e7   :  { %1931 = vmatpush.msra.mxu2 %v3102_v0 }
 0x4e9   :  { %1932 = vmatpush.msra.mxu2 %v3101_v37 }
 0x4eb   :  { %v1727_v19 = vpop.f32.mrf.mxu2  ;;  %1933 = vmatpush.msra.mxu2 %v3100_v18 }
 0x4ec   :  { %v1728_v14 = vadd.f32 %v1727_v19, %v1689_v59  ;;  %v3099_v59 = vld [vmem:[%s4717_s5 + $0x458] sm:$0xff] }
 0x4ed   :  { %v1692_v35 = vpop.f32.mrf.mxu0  ;;  %1934 = vmatpush.msra.mxu2 %v3099_v59 }
 0x4ee   :  { %1781 = vmatmul.f32.gmra.mxu1 %v1728_v14  ;;  %1862 = vmatmul.f32.gmra.mxu3 %v1808_v10  ;;  %v3097_v10 = vld [vmem:[%s4717_s5 + $0x448] sm:$0xff]  ;;  %v3096_v14 = vld [vmem:[%s4717_s5 + $0x440] sm:$0xff] }
 0x4ef   :  { %1935 = vmatpush.msra.mxu2 %v3098_v51 }
 0x4f1   :  { %1936 = vmatpush.msra.mxu2 %v3097_v10 }
 0x4f3   :  { %v1730_v17 = vpop.f32.mrf.mxu2  ;;  %1937 = vmatpush.msra.mxu2 %v3096_v14 }
 0x4f4   :  { %v1731_v25 = vadd.f32 %v1730_v17, %v1692_v35  ;;  %v3095_v35 = vld [vmem:[%s4717_s5 + $0x438] sm:$0xff]  ;;  %v3094_v17 = vld [vmem:[%s4717_s5 + $0x430] sm:$0xff] }
 0x4f5   :  { %v1695_v24 = vpop.f32.mrf.mxu0  ;;  %1938 = vmatpush.msra.mxu2 %v3095_v35 }
 0x4f6   :  { %1784 = vmatmul.f32.gmra.mxu1 %v1731_v25  ;;  %1865 = vmatmul.f32.gmra.mxu3 %v1810_v4  ;;  %v3093_v25 = vld [vmem:[%s4717_s5 + $0x428] sm:$0xff] }
 0x4f7   :  { %1939 = vmatpush.msra.mxu2 %v3094_v17 }
 0x4f9   :  { %1940 = vmatpush.msra.mxu2 %v3093_v25 }
 0x4fb   :  { %v1733_v47 = vpop.f32.mrf.mxu2 }
 0x4fc   :  { %v1734_v55 = vadd.f32 %v1733_v47, %v1695_v24  ;;  %v3092_v24 = vld [vmem:[%s4717_s5 + $0x420] sm:$0xff]  ;;  %v3091_v47 = vld [vmem:[%s4717_s5 + $0x418] sm:$0xff] }
 0x4fd   :  { %v1698_v30 = vpop.f32.mrf.mxu0  ;;  %1941 = vmatpush.msra.mxu2 %v3092_v24 }
 0x4fe   :  { %1787 = vmatmul.f32.gmra.mxu1 %v1734_v55  ;;  %1868 = vmatmul.f32.gmra.mxu3 %v1812_v33  ;;  %v3090_v33 = vld [vmem:[%s4717_s5 + $0x410] sm:$0xff] }
 0x4ff   :  { %1942 = vmatpush.msra.mxu2 %v3091_v47 }
 0x501   :  { %1943 = vmatpush.msra.mxu2 %v3090_v33 }
 0x503   :  { %v1736_v5 = vpop.f32.mrf.mxu2 }
 0x504   :  { %v1737_v41 = vadd.f32 %v1736_v5, %v1698_v30  ;;  %v3089_v30 = vld [vmem:[%s4717_s5 + $0x408] sm:$0xff]  ;;  %v3088_v5 = vld [vmem:[%s4717_s5 + $0x400] sm:$0xff] }
 0x505   :  { %1944 = vmatpush.msra.mxu2 %v3089_v30  ;;  %v1892_v46 = vpop.f32.mrf.mxu0 }
 0x506   :  { %1790 = vmatmul.f32.gmra.mxu1 %v1737_v41  ;;  %1871 = vmatmul.f32.gmra.mxu3 %v1814_v32 }
 0x507   :  { %1945 = vmatpush.msra.mxu2 %v3088_v5 }
 0x50d   :  { %v1895_v37 = vpop.f32.mrf.mxu0 }
 0x521   :  { %v4379_v40 = vpop.f32.mrf.mxu3 }
 0x529   :  { %v4393_v19 = vpop.f32.mrf.mxu3 }
 0x52a   :  { %v1898_v51 = vpop.f32.mrf.mxu0 }
 0x531   :  { %v4407_v4 = vpop.f32.mrf.mxu3 }
 0x532   :  { %v1901_v17 = vpop.f32.mrf.mxu0 }
 0x539   :  { %v4421_v55 = vpop.f32.mrf.mxu3 }
 0x53a   :  { %v1904_v33 = vpop.f32.mrf.mxu0 }
 0x541   :  { %v4429_v32 = vpop.f32.mrf.mxu3 }
 0x549   :  { %v4431_v41 = vpop.f32.mrf.mxu3 }
 0x54a   :  { %4726 = vst [vmem:[#allocation9_spill] sm:$0xff] %v4431_v41 }
 0x551   :  { %v4433_v0 = vpop.f32.mrf.mxu3 }
 0x552   :  { %4727 = vst [vmem:[#allocation10_spill] sm:$0xff] %v4433_v0  ;;  %v1907_v0 = vpop.f32.mrf.mxu0 }
 0x559   :  { %v1854_v18 = vpop.f32.mrf.mxu3 }
 0x55a   :  { %v1893_v59 = vadd.f32 %v1892_v46, %v1854_v18  ;;  %v1910_v46 = vpop.f32.mrf.mxu0 }
 0x55c   :  { %1946 = vmatmul.f32.vlgmr.msra.gmra.mxu2 %v1893_v59 }
 0x561   :  { %v1857_v10 = vpop.f32.mrf.mxu3 }
 0x562   :  { %v1896_v14 = vadd.f32 %v1895_v37, %v1857_v10  ;;  %v1773_v37 = vpop.f32.mrf.mxu1 }
 0x564   :  { %1949 = vmatmul.f32.gmra.mxu2 %v1896_v14 }
 0x569   :  { %v1860_v35 = vpop.f32.mrf.mxu3 }
 0x56a   :  { %v1899_v25 = vadd.f32 %v1898_v51, %v1860_v35  ;;  %v1776_v10 = vpop.f32.mrf.mxu1 }
 0x56c   :  { %1952 = vmatmul.f32.gmra.mxu2 %v1899_v25 }
 0x571   :  { %v1863_v24 = vpop.f32.mrf.mxu3 }
 0x572   :  { %v1902_v47 = vadd.f32 %v1901_v17, %v1863_v24  ;;  %v1779_v51 = vpop.f32.mrf.mxu1  ;;  %v740_v24 = vadd.f32 %v4182_v50, %v4120_v16  ;;  %v749_v16 = vadd.f32 %v4207_v27, %v4126_v6 }
 0x574   :  { %1955 = vmatmul.f32.gmra.mxu2 %v1902_v47  ;;  %v737_v47 = vadd.f32 %v4164_v49, %v4118_v21  ;;  %v928_v49 = vadd.f32 %v4246_v9, %v749_v16 }
 0x579   :  { %v1866_v30 = vpop.f32.mrf.mxu3 }
 0x57a   :  { %v1905_v5 = vadd.f32 %v1904_v33, %v1866_v30  ;;  %v1782_v25 = vpop.f32.mrf.mxu1  ;;  %v746_v30 = vadd.f32 %v4205_v22, %v4124_v13 }
 0x57c   :  { %1958 = vmatmul.f32.gmra.mxu2 %v1905_v5  ;;  %v924_v5 = vadd.f32 %v4226_v1, %v737_v47  ;;  %v927_v21 = vadd.f32 %v4241_v56, %v746_v30 }
 0x581   :  { %v1869_v3 = vpop.f32.mrf.mxu3 }
 0x582   :  { %v1908_v41 = vadd.f32 %v1907_v0, %v1869_v3  ;;  %v743_v3 = vadd.f32 %v4200_v62, %v4122_v23  ;;  %v1785_v0 = vpop.f32.mrf.mxu1  ;;  %v752_v23 = vadd.f32 %v4210_v39, %v4128_v12  ;;  %v1098_v62 = vadd.f32 %v4244_v26, %v924_v5 }
 0x583   :  { %v755_v12 = vadd.f32 %v4218_v42, %v4130_v29  ;;  %v1102_v39 = vadd.f32 %v4264_v57, %v928_v49 }
 0x584   :  { %1961 = vmatmul.f32.gmra.mxu2 %v1908_v41  ;;  %v925_v41 = vadd.f32 %v4233_v38, %v740_v24  ;;  %v929_v1 = vadd.f32 %v4250_v7, %v752_v23  ;;  %v1101_v38 = vadd.f32 %v4256_v52, %v927_v21  ;;  %v1272_v6 = vadd.f32 %v4286_v36, %v1098_v62 }
 0x585   :  { %v930_v36 = vadd.f32 %v4252_v48, %v755_v12 }
 0x586   :  { %v1099_v50 = vadd.f32 %v4248_v8, %v925_v41  ;;  %v1275_v26 = vadd.f32 %v4295_v54, %v1101_v38  ;;  %v1446_v9 = vadd.f32 %v4304_v60, %v1272_v6  ;;  %v1103_v52 = vadd.f32 %v4266_v31, %v929_v1 }
 0x587   :  { %v1104_v48 = vadd.f32 %v4268_v15, %v930_v36 }
 0x588   :  { %v1273_v22 = vadd.f32 %v4289_v61, %v1099_v50  ;;  %v1276_v61 = vadd.f32 %v4298_v53, %v1102_v39  ;;  %v1620_v29 = vadd.f32 %v4379_v40, %v1446_v9  ;;  %v1277_v54 = vadd.f32 %v4300_v34, %v1103_v52  ;;  %v4728_v34 = vld [vmem:[#allocation9_spill] sm:$0xff] }
 0x589   :  { %v1872_v18 = vpop.f32.mrf.mxu3 }
 0x58a   :  { %v1911_v59 = vadd.f32 %v1910_v46, %v1872_v18  ;;  %v926_v46 = vadd.f32 %v4238_v20, %v743_v3  ;;  %v1447_v20 = vadd.f32 %v4315_v2, %v1273_v22  ;;  %v1450_v60 = vadd.f32 %v4360_v63, %v1276_v61 }
 0x58b   :  { %v1451_v53 = vadd.f32 %v4362_v11, %v1277_v54  ;;  %v4730_v11 = vld [vmem:[#allocation10_spill] sm:$0xff] }
 0x58c   :  { %1964 = vmatmul.f32.gmra.mxu2 %v1911_v59  ;;  %v1100_v13 = vadd.f32 %v4254_v44, %v926_v46  ;;  %v1621_v7 = vadd.f32 %v4393_v19, %v1447_v20  ;;  %v1788_v44 = vpop.f32.mrf.mxu1 }
 0x58d   :  { %v1625_v24 = vadd.f32 %v4728_v34, %v1451_v53 }
 0x58e   :  { %v1274_v27 = vadd.f32 %v4292_v43, %v1100_v13  ;;  %v1449_v43 = vadd.f32 %v4346_v45, %v1275_v26  ;;  %v1795_v57 = vadd.f32 %v1776_v10, %v1621_v7  ;;  %v1624_v45 = vadd.f32 %v4429_v32, %v1450_v60 }
 0x58f   :  { %v1278_v10 = vadd.f32 %v4302_v58, %v1104_v48 }
 0x590   :  { %v1448_v8 = vadd.f32 %v4329_v28, %v1274_v27  ;;  %v1623_v2 = vadd.f32 %v4421_v55, %v1449_v43  ;;  %v1794_v28 = vadd.f32 %v1773_v37, %v1620_v29  ;;  %v1798_v63 = vadd.f32 %v1785_v0, %v1624_v45  ;;  %v4729_v37 = vld [vmem:[#allocation8_spill] sm:$0xff] }
 0x592   :  { %v1622_v42 = vadd.f32 %v4407_v4, %v1448_v8  ;;  %v1797_v18 = vadd.f32 %v1782_v25, %v1623_v2 }
 0x594   :  { %v1796_v19 = vadd.f32 %v1779_v51, %v1622_v42  ;;  %v1452_v51 = vadd.f32 %v4729_v37, %v1278_v10  ;;  %v1791_v3 = vpop.f32.mrf.mxu1  ;;  %v1975_v10 = vld [vmem:[%s4718_s6] sm:$0x1] }
 0x596   :  { %v1626_v30 = vadd.f32 %v4730_v11, %v1452_v51 }
 0x5df   :  { %v1947_v14 = vpop.f32.mrf.mxu2 }
 0x5e0   :  { %v1968_v40 = vadd.f32 %v1947_v14, %v1794_v28  ;;  %v1800_v14 = vadd.f32 %v1791_v3, %v1626_v30 }
 0x5e7   :  { %v1950_v35 = vpop.f32.mrf.mxu2 }
 0x5e8   :  { %v1969_v31 = vadd.f32 %v1950_v35, %v1795_v57  ;;  %v1799_v35 = vadd.f32 %v1788_v44, %v1625_v24 }
 0x5ea   :  { %v1977_v47 = vadd.f32 %v1969_v31, %v1968_v40 }
 0x5ef   :  { %v1953_v17 = vpop.f32.mrf.mxu2 }
 0x5f0   :  { %v1970_v59 = vadd.f32 %v1953_v17, %v1796_v19 }
 0x5f2   :  { %v1978_v15 = vadd.f32 %v1977_v47, %v1970_v59 }
 0x5f7   :  { %v1956_v33 = vpop.f32.mrf.mxu2 }
 0x5f8   :  { %v1971_v55 = vadd.f32 %v1956_v33, %v1797_v18 }
 0x5fa   :  { %v1979_v32 = vadd.f32 %v1978_v15, %v1971_v55 }
 0x5ff   :  { %v1959_v56 = vpop.f32.mrf.mxu2 }
 0x600   :  { %v1972_v41 = vadd.f32 %v1959_v56, %v1798_v63 }
 0x602   :  { %v1980_v17 = vadd.f32 %v1979_v32, %v1972_v41 }
 0x607   :  { %v1962_v4 = vpop.f32.mrf.mxu2 }
 0x608   :  { %v1973_v25 = vadd.f32 %v1962_v4, %v1799_v35 }
 0x60a   :  { %v1981_v58 = vadd.f32 %v1980_v17, %v1973_v25 }
 0x60f   :  { %v1965_v5 = vpop.f32.mrf.mxu2 }
 0x610   :  { %v1974_v46 = vadd.f32 %v1965_v5, %v1800_v14 }
 0x612   :  { %v1982_v16 = vsel %vm260_vm1, %v1974_v46, 0.0 }
 0x613   :  { %v1983_v0 = vadd.f32 %v1982_v16, %v1981_v58 }
 0x615   :  { %v1984_v50 = vrot.slane %v1983_v0, 4 }
 0x617   :  { %v1985_v33 = vadd.f32 %v1984_v50, %v1983_v0 }
 0x619   :  { %v1986_v21 = vrot.slane %v1985_v33, 2 }
 0x61b   :  { %v1987_v23 = vadd.f32 %v1986_v21, %v1985_v33 }
 0x61d   :  { %v1988_v49 = vrot.slane %v1987_v23, 1 }
 0x61f   :  { %v1989_v62 = vadd.f32 %v1988_v49, %v1987_v23  ;;  %v2058_v49 = vld [vmem:[%s4720_s8] sm:$0xff] }
 0x621   :  { %v1990_v13 = vmul.f32 0.02, %v1989_v62  ;;  %v3108_v62 = vld [vmem:[%s4720_s8 + $0x18] sm:$0xff] }
 0x623   :  { %v1991_v22 = vsub.f32 %v1968_v40, %v1990_v13  ;;  %v1992_v1 = vsub.f32 %v1969_v31, %v1990_v13  ;;  %v1993_v38 = vsub.f32 %v1970_v59, %v1990_v13  ;;  %v1994_v6 = vsub.f32 %v1971_v55, %v1990_v13  ;;  %v3187_v55 = vld [vmem:[%s4719_s7] ss:$0 sm:$0xff] }
 0x624   :  { %v1995_v56 = vsub.f32 %v1972_v41, %v1990_v13  ;;  %v1997_v26 = vsub.f32 %v1974_v46, %v1990_v13  ;;  %v1996_v9 = vsub.f32 %v1973_v25, %v1990_v13  ;;  %v2115_v13 = vld [vmem:[#allocation4 + $0x78] sm:$0xff] }
 0x625   :  { %v1998_v27 = vmul.f32 %v1991_v22, %v1991_v22  ;;  %v1999_v20 = vmul.f32 %v1992_v1, %v1992_v1  ;;  %v2000_v12 = vmul.f32 %v1993_v38, %v1993_v38  ;;  %v2001_v8 = vmul.f32 %v1994_v6, %v1994_v6 }
 0x626   :  { %v2002_v44 = vmul.f32 %v1995_v56, %v1995_v56  ;;  %v2004_v36 = vmul.f32 %v1997_v26, %v1997_v26  ;;  %v2003_v61 = vmul.f32 %v1996_v9, %v1996_v9 }
 0x627   :  { %v2005_v39 = vadd.f32 %v1999_v20, %v1998_v27  ;;  %v3109_v27 = vld [vmem:[%s4720_s8 + $0x20] sm:$0xff]  ;;  %v2111_v20 = vld [vmem:[#allocation4 + $0x58] sm:$0xff] }
 0x628   :  { %v2010_v42 = vsel %vm260_vm1, %v2004_v36, 0.0  ;;  %v2103_v36 = vld [vmem:[#allocation4 + $0x18] sm:$0xff] }
 0x629   :  { %v2006_v7 = vadd.f32 %v2005_v39, %v2000_v12  ;;  %v2109_v12 = vld [vmem:[#allocation4 + $0x48] sm:$0xff]  ;;  %v2108_v39 = vld [vmem:[#allocation4 + $0x40] sm:$0xff] }
 0x62b   :  { %v2007_v52 = vadd.f32 %v2006_v7, %v2001_v8  ;;  %v2107_v8 = vld [vmem:[#allocation4 + $0x38] sm:$0xff]  ;;  %v2106_v7 = vld [vmem:[#allocation4 + $0x30] sm:$0xff] }
 0x62d   :  { %v2008_v43 = vadd.f32 %v2007_v52, %v2002_v44  ;;  %v2105_v44 = vld [vmem:[#allocation4 + $0x28] sm:$0xff]  ;;  %v2104_v52 = vld [vmem:[#allocation4 + $0x20] sm:$0xff] }
 0x62f   :  { %v2009_v29 = vadd.f32 %v2008_v43, %v2003_v61  ;;  %v3115_v61 = vld [vmem:[%s4720_s8 + $0x30] sm:$0xff]  ;;  %v2102_v43 = vld [vmem:[#allocation4 + $0x10] sm:$0xff] }
 0x631   :  { %v2011_v57 = vadd.f32 %v2010_v42, %v2009_v29  ;;  %v2101_v29 = vld [vmem:[#allocation4 + $0x8] sm:$0xff]  ;;  %v2100_v42 = vld [vmem:[#allocation4] sm:$0xff] }
 0x633   :  { %v2012_v54 = vrot.slane %v2011_v57, 4 }
 0x635   :  { %v2013_v60 = vadd.f32 %v2012_v54, %v2011_v57  ;;  %v3116_v57 = vld [vmem:[%s4720_s8 + $0x38] sm:$0xff]  ;;  %v2171_v54 = vld [vmem:[#allocation4 + $0xf8] sm:$0xff] }
 0x636   :  { %2172 = vmatpush.msra.mxu0 %v2171_v54  ;;  %v2533_v54 = vld [vmem:[#allocation4 + $0x2f0] sm:$0xff] }
 0x637   :  { %v2014_v2 = vrot.slane %v2013_v60, 2 }
 0x639   :  { %v2015_v28 = vadd.f32 %v2014_v2, %v2013_v60  ;;  %v2170_v60 = vld [vmem:[#allocation4 + $0xf0] sm:$0xff] }
 0x63a   :  { %2173 = vmatpush.msra.mxu0 %v2170_v60  ;;  %v3117_v2 = vld [vmem:[%s4720_s8 + $0x40] sm:$0x3]  ;;  %v2532_v60 = vld [vmem:[#allocation4 + $0x2e8] sm:$0xff] }
 0x63b   :  { %v2016_v19 = vrot.slane %v2015_v28, 1 }
 0x63d   :  { %v2017_v31 = vadd.f32 %v2016_v19, %v2015_v28  ;;  %v2169_v28 = vld [vmem:[#allocation4 + $0xe8] sm:$0xff]  ;;  %v2168_v19 = vld [vmem:[#allocation4 + $0xe0] sm:$0xff] }
 0x63e   :  { %2174 = vmatpush.msra.mxu0 %v2169_v28 }
 0x63f   :  { %v2018_v48 = vmul.f32 0.02, %v2017_v31  ;;  %v2167_v31 = vld [vmem:[#allocation4 + $0xd8] sm:$0xff] }
 0x640   :  { %2175 = vmatpush.msra.mxu0 %v2168_v19  ;;  %v2530_v19 = vld [vmem:[#allocation4 + $0x2d8] sm:$0xff] }
 0x641   :  { %v2019_v53 = vadd.f32 1e-05, %v2018_v48  ;;  %v2166_v48 = vld [vmem:[#allocation4 + $0xd0] sm:$0xff] }
 0x642   :  { %2176 = vmatpush.msra.mxu0 %v2167_v31 }
 0x643   :  { %3191 = vrsqrt.f32 %v2019_v53  ;;  %vm2026_vm7 = vweird.f32 %v2019_v53 }
 0x644   :  { %2177 = vmatpush.msra.mxu0 %v2166_v48  ;;  %v2529_v48 = vld [vmem:[#allocation4 + $0x2d0] sm:$0xff] }
 0x649   :  { %v3192_v45 = vpop.eup %3191 }
 0x64a   :  { %v2021_v18 = vmul.f32 %v3192_v45, %v2019_v53  ;;  %vm2027_vm6 = vweird.f32 %v3192_v45  ;;  %v3122_v53 = vld [vmem:[%s4720_s8 + $0x48] sm:$0xff] }
 0x64b   :  { %vm2028_vm8 = vmor %vm2026_vm7, %vm2027_vm6 }
 0x64c   :  { %v2022_v40 = vmul.f32 %v3192_v45, %v2021_v18  ;;  %v2164_v18 = vld [vmem:[#allocation4 + $0xc0] sm:$0xff] }
 0x64e   :  { %v2023_v59 = vmul.f32 0.5, %v2022_v40  ;;  %v2163_v40 = vld [vmem:[#allocation4 + $0xb8] sm:$0xff] }
 0x650   :  { %v2024_v4 = vsub.f32 1.5, %v2023_v59  ;;  %v2162_v59 = vld [vmem:[#allocation4 + $0xb0] sm:$0xff] }
 0x652   :  { %v2025_v34 = vmul.f32 %v3192_v45, %v2024_v4  ;;  %v3123_v4 = vld [vmem:[%s4720_s8 + $0x50] sm:$0xff] }
 0x654   :  { %v2029_v24 = vsel %vm2028_vm8, %v3192_v45, %v2025_v34  ;;  %v2165_v45 = vld [vmem:[#allocation4 + $0xc8] sm:$0xff]  ;;  %v2160_v34 = vld [vmem:[#allocation4 + $0xa0] sm:$0xff] }
 0x655   :  { %v2030_v63 = vmul.f32 %v2029_v24, %v1975_v10  ;;  %2178 = vmatpush.msra.mxu0 %v2165_v45  ;;  %v2161_v10 = vld [vmem:[#allocation4 + $0xa8] sm:$0xff]  ;;  %v2159_v24 = vld [vmem:[#allocation4 + $0x98] sm:$0xff]  ;;  %v2527_v45 = vld [vmem:[#allocation4 + $0x2c0] sm:$0xff] }
 0x657   :  { %v2032_v47 = vperm.slane %v2030_v63, 0  ;;  %2179 = vmatpush.msra.mxu0 %v2164_v18  ;;  %v2158_v63 = vld [vmem:[#allocation4 + $0x90] sm:$0xff] }
 0x659   :  { %v2038_v37 = vmul.f32 %v2032_v47, %v1995_v56  ;;  %v2039_v51 = vmul.f32 %v2032_v47, %v1996_v9  ;;  %v2040_v35 = vmul.f32 %v2032_v47, %v1997_v26  ;;  %v2037_v3 = vmul.f32 %v2032_v47, %v1994_v6  ;;  %v2059_v6 = vld [vmem:[%s4720_s8 + $0x8] sm:$0xff]  ;;  %v2110_v56 = vld [vmem:[#allocation4 + $0x50] sm:$0xff]  ;;  %v2060_v26 = vld [vmem:[%s4720_s8 + $0x10] sm:$0x3]  ;;  %2180 = vmatpush.msra.mxu0 %v2163_v40 }
 0x65a   :  { %v2036_v11 = vmul.f32 %v2032_v47, %v1993_v38  ;;  %v2035_v25 = vmul.f32 %v2032_v47, %v1992_v1  ;;  %v2034_v5 = vmul.f32 %v2032_v47, %v1991_v22  ;;  %v2114_v22 = vld [vmem:[#allocation4 + $0x70] sm:$0xff]  ;;  %v2113_v1 = vld [vmem:[#allocation4 + $0x68] sm:$0xff]  ;;  %v2112_v38 = vld [vmem:[#allocation4 + $0x60] sm:$0xff] }
 0x65b   :  { %v2049_v15 = vadd.f32 %v3187_v55, %v2039_v51  ;;  %v2050_v41 = vadd.f32 %v3187_v55, %v2040_v35  ;;  %v2048_v30 = vadd.f32 %v3187_v55, %v2038_v37  ;;  %v2047_v14 = vadd.f32 %v3187_v55, %v2037_v3  ;;  %v3110_v9 = vld [vmem:[%s4720_s8 + $0x28] sm:$0x3]  ;;  %2181 = vmatpush.msra.mxu0 %v2162_v59  ;;  %v3124_v47 = vld [vmem:[%s4720_s8 + $0x58] sm:$0x3]  ;;  %v2156_v37 = vld [vmem:[#allocation4 + $0x80] sm:$0xff] }
 0x65c   :  { %v2046_v46 = vadd.f32 %v3187_v55, %v2036_v11  ;;  %v2045_v16 = vadd.f32 %v3187_v55, %v2035_v25  ;;  %v2044_v50 = vadd.f32 %v3187_v55, %v2034_v5  ;;  %v2157_v55 = vld [vmem:[#allocation4 + $0x88] sm:$0xff]  ;;  %v2364_v51 = vld [vmem:[#allocation4 + $0x1f8] sm:$0xff]  ;;  %v2363_v35 = vld [vmem:[#allocation4 + $0x1f0] sm:$0xff] }
 0x65d   :  { %v4492_v32 = vmax.f32 %v2050_v41, 0.0  ;;  %v4494_v17 = vmax.f32 %v2049_v15, 0.0  ;;  %v4500_v58 = vmax.f32 %v2048_v30, 0.0  ;;  %v4504_v0 = vmax.f32 %v2047_v14, 0.0  ;;  %2182 = vmatpush.msra.mxu0 %v2161_v10  ;;  %v3136_v3 = vld [vmem:[%s4720_s8 + $0x78] sm:$0xff]  ;;  %v2361_v41 = vld [vmem:[#allocation4 + $0x1e0] sm:$0xff] }
 0x65e   :  { %v4508_v33 = vmax.f32 %v2046_v46, 0.0  ;;  %v4512_v21 = vmax.f32 %v2045_v16, 0.0  ;;  %v4516_v23 = vmax.f32 %v2044_v50, 0.0  ;;  %v2362_v15 = vld [vmem:[#allocation4 + $0x1e8] sm:$0xff]  ;;  %v2360_v11 = vld [vmem:[#allocation4 + $0x1d8] sm:$0xff]  ;;  %v2359_v30 = vld [vmem:[#allocation4 + $0x1d0] sm:$0xff] }
 0x65f   :  { %3104 = vmatpush.msk.msrb.mxu1 %vm260_vm1, %v4492_v32  ;;  %3111 = vmatpush.msk.msrb.mxu3 %vm260_vm1, %v4492_v32  ;;  %v3137_v25 = vld [vmem:[%s4720_s8 + $0x80] sm:$0xff]  ;;  %v2358_v14 = vld [vmem:[#allocation4 + $0x1c8] sm:$0xff]  ;;  %v2357_v5 = vld [vmem:[#allocation4 + $0x1c0] sm:$0xff] }
 0x660   :  { %2183 = vmatpush.msra.mxu0 %v2160_v34  ;;  %v2356_v46 = vld [vmem:[#allocation4 + $0x1b8] sm:$0xff]  ;;  %v2355_v16 = vld [vmem:[#allocation4 + $0x1b0] sm:$0xff]  ;;  %v2524_v10 = vld [vmem:[#allocation4 + $0x2a8] sm:$0xff] }
 0x661   :  { %2084 = vmatpush.msrb.mxu1 %v4494_v17  ;;  %2139 = vmatpush.msrb.mxu3 %v4494_v17  ;;  %v3138_v50 = vld [vmem:[%s4720_s8 + $0x88] sm:$0x3]  ;;  %v2523_v34 = vld [vmem:[#allocation4 + $0x2a0] sm:$0xff] }
 0x662   :  { %2184 = vmatpush.msra.mxu0 %v2159_v24  ;;  %v2526_v40 = vld [vmem:[#allocation4 + $0x2b8] sm:$0xff]  ;;  %v3129_v24 = vld [vmem:[%s4720_s8 + $0x60] sm:$0xff] }
 0x663   :  { %2085 = vmatpush.msrb.mxu1 %v4500_v58  ;;  %2140 = vmatpush.msrb.mxu3 %v4500_v58 }
 0x664   :  { %2185 = vmatpush.msra.mxu0 %v2158_v63 }
 0x665   :  { %2086 = vmatpush.msrb.mxu1 %v4504_v0  ;;  %2141 = vmatpush.msrb.mxu3 %v4504_v0 }
 0x666   :  { %2186 = vmatpush.msra.mxu0 %v2157_v55  ;;  %v2521_v55 = vld [vmem:[#allocation4 + $0x290] sm:$0xff] }
 0x667   :  { %2087 = vmatpush.msrb.mxu1 %v4508_v33  ;;  %2142 = vmatpush.msrb.mxu3 %v4508_v33 }
 0x668   :  { %2187 = vmatpush.msra.mxu0 %v2156_v37  ;;  %v2520_v37 = vld [vmem:[#allocation4 + $0x288] sm:$0xff] }
 0x669   :  { %2088 = vmatpush.msrb.mxu1 %v4512_v21  ;;  %2143 = vmatpush.msrb.mxu3 %v4512_v21 }
 0x66a   :  { %2365 = vmatpush.msrb.mxu0 %v2364_v51  ;;  %v2519_v51 = vld [vmem:[#allocation4 + $0x280] sm:$0xff] }
 0x66b   :  { %2089 = vmatpush.msrb.mxu1 %v4516_v23  ;;  %2144 = vmatpush.msrb.mxu3 %v4516_v23 }
 0x66c   :  { %3105 = vmatmul.msk.f32.vlgmr.msrb.gmra.mxu1 %vm2061_vm9, %v2058_v49  ;;  %3112 = vmatmul.msk.f32.vlgmr.msrb.gmra.mxu3 %vm2061_vm9, %v3108_v62  ;;  %v2354_v49 = vld [vmem:[#allocation4 + $0x1a8] sm:$0xff]  ;;  %v2353_v62 = vld [vmem:[#allocation4 + $0x1a0] sm:$0xff] }
 0x66d   :  { %2198 = vmatpush.msra.mxu1 %v2115_v13  ;;  %3118 = vmatpush.msk.msra.mxu3 %vm260_vm1, %v4492_v32  ;;  %v2352_v13 = vld [vmem:[#allocation4 + $0x198] sm:$0xff] }
 0x66e   :  { %2366 = vmatpush.msrb.mxu0 %v2363_v35 }
 0x66f   :  { %2199 = vmatpush.msra.mxu1 %v2114_v22  ;;  %2247 = vmatpush.msra.mxu3 %v4494_v17  ;;  %v2279_v22 = vld [vmem:[#allocation4 + $0x178] sm:$0xff] }
 0x670   :  { %2367 = vmatpush.msrb.mxu0 %v2362_v15  ;;  %2280 = vmatpush.msrb.mxu2 %v2279_v22  ;;  %v2444_v22 = vld [vmem:[#allocation4 + $0x250] sm:$0xff] }
 0x671   :  { %2200 = vmatpush.msra.mxu1 %v2113_v1  ;;  %2248 = vmatpush.msra.mxu3 %v4500_v58  ;;  %v2351_v1 = vld [vmem:[#allocation4 + $0x190] sm:$0xff] }
 0x672   :  { %2368 = vmatpush.msrb.mxu0 %v2361_v41  ;;  %v3131_v41 = vld [vmem:[%s4720_s8 + $0x70] sm:$0x3] }
 0x673   :  { %2201 = vmatpush.msra.mxu1 %v2112_v38  ;;  %2249 = vmatpush.msra.mxu3 %v4504_v0  ;;  %v2278_v38 = vld [vmem:[#allocation4 + $0x170] sm:$0xff] }
 0x674   :  { %3106 = vmatmul.msk.f32.gmra.mxu1 %vm2061_vm9, %v2059_v6  ;;  %3113 = vmatmul.msk.f32.gmra.mxu3 %vm2061_vm9, %v3109_v27  ;;  %v2350_v6 = vld [vmem:[#allocation4 + $0x188] sm:$0xff] }
 0x675   :  { %2202 = vmatpush.msra.mxu1 %v2111_v20  ;;  %2250 = vmatpush.msra.mxu3 %v4508_v33  ;;  %v2277_v27 = vld [vmem:[#allocation4 + $0x168] sm:$0xff]  ;;  %v2349_v20 = vld [vmem:[#allocation4 + $0x180] sm:$0xff] }
 0x676   :  { %2369 = vmatpush.msrb.mxu0 %v2360_v11  ;;  %2281 = vmatpush.msrb.mxu2 %v2278_v38  ;;  %v3143_v11 = vld [vmem:[%s4720_s8 + $0x90] sm:$0xff]  ;;  %v3157_v38 = vld [vmem:[%s4720_s8 + $0xc0] sm:$0xff] }
 0x677   :  { %2203 = vmatpush.msra.mxu1 %v2110_v56  ;;  %2251 = vmatpush.msra.mxu3 %v4512_v21  ;;  %v2276_v56 = vld [vmem:[#allocation4 + $0x160] sm:$0xff] }
 0x678   :  { %2370 = vmatpush.msrb.mxu0 %v2359_v30  ;;  %2282 = vmatpush.msrb.mxu2 %v2277_v27  ;;  %v2441_v27 = vld [vmem:[#allocation4 + $0x238] sm:$0xff] }
 0x679   :  { %2204 = vmatpush.msra.mxu1 %v2109_v12  ;;  %2252 = vmatpush.msra.mxu3 %v4516_v23  ;;  %v2275_v12 = vld [vmem:[#allocation4 + $0x158] sm:$0xff] }
 0x67a   :  { %2371 = vmatpush.msrb.mxu0 %v2358_v14  ;;  %2283 = vmatpush.msrb.mxu2 %v2276_v56  ;;  %v2439_v56 = vld [vmem:[#allocation4 + $0x228] sm:$0xff] }
 0x67b   :  { %3125 = vmatpush.msk.msrb.mxu3 %vm260_vm1, %v4492_v32  ;;  %2205 = vmatpush.msra.mxu1 %v2108_v39  ;;  %v2274_v39 = vld [vmem:[#allocation4 + $0x150] sm:$0xff] }
 0x67c   :  { %3107 = vmatmul.msk.f32.gmra.mxu1 %vm2061_vm9, %v2060_v26  ;;  %3114 = vmatmul.msk.f32.gmra.mxu3 %vm2061_vm9, %v3110_v9  ;;  %v2273_v26 = vld [vmem:[#allocation4 + $0x148] sm:$0xff]  ;;  %v2272_v9 = vld [vmem:[#allocation4 + $0x140] sm:$0xff] }
 0x67d   :  { %2332 = vmatpush.msrb.mxu3 %v4494_v17  ;;  %2206 = vmatpush.msra.mxu1 %v2107_v8  ;;  %v2271_v8 = vld [vmem:[#allocation4 + $0x138] sm:$0xff] }
 0x67e   :  { %2372 = vmatpush.msrb.mxu0 %v2357_v5  ;;  %2284 = vmatpush.msrb.mxu2 %v2275_v12  ;;  %v2449_v5 = vld [vmem:[#allocation4 + $0x278] sm:$0xff] }
 0x67f   :  { %2333 = vmatpush.msrb.mxu3 %v4500_v58  ;;  %2207 = vmatpush.msra.mxu1 %v2106_v7  ;;  %v2270_v7 = vld [vmem:[#allocation4 + $0x130] sm:$0xff]  ;;  %v3158_v12 = vld [vmem:[%s4720_s8 + $0xc8] sm:$0xff] }
 0x680   :  { %2373 = vmatpush.msrb.mxu0 %v2356_v46  ;;  %2285 = vmatpush.msrb.mxu2 %v2274_v39  ;;  %v2448_v46 = vld [vmem:[#allocation4 + $0x270] sm:$0xff]  ;;  %v2438_v39 = vld [vmem:[#allocation4 + $0x220] sm:$0xff] }
 0x681   :  { %2334 = vmatpush.msrb.mxu3 %v4504_v0  ;;  %2208 = vmatpush.msra.mxu1 %v2105_v44  ;;  %v2269_v44 = vld [vmem:[#allocation4 + $0x128] sm:$0xff] }
 0x682   :  { %2374 = vmatpush.msrb.mxu0 %v2355_v16  ;;  %2286 = vmatpush.msrb.mxu2 %v2273_v26  ;;  %v2447_v16 = vld [vmem:[#allocation4 + $0x268] sm:$0xff]  ;;  %v2437_v26 = vld [vmem:[#allocation4 + $0x218] sm:$0xff] }
 0x683   :  { %2335 = vmatpush.msrb.mxu3 %v4508_v33  ;;  %2209 = vmatpush.msra.mxu1 %v2104_v52  ;;  %v2268_v52 = vld [vmem:[#allocation4 + $0x120] sm:$0xff] }
 0x684   :  { %3119 = vmatmul.msk.f32.vlgmr.msra.gmra.mxu3 %vm2061_vm9, %v3115_v61  ;;  %2375 = vmatpush.msrb.mxu0 %v2354_v49  ;;  %v2266_v61 = vld [vmem:[#allocation4 + $0x110] sm:$0xff]  ;;  %v2446_v49 = vld [vmem:[#allocation4 + $0x260] sm:$0xff] }
 0x685   :  { %2336 = vmatpush.msrb.mxu3 %v4512_v21  ;;  %2210 = vmatpush.msra.mxu1 %v2103_v36  ;;  %v2267_v36 = vld [vmem:[#allocation4 + $0x118] sm:$0xff] }
 0x686   :  { %2376 = vmatpush.msrb.mxu0 %v2353_v62  ;;  %2287 = vmatpush.msrb.mxu2 %v2272_v9  ;;  %v2445_v62 = vld [vmem:[#allocation4 + $0x258] sm:$0xff]  ;;  %v2436_v9 = vld [vmem:[#allocation4 + $0x210] sm:$0xff] }
 0x687   :  { %2337 = vmatpush.msrb.mxu3 %v4516_v23  ;;  %2211 = vmatpush.msra.mxu1 %v2102_v43  ;;  %v2265_v43 = vld [vmem:[#allocation4 + $0x108] sm:$0xff] }
 0x688   :  { %2377 = vmatpush.msrb.mxu0 %v2352_v13  ;;  %2288 = vmatpush.msrb.mxu2 %v2271_v8  ;;  %v2435_v8 = vld [vmem:[#allocation4 + $0x208] sm:$0xff] }
 0x689   :  { %3139 = vmatpush.msk.msra.mxu3 %vm260_vm1, %v4492_v32  ;;  %2212 = vmatpush.msra.mxu1 %v2101_v29  ;;  %v2534_v29 = vld [vmem:[#allocation4 + $0x2f8] sm:$0xff] }
 0x68a   :  { %2378 = vmatpush.msrb.mxu0 %v2351_v1  ;;  %2289 = vmatpush.msrb.mxu2 %v2270_v7  ;;  %v2443_v1 = vld [vmem:[#allocation4 + $0x248] sm:$0xff]  ;;  %v3159_v7 = vld [vmem:[%s4720_s8 + $0xd0] sm:$0x3] }
 0x68b   :  { %2502 = vmatpush.msra.mxu3 %v4494_v17  ;;  %2213 = vmatpush.msra.mxu1 %v2100_v42  ;;  %v2264_v42 = vld [vmem:[#allocation4 + $0x100] sm:$0xff] }
 0x68c   :  { %3120 = vmatmul.msk.f32.gmra.mxu3 %vm2061_vm9, %v3116_v57  ;;  %2379 = vmatpush.msrb.mxu0 %v2350_v6  ;;  %v2442_v6 = vld [vmem:[#allocation4 + $0x240] sm:$0xff] }
 0x68d   :  { %2503 = vmatpush.msra.mxu3 %v4500_v58  ;;  %3132 = vmatpush.msk.msrb.mxu1 %vm260_vm1, %v4492_v32 }
 0x68e   :  { %2380 = vmatpush.msrb.mxu0 %v2349_v20  ;;  %2290 = vmatpush.msrb.mxu2 %v2269_v44  ;;  %v2440_v20 = vld [vmem:[#allocation4 + $0x230] sm:$0xff]  ;;  %v2434_v44 = vld [vmem:[#allocation4 + $0x200] sm:$0xff] }
 0x68f   :  { %2504 = vmatpush.msra.mxu3 %v4504_v0  ;;  %2417 = vmatpush.msrb.mxu1 %v4494_v17 }
 0x690   :  { %2291 = vmatpush.msrb.mxu2 %v2268_v52 }
 0x691   :  { %2505 = vmatpush.msra.mxu3 %v4508_v33  ;;  %2418 = vmatpush.msrb.mxu1 %v4500_v58 }
 0x692   :  { %2292 = vmatpush.msrb.mxu2 %v2267_v36 }
 0x693   :  { %2506 = vmatpush.msra.mxu3 %v4512_v21  ;;  %2419 = vmatpush.msrb.mxu1 %v4504_v0 }
 0x694   :  { %3121 = vmatmul.msk.f32.gmra.mxu3 %vm2061_vm9, %v3117_v2  ;;  %2293 = vmatpush.msrb.mxu2 %v2266_v61  ;;  %v2531_v2 = vld [vmem:[#allocation4 + $0x2e0] sm:$0xff] }
 0x695   :  { %2507 = vmatpush.msra.mxu3 %v4516_v23  ;;  %2420 = vmatpush.msrb.mxu1 %v4508_v33 }
 0x696   :  { %2294 = vmatpush.msrb.mxu2 %v2265_v43 }
 0x697   :  { %2421 = vmatpush.msrb.mxu1 %v4512_v21 }
 0x698   :  { %2295 = vmatpush.msrb.mxu2 %v2264_v42  ;;  %v2618_v42 = vld [vmem:[#allocation4 + $0x370] sm:$0xff] }
 0x699   :  { %2422 = vmatpush.msrb.mxu1 %v4516_v23 }
 0x69a   :  { %2450 = vmatpush.msra.mxu2 %v2449_v5  ;;  %v2693_v5 = vld [vmem:[#allocation4 + $0x3a0] sm:$0xff] }
 0x69c   :  { %3126 = vmatmul.msk.f32.vlgmr.msrb.gmra.mxu3 %vm2061_vm9, %v3122_v53  ;;  %v2528_v53 = vld [vmem:[#allocation4 + $0x2c8] sm:$0xff]  ;;  %2451 = vmatpush.msra.mxu2 %v2448_v46  ;;  %v2786_v46 = vld [vmem:[#allocation4 + $0x460] sm:$0xff] }
 0x69d   :  { %3153 = vmatpush.msk.msrb.mxu3 %vm260_vm1, %v4492_v32 }
 0x69e   :  { %2452 = vmatpush.msra.mxu2 %v2447_v16  ;;  %v2692_v16 = vld [vmem:[#allocation4 + $0x398] sm:$0xff] }
 0x69f   :  { %2672 = vmatpush.msrb.mxu3 %v4494_v17 }
 0x6a0   :  { %2453 = vmatpush.msra.mxu2 %v2446_v49  ;;  %v2691_v49 = vld [vmem:[#allocation4 + $0x390] sm:$0xff] }
 0x6a1   :  { %2673 = vmatpush.msrb.mxu3 %v4500_v58 }
 0x6a2   :  { %2454 = vmatpush.msra.mxu2 %v2445_v62  ;;  %v2784_v62 = vld [vmem:[#allocation4 + $0x450] sm:$0xff] }
 0x6a3   :  { %2674 = vmatpush.msrb.mxu3 %v4504_v0 }
 0x6a4   :  { %3127 = vmatmul.msk.f32.gmra.mxu3 %vm2061_vm9, %v3123_v4  ;;  %v2525_v4 = vld [vmem:[#allocation4 + $0x2b0] sm:$0xff]  ;;  %2455 = vmatpush.msra.mxu2 %v2444_v22  ;;  %v2783_v22 = vld [vmem:[#allocation4 + $0x448] sm:$0xff] }
 0x6a5   :  { %2675 = vmatpush.msrb.mxu3 %v4508_v33 }
 0x6a6   :  { %2456 = vmatpush.msra.mxu2 %v2443_v1 }
 0x6a7   :  { %2676 = vmatpush.msrb.mxu3 %v4512_v21 }
 0x6a8   :  { %2457 = vmatpush.msra.mxu2 %v2442_v6 }
 0x6a9   :  { %2677 = vmatpush.msrb.mxu3 %v4516_v23 }
 0x6aa   :  { %2458 = vmatpush.msra.mxu2 %v2441_v27  ;;  %v2689_v27 = vld [vmem:[#allocation4 + $0x380] sm:$0xff] }
 0x6ac   :  { %3128 = vmatmul.msk.f32.gmra.mxu3 %vm2061_vm9, %v3124_v47  ;;  %v2522_v47 = vld [vmem:[#allocation4 + $0x298] sm:$0xff]  ;;  %2459 = vmatpush.msra.mxu2 %v2440_v20  ;;  %v2782_v20 = vld [vmem:[#allocation4 + $0x440] sm:$0xff] }
 0x6ae   :  { %2460 = vmatpush.msra.mxu2 %v2439_v56 }
 0x6b0   :  { %2461 = vmatpush.msra.mxu2 %v2438_v39 }
 0x6b2   :  { %2462 = vmatpush.msra.mxu2 %v2437_v26  ;;  %v2780_v26 = vld [vmem:[#allocation4 + $0x430] sm:$0xff] }
 0x6b4   :  { %3140 = vmatmul.msk.f32.vlgmr.msra.gmra.mxu3 %vm2061_vm9, %v3136_v3  ;;  %v3130_v3 = vld [vmem:[%s4720_s8 + $0x68] sm:$0xff]  ;;  %2463 = vmatpush.msra.mxu2 %v2436_v9  ;;  %v2779_v9 = vld [vmem:[#allocation4 + $0x428] sm:$0xff] }
 0x6b6   :  { %2464 = vmatpush.msra.mxu2 %v2435_v8 }
 0x6b8   :  { %2465 = vmatpush.msra.mxu2 %v2434_v44 }
 0x6bc   :  { %3141 = vmatmul.msk.f32.gmra.mxu3 %vm2061_vm9, %v3137_v25  ;;  %v3144_v25 = vld [vmem:[%s4720_s8 + $0x98] sm:$0xff] }
 0x6c4   :  { %3142 = vmatmul.msk.f32.gmra.mxu3 %vm2061_vm9, %v3138_v50  ;;  %v3145_v50 = vld [vmem:[%s4720_s8 + $0xa0] sm:$0x3] }
 0x6e9   :  { %v2091_v57 = vpop.f32.mrf.mxu1 }
 0x6ea   :  { %2214 = vmatmul.f32.vlgmr.msra.gmra.mxu1 %v2091_v57  ;;  %v2617_v57 = vld [vmem:[#allocation4 + $0x368] sm:$0xff] }
 0x6eb   :  { %2535 = vmatpush.msra.mxu1 %v2534_v29  ;;  %v2619_v29 = vld [vmem:[#allocation4 + $0x378] sm:$0xff] }
 0x6ed   :  { %2536 = vmatpush.msra.mxu1 %v2533_v54 }
 0x6ef   :  { %2537 = vmatpush.msra.mxu1 %v2532_v60  ;;  %v2146_v28 = vpop.f32.mrf.mxu3 }
 0x6f0   :  { %2188 = vmatmul.f32.vlgmr.msra.gmra.mxu0 %v2146_v28 }
 0x6f1   :  { %2538 = vmatpush.msra.mxu1 %v2531_v2  ;;  %3146 = vmatpush.msk.msra.mxu0 %vm260_vm1, %v4492_v32  ;;  %v2094_v31 = vpop.f32.mrf.mxu1 }
 0x6f2   :  { %2217 = vmatmul.f32.gmra.mxu1 %v2094_v31 }
 0x6f3   :  { %2539 = vmatpush.msra.mxu1 %v2530_v19  ;;  %2587 = vmatpush.msra.mxu0 %v4494_v17  ;;  %v2616_v19 = vld [vmem:[#allocation4 + $0x360] sm:$0xff] }
 0x6f5   :  { %2540 = vmatpush.msra.mxu1 %v2529_v48  ;;  %2588 = vmatpush.msra.mxu0 %v4500_v58 }
 0x6f7   :  { %2541 = vmatpush.msra.mxu1 %v2528_v53  ;;  %2589 = vmatpush.msra.mxu0 %v4504_v0  ;;  %v2149_v18 = vpop.f32.mrf.mxu3  ;;  %v2615_v53 = vld [vmem:[#allocation4 + $0x358] sm:$0xff] }
 0x6f8   :  { %2191 = vmatmul.f32.gmra.mxu0 %v2149_v18  ;;  %v2614_v18 = vld [vmem:[#allocation4 + $0x350] sm:$0xff] }
 0x6f9   :  { %2542 = vmatpush.msra.mxu1 %v2527_v45  ;;  %2590 = vmatpush.msra.mxu0 %v4508_v33  ;;  %v2097_v59 = vpop.f32.mrf.mxu1  ;;  %v2704_v45 = vld [vmem:[#allocation4 + $0x3f8] sm:$0xff] }
 0x6fa   :  { %2220 = vmatmul.f32.gmra.mxu1 %v2097_v59  ;;  %v2702_v59 = vld [vmem:[#allocation4 + $0x3e8] sm:$0xff] }
 0x6fb   :  { %2543 = vmatpush.msra.mxu1 %v2526_v40  ;;  %2591 = vmatpush.msra.mxu0 %v4512_v21  ;;  %v2703_v40 = vld [vmem:[#allocation4 + $0x3f0] sm:$0xff] }
 0x6fd   :  { %2544 = vmatpush.msra.mxu1 %v2525_v4  ;;  %2592 = vmatpush.msra.mxu0 %v4516_v23  ;;  %v2613_v4 = vld [vmem:[#allocation4 + $0x348] sm:$0xff] }
 0x6ff   :  { %2545 = vmatpush.msra.mxu1 %v2524_v10  ;;  %v2152_v63 = vpop.f32.mrf.mxu3  ;;  %v2612_v10 = vld [vmem:[#allocation4 + $0x340] sm:$0xff] }
 0x700   :  { %2194 = vmatmul.f32.gmra.mxu0 %v2152_v63  ;;  %v2700_v63 = vld [vmem:[#allocation4 + $0x3d8] sm:$0xff] }
 0x701   :  { %2546 = vmatpush.msra.mxu1 %v2523_v34  ;;  %v2701_v34 = vld [vmem:[#allocation4 + $0x3e0] sm:$0xff] }
 0x702   :  { %3133 = vmatmul.msk.f32.vlgmr.msrb.gmra.mxu1 %vm2061_vm9, %v3129_v24  ;;  %v2611_v24 = vld [vmem:[#allocation4 + $0x338] sm:$0xff] }
 0x703   :  { %2547 = vmatpush.msra.mxu1 %v2522_v47 }
 0x705   :  { %2548 = vmatpush.msra.mxu1 %v2521_v55  ;;  %v2699_v55 = vld [vmem:[#allocation4 + $0x3d0] sm:$0xff] }
 0x707   :  { %2549 = vmatpush.msra.mxu1 %v2520_v37  ;;  %v2254_v35 = vpop.f32.mrf.mxu3  ;;  %v2610_v37 = vld [vmem:[#allocation4 + $0x330] sm:$0xff] }
 0x708   :  { %2296 = vmatmul.f32.vlgmr.msrb.gmra.mxu2 %v2254_v35  ;;  %v2609_v35 = vld [vmem:[#allocation4 + $0x328] sm:$0xff] }
 0x709   :  { %2550 = vmatpush.msra.mxu1 %v2519_v51  ;;  %2620 = vmatpush.msrb.mxu2 %v2619_v29  ;;  %v2698_v51 = vld [vmem:[#allocation4 + $0x3c8] sm:$0xff] }
 0x70a   :  { %3134 = vmatmul.msk.f32.gmra.mxu1 %vm2061_vm9, %v3130_v3  ;;  %v2608_v3 = vld [vmem:[#allocation4 + $0x320] sm:$0xff] }
 0x70b   :  { %3160 = vmatpush.msk.msrb.mxu1 %vm260_vm1, %v4492_v32  ;;  %2621 = vmatpush.msrb.mxu2 %v2618_v42  ;;  %v2775_v42 = vld [vmem:[#allocation4 + $0x408] sm:$0xff] }
 0x70d   :  { %2757 = vmatpush.msrb.mxu1 %v4494_v17  ;;  %v3150_v17 = vld [vmem:[%s4720_s8 + $0xa8] sm:$0xff]  ;;  %2622 = vmatpush.msrb.mxu2 %v2617_v57 }
 0x70e   :  { %3154 = vmatmul.msk.f32.vlgmr.msrb.gmra.mxu3 %vm2061_vm9, %v3150_v17  ;;  %v2789_v17 = vld [vmem:[#allocation4 + $0x478] sm:$0xff] }
 0x70f   :  { %2758 = vmatpush.msrb.mxu1 %v4500_v58  ;;  %v2257_v15 = vpop.f32.mrf.mxu3  ;;  %2623 = vmatpush.msrb.mxu2 %v2616_v19 }
 0x710   :  { %2299 = vmatmul.f32.gmra.mxu2 %v2257_v15  ;;  %v2697_v15 = vld [vmem:[#allocation4 + $0x3c0] sm:$0xff]  ;;  %2790 = vmatpush.msra.mxu3 %v2789_v17 }
 0x711   :  { %2759 = vmatpush.msrb.mxu1 %v4504_v0  ;;  %v3151_v0 = vld [vmem:[%s4720_s8 + $0xb0] sm:$0xff]  ;;  %2624 = vmatpush.msrb.mxu2 %v2615_v53 }
 0x712   :  { %3135 = vmatmul.msk.f32.gmra.mxu1 %vm2061_vm9, %v3131_v41  ;;  %v2607_v41 = vld [vmem:[#allocation4 + $0x318] sm:$0xff] }
 0x713   :  { %2760 = vmatpush.msrb.mxu1 %v4508_v33  ;;  %2625 = vmatpush.msrb.mxu2 %v2614_v18 }
 0x715   :  { %2761 = vmatpush.msrb.mxu1 %v4512_v21  ;;  %v3152_v21 = vld [vmem:[%s4720_s8 + $0xb8] sm:$0x3]  ;;  %2626 = vmatpush.msrb.mxu2 %v2613_v4 }
 0x716   :  { %3155 = vmatmul.msk.f32.gmra.mxu3 %vm2061_vm9, %v3151_v0  ;;  %v2695_v0 = vld [vmem:[#allocation4 + $0x3b0] sm:$0xff] }
 0x717   :  { %2762 = vmatpush.msrb.mxu1 %v4516_v23  ;;  %v2260_v32 = vpop.f32.mrf.mxu3  ;;  %2627 = vmatpush.msrb.mxu2 %v2612_v10 }
 0x718   :  { %2302 = vmatmul.f32.gmra.mxu2 %v2260_v32  ;;  %v2696_v32 = vld [vmem:[#allocation4 + $0x3b8] sm:$0xff] }
 0x719   :  { %2628 = vmatpush.msrb.mxu2 %v2611_v24 }
 0x71b   :  { %2629 = vmatpush.msrb.mxu2 %v2610_v37 }
 0x71d   :  { %2630 = vmatpush.msrb.mxu2 %v2609_v35 }
 0x71e   :  { %3156 = vmatmul.msk.f32.gmra.mxu3 %vm2061_vm9, %v3152_v21  ;;  %v2606_v21 = vld [vmem:[#allocation4 + $0x310] sm:$0xff] }
 0x71f   :  { %v2339_v58 = vpop.f32.mrf.mxu3  ;;  %2631 = vmatpush.msrb.mxu2 %v2608_v3 }
 0x720   :  { %2381 = vmatmul.f32.vlgmr.msrb.gmra.mxu0 %v2339_v58 }
 0x721   :  { %2705 = vmatpush.msrb.mxu0 %v2704_v45  ;;  %2632 = vmatpush.msrb.mxu2 %v2607_v41 }
 0x723   :  { %2706 = vmatpush.msrb.mxu0 %v2703_v40  ;;  %2633 = vmatpush.msrb.mxu2 %v2606_v21 }
 0x725   :  { %2707 = vmatpush.msrb.mxu0 %v2702_v59 }
 0x727   :  { %v2342_v33 = vpop.f32.mrf.mxu3  ;;  %2708 = vmatpush.msrb.mxu0 %v2701_v34 }
 0x728   :  { %2384 = vmatmul.f32.gmra.mxu0 %v2342_v33  ;;  %v2788_v33 = vld [vmem:[#allocation4 + $0x470] sm:$0xff] }
 0x729   :  { %2709 = vmatpush.msrb.mxu0 %v2700_v63  ;;  %2791 = vmatpush.msra.mxu3 %v2788_v33 }
 0x72b   :  { %2710 = vmatpush.msrb.mxu0 %v2699_v55 }
 0x72d   :  { %2711 = vmatpush.msrb.mxu0 %v2698_v51 }
 0x72f   :  { %v2345_v23 = vpop.f32.mrf.mxu3  ;;  %2712 = vmatpush.msrb.mxu0 %v2697_v15 }
 0x730   :  { %2387 = vmatmul.f32.gmra.mxu0 %v2345_v23  ;;  %v2787_v23 = vld [vmem:[#allocation4 + $0x468] sm:$0xff] }
 0x731   :  { %2713 = vmatpush.msrb.mxu0 %v2696_v32  ;;  %2792 = vmatpush.msra.mxu3 %v2787_v23 }
 0x733   :  { %2714 = vmatpush.msrb.mxu0 %v2695_v0  ;;  %2793 = vmatpush.msra.mxu3 %v2786_v46 }
 0x737   :  { %v2509_v30 = vpop.f32.mrf.mxu3 }
 0x738   :  { %2551 = vmatmul.f32.vlgmr.msra.gmra.mxu1 %v2509_v30  ;;  %3147 = vmatmul.msk.f32.vlgmr.msra.gmra.mxu0 %vm2061_vm9, %v3143_v11  ;;  %v2694_v11 = vld [vmem:[#allocation4 + $0x3a8] sm:$0xff] }
 0x739   :  { %v2605_v30 = vld [vmem:[#allocation4 + $0x308] sm:$0xff]  ;;  %2715 = vmatpush.msrb.mxu0 %v2694_v11 }
 0x73a   :  { %2634 = vmatpush.msrb.mxu2 %v2605_v30 }
 0x73b   :  { %2716 = vmatpush.msrb.mxu0 %v2693_v5 }
 0x73d   :  { %2717 = vmatpush.msrb.mxu0 %v2692_v16 }
 0x73f   :  { %v2512_v14 = vpop.f32.mrf.mxu3  ;;  %2718 = vmatpush.msrb.mxu0 %v2691_v49 }
 0x740   :  { %2554 = vmatmul.f32.gmra.mxu1 %v2512_v14  ;;  %3148 = vmatmul.msk.f32.gmra.mxu0 %vm2061_vm9, %v3144_v25  ;;  %v2604_v14 = vld [vmem:[#allocation4 + $0x300] sm:$0xff] }
 0x741   :  { %2635 = vmatpush.msrb.mxu2 %v2604_v14 }
 0x747   :  { %v2515_v13 = vpop.f32.mrf.mxu3 }
 0x748   :  { %2557 = vmatmul.f32.gmra.mxu1 %v2515_v13  ;;  %3149 = vmatmul.msk.f32.gmra.mxu0 %vm2061_vm9, %v3145_v50  ;;  %v2785_v50 = vld [vmem:[#allocation4 + $0x458] sm:$0xff]  ;;  %v2690_v13 = vld [vmem:[#allocation4 + $0x388] sm:$0xff] }
 0x749   :  { %2794 = vmatpush.msra.mxu3 %v2785_v50  ;;  %2719 = vmatpush.msrb.mxu0 %v2690_v13 }
 0x74b   :  { %2795 = vmatpush.msra.mxu3 %v2784_v62  ;;  %2720 = vmatpush.msrb.mxu0 %v2689_v27 }
 0x74d   :  { %2796 = vmatpush.msra.mxu3 %v2783_v22 }
 0x74f   :  { %2797 = vmatpush.msra.mxu3 %v2782_v20 }
 0x750   :  { %3161 = vmatmul.msk.f32.vlgmr.msrb.gmra.mxu1 %vm2061_vm9, %v3157_v38 }
 0x758   :  { %3162 = vmatmul.msk.f32.gmra.mxu1 %vm2061_vm9, %v3158_v12  ;;  %v2781_v12 = vld [vmem:[#allocation4 + $0x438] sm:$0xff] }
 0x759   :  { %2798 = vmatpush.msra.mxu3 %v2781_v12 }
 0x75b   :  { %2799 = vmatpush.msra.mxu3 %v2780_v26 }
 0x75d   :  { %2800 = vmatpush.msra.mxu3 %v2779_v9 }
 0x760   :  { %3163 = vmatmul.msk.f32.gmra.mxu1 %vm2061_vm9, %v3159_v7 }
 0x767   :  { %v2215_v52 = vpop.f32.mrf.mxu1 }
 0x76d   :  { %v2189_v36 = vpop.f32.mrf.mxu0 }
 0x76e   :  { %v4686_v61 = vadd.f32 %v2215_v52, %v2189_v36  ;;  %v2778_v52 = vld [vmem:[#allocation4 + $0x420] sm:$0xff] }
 0x76f   :  { %v2218_v43 = vpop.f32.mrf.mxu1  ;;  %2801 = vmatpush.msra.mxu3 %v2778_v52 }
 0x775   :  { %v2192_v54 = vpop.f32.mrf.mxu0 }
 0x776   :  { %v4688_v60 = vadd.f32 %v2218_v43, %v2192_v54  ;;  %v2776_v43 = vld [vmem:[#allocation4 + $0x410] sm:$0xff] }
 0x777   :  { %v2221_v2 = vpop.f32.mrf.mxu1 }
 0x77d   :  { %v2195_v28 = vpop.f32.mrf.mxu0 }
 0x77e   :  { %v4690_v48 = vadd.f32 %v2221_v2, %v2195_v28  ;;  %v2774_v28 = vld [vmem:[#allocation4 + $0x400] sm:$0xff] }
 0x77f   :  { %v2424_v31 = vpop.f32.mrf.mxu1 }
 0x780   :  { %2466 = vmatmul.f32.vlgmr.msra.gmra.mxu2 %v2424_v31 }
 0x787   :  { %v2427_v47 = vpop.f32.mrf.mxu1 }
 0x788   :  { %2469 = vmatmul.f32.gmra.mxu2 %v2427_v47 }
 0x78b   :  { %v2297_v25 = vpop.f32.mrf.mxu2 }
 0x78c   :  { %v2306_v1 = vadd.f32 %v2297_v25, %v4686_v61  ;;  %v2777_v61 = vld [vmem:[#allocation4 + $0x418] sm:$0xff] }
 0x78d   :  { %2802 = vmatpush.msra.mxu3 %v2777_v61 }
 0x78f   :  { %v2430_v58 = vpop.f32.mrf.mxu1  ;;  %2803 = vmatpush.msra.mxu3 %v2776_v43 }
 0x790   :  { %2472 = vmatmul.f32.gmra.mxu2 %v2430_v58 }
 0x791   :  { %v2679_v6 = vpop.f32.mrf.mxu3  ;;  %2804 = vmatpush.msra.mxu3 %v2775_v42 }
 0x792   :  { %2721 = vmatmul.f32.vlgmr.msrb.gmra.mxu0 %v2679_v6 }
 0x793   :  { %v2300_v39 = vpop.f32.mrf.mxu2  ;;  %2805 = vmatpush.msra.mxu3 %v2774_v28 }
 0x794   :  { %v2307_v8 = vadd.f32 %v2300_v39, %v4688_v60 }
 0x799   :  { %v2682_v44 = vpop.f32.mrf.mxu3 }
 0x79a   :  { %2724 = vmatmul.f32.gmra.mxu0 %v2682_v44 }
 0x79b   :  { %v2303_v29 = vpop.f32.mrf.mxu2 }
 0x79c   :  { %v2308_v57 = vadd.f32 %v2303_v29, %v4690_v48 }
 0x79d   :  { %v2382_v38 = vpop.f32.mrf.mxu0 }
 0x79e   :  { %v2391_v56 = vadd.f32 %v2382_v38, %v2306_v1 }
 0x7a1   :  { %v2685_v2 = vpop.f32.mrf.mxu3 }
 0x7a2   :  { %2727 = vmatmul.f32.gmra.mxu0 %v2685_v2 }
 0x7a5   :  { %v2385_v7 = vpop.f32.mrf.mxu0 }
 0x7a6   :  { %v2392_v36 = vadd.f32 %v2385_v7, %v2307_v8 }
 0x7ad   :  { %v2388_v54 = vpop.f32.mrf.mxu0 }
 0x7ae   :  { %v2393_v60 = vadd.f32 %v2388_v54, %v2308_v57 }
 0x7b5   :  { %v2552_v19 = vpop.f32.mrf.mxu1  ;;  %v2594_v31 = vpop.f32.mrf.mxu0 }
 0x7b6   :  { %2636 = vmatmul.f32.vlgmr.msrb.gmra.mxu2 %v2594_v31 }
 0x7bd   :  { %v2555_v53 = vpop.f32.mrf.mxu1  ;;  %v2597_v45 = vpop.f32.mrf.mxu0 }
 0x7be   :  { %2639 = vmatmul.f32.gmra.mxu2 %v2597_v45 }
 0x7c5   :  { %v2558_v18 = vpop.f32.mrf.mxu1  ;;  %v2600_v40 = vpop.f32.mrf.mxu0 }
 0x7c6   :  { %2642 = vmatmul.f32.gmra.mxu2 %v2600_v40 }
 0x7cd   :  { %v2764_v59 = vpop.f32.mrf.mxu1 }
 0x7ce   :  { %2806 = vmatmul.f32.vlgmr.msra.gmra.mxu3 %v2764_v59 }
 0x7d5   :  { %v2767_v4 = vpop.f32.mrf.mxu1 }
 0x7d6   :  { %2809 = vmatmul.f32.gmra.mxu3 %v2767_v4 }
 0x7dd   :  { %v2770_v48 = vpop.f32.mrf.mxu1 }
 0x7de   :  { %2812 = vmatmul.f32.gmra.mxu3 %v2770_v48 }
 0x803   :  { %v2467_v10 = vpop.f32.mrf.mxu2 }
 0x804   :  { %v2476_v55 = vadd.f32 %v2467_v10, %v2391_v56  ;;  %v3188_v10 = vld [vmem:[%s4723_s11] ss:$0 sm:$0xff] }
 0x806   :  { %v2561_v3 = vadd.f32 %v2552_v19, %v2476_v55 }
 0x80b   :  { %v2470_v34 = vpop.f32.mrf.mxu2 }
 0x80c   :  { %v2477_v37 = vadd.f32 %v2470_v34, %v2392_v36 }
 0x80e   :  { %v2562_v15 = vadd.f32 %v2555_v53, %v2477_v37 }
 0x80f   :  { %v2722_v47 = vpop.f32.mrf.mxu0 }
 0x813   :  { %v2473_v24 = vpop.f32.mrf.mxu2 }
 0x814   :  { %v2478_v58 = vadd.f32 %v2473_v24, %v2393_v60 }
 0x816   :  { %v2563_v11 = vadd.f32 %v2558_v18, %v2478_v58  ;;  %v2819_v18 = vld [vmem:[%s4722_s10] sm:$0x1] }
 0x817   :  { %v2725_v41 = vpop.f32.mrf.mxu0 }
 0x81f   :  { %v2728_v46 = vpop.f32.mrf.mxu0 }
 0x839   :  { %v2637_v63 = vpop.f32.mrf.mxu2 }
 0x83a   :  { %v2646_v32 = vadd.f32 %v2637_v63, %v2561_v3 }
 0x83c   :  { %v2731_v0 = vadd.f32 %v2722_v47, %v2646_v32 }
 0x841   :  { %v2640_v51 = vpop.f32.mrf.mxu2 }
 0x842   :  { %v2647_v17 = vadd.f32 %v2640_v51, %v2562_v15 }
 0x844   :  { %v2732_v33 = vadd.f32 %v2725_v41, %v2647_v17 }
 0x849   :  { %v2643_v21 = vpop.f32.mrf.mxu2 }
 0x84a   :  { %v2648_v14 = vadd.f32 %v2643_v21, %v2563_v11 }
 0x84c   :  { %v2733_v16 = vadd.f32 %v2728_v46, %v2648_v14 }
 0x851   :  { %v2807_v35 = vpop.f32.mrf.mxu3 }
 0x852   :  { %v2816_v30 = vadd.f32 %v2807_v35, %v2731_v0 }
 0x859   :  { %v2810_v23 = vpop.f32.mrf.mxu3 }
 0x85a   :  { %v2817_v25 = vadd.f32 %v2810_v23, %v2732_v33 }
 0x85c   :  { %v2821_v5 = vadd.f32 %v2817_v25, %v2816_v30 }
 0x861   :  { %v2813_v50 = vpop.f32.mrf.mxu3 }
 0x862   :  { %v2818_v49 = vadd.f32 %v2813_v50, %v2733_v16 }
 0x864   :  { %v2822_v62 = vsel %vm260_vm1, %v2818_v49, 0.0 }
 0x865   :  { %v2823_v13 = vadd.f32 %v2822_v62, %v2821_v5 }
 0x867   :  { %v2824_v22 = vrot.slane %v2823_v13, 4 }
 0x869   :  { %v2825_v1 = vadd.f32 %v2824_v22, %v2823_v13 }
 0x86b   :  { %v2826_v38 = vrot.slane %v2825_v1, 2 }
 0x86d   :  { %v2827_v6 = vadd.f32 %v2826_v38, %v2825_v1 }
 0x86f   :  { %v2828_v27 = vrot.slane %v2827_v6, 1 }
 0x871   :  { %v2829_v20 = vadd.f32 %v2828_v27, %v2827_v6 }
 0x873   :  { %v2830_v56 = vmul.f32 0.055555556, %v2829_v20 }
 0x875   :  { %v2831_v12 = vsub.f32 %v2816_v30, %v2830_v56  ;;  %v2832_v39 = vsub.f32 %v2817_v25, %v2830_v56  ;;  %v2833_v26 = vsub.f32 %v2818_v49, %v2830_v56 }
 0x877   :  { %v2834_v9 = vmul.f32 %v2831_v12, %v2831_v12  ;;  %v2835_v8 = vmul.f32 %v2832_v39, %v2832_v39  ;;  %v2836_v7 = vmul.f32 %v2833_v26, %v2833_v26 }
 0x879   :  { %v2837_v44 = vadd.f32 %v2835_v8, %v2834_v9  ;;  %v2838_v52 = vsel %vm260_vm1, %v2836_v7, 0.0 }
 0x87b   :  { %v2839_v36 = vadd.f32 %v2838_v52, %v2837_v44 }
 0x87d   :  { %v2840_v61 = vrot.slane %v2839_v36, 4 }
 0x87f   :  { %v2841_v43 = vadd.f32 %v2840_v61, %v2839_v36 }
 0x881   :  { %v2842_v29 = vrot.slane %v2841_v43, 2 }
 0x883   :  { %v2843_v42 = vadd.f32 %v2842_v29, %v2841_v43 }
 0x885   :  { %v2844_v57 = vrot.slane %v2843_v42, 1 }
 0x887   :  { %v2845_v54 = vadd.f32 %v2844_v57, %v2843_v42 }
 0x889   :  { %v2846_v2 = vmul.f32 0.055555556, %v2845_v54 }
 0x88b   :  { %v2847_v28 = vadd.f32 1e-05, %v2846_v2 }
 0x88d   :  { %3193 = vrsqrt.f32 %v2847_v28  ;;  %vm2854_vm11 = vweird.f32 %v2847_v28 }
 0x893   :  { %v3194_v60 = vpop.eup %3193 }
 0x894   :  { %v2849_v19 = vmul.f32 %v3194_v60, %v2847_v28  ;;  %vm2855_vm10 = vweird.f32 %v3194_v60 }
 0x895   :  { %vm2856_vm12 = vmor %vm2854_vm11, %vm2855_vm10 }
 0x896   :  { %v2850_v31 = vmul.f32 %v3194_v60, %v2849_v19 }
 0x898   :  { %v2851_v53 = vmul.f32 0.5, %v2850_v31 }
 0x89a   :  { %v2852_v45 = vsub.f32 1.5, %v2851_v53 }
 0x89c   :  { %v2853_v40 = vmul.f32 %v3194_v60, %v2852_v45 }
 0x89e   :  { %v2857_v59 = vsel %vm2856_vm12, %v3194_v60, %v2853_v40 }
 0x89f   :  { %v2858_v4 = vmul.f32 %v2857_v59, %v2819_v18 }
 0x8a1   :  { %v2860_v48 = vperm.slane %v2858_v4, 0 }
 0x8a3   :  { %v2862_v34 = vmul.f32 %v2860_v48, %v2831_v12  ;;  %v2863_v24 = vmul.f32 %v2860_v48, %v2832_v39  ;;  %v2864_v63 = vmul.f32 %v2860_v48, %v2833_v26 }
 0x8a5   :  { %v2868_v47 = vadd.f32 %v3188_v10, %v2862_v34  ;;  %v2869_v55 = vadd.f32 %v3188_v10, %v2863_v24  ;;  %v2870_v37 = vadd.f32 %v3188_v10, %v2864_v63 }
 0x8a7   :  { %v2871_v51 = vmax.f32 %v2868_v47, 0.0  ;;  %v2872_v35 = vmax.f32 %v2869_v55, 0.0  ;;  %v2873_v3 = vmax.f32 %v2870_v37, 0.0 }
 0x8a9   :  { %2874 = vst [vmem:[%s4724_s12] sm:$0xff] %v2871_v51 }
 0x8aa   :  { %2875 = vst [vmem:[%s4724_s12 + $0x8] sm:$0xff] %v2872_v35 }
 0x8ab   :  { %2876 = vst [vmem:[%s4724_s12 + $0x10] sm:$0x3] %v2873_v3 }
 0x8ac   :  { %2881 = vsyncpa [#allocation3], 1 }
 0x8ad   :  { %2882 = vsyncpa [#allocation5], 1 }

</bundles_post_ra>
